<compile_context>
chip_gen: v7x
topology: tpu7x:2x2x1
jax: 0.10.0
libtpu: 0.0.40
codegen_flags: <defaults>
</compile_context>

<pallas_src>
import functools

import jax
import jax.numpy as jnp
from jax import lax
from jax.experimental import pallas as pl
from jax.experimental.pallas import tpu as pltpu

N_HEADS = 4
EPS = 1e-5

_LAYER_KEYS = ("ln1_w", "ln1_b", "in_w", "in_b", "out_w", "out_b",
               "ln2_w", "ln2_b", "fc1_w", "fc1_b", "fc2_w", "fc2_b")


def _layernorm(x, w, b):
    mu = jnp.mean(x, axis=-1, keepdims=True)
    var = jnp.mean((x - mu) ** 2, axis=-1, keepdims=True)
    return (x - mu) * lax.rsqrt(var + EPS) * w + b


def _bf16(x):
    return x.astype(jnp.bfloat16)


def _resblock(x, w):
    """One CLIP residual attention block (no mask) on an (S, D) f32 slab.

    Matmul weights arrive in bf16; activations are cast to bf16 once per tile
    for each MXU matmul with f32 accumulation.  in_w/in_b q-columns are
    pre-scaled by 1/sqrt(dh) in the wrapper.
    """
    S, D = x.shape
    dh = D // N_HEADS

    # ---- multi-head self-attention ----
    y = _layernorm(x, w["ln1_w"], w["ln1_b"])
    qkv = jnp.dot(_bf16(y), w["in_w"], preferred_element_type=jnp.float32) + w["in_b"]
    qkv = _bf16(qkv)  # one whole-tile cast instead of 3*H sliced casts
    heads = []
    # TODO(synk): at real CLIP head counts (H=12) switch this static unroll to a
    # lax.fori_loop with pl.ds(pl.multiple_of(h*dh, dh)) slices to bound live ranges.
    for h in range(N_HEADS):
        qh = qkv[:, h * dh:(h + 1) * dh]
        kh = qkv[:, D + h * dh:D + (h + 1) * dh]
        vh = qkv[:, 2 * D + h * dh:2 * D + (h + 1) * dh]
        # Contract the head dim of K directly: no materialized kh.T (XLU vxpose).
        s = lax.dot_general(qh, kh, (((1,), (1,)), ((), ())),
                            preferred_element_type=jnp.float32)      # (S, S)
        s = s - jnp.max(s, axis=-1, keepdims=True)                   # f32 softmax
        p = jnp.exp(s)
        p = p * pl.reciprocal(jnp.sum(p, axis=-1, keepdims=True), approx=True)
        heads.append(jnp.dot(_bf16(p), vh, preferred_element_type=jnp.float32))
    # One full-K (D x D) output projection instead of H partial-K matmuls.
    attn = _bf16(jnp.concatenate(heads, axis=-1))                    # (S, D) bf16
    attn = jnp.dot(attn, w["out_w"], preferred_element_type=jnp.float32) + w["out_b"]
    x = x + attn

    # ---- MLP with QuickGELU (kept in f32: no bf16 VPU/EUP on v5e) ----
    y = _layernorm(x, w["ln2_w"], w["ln2_b"])
    h1 = jnp.dot(_bf16(y), w["fc1_w"], preferred_element_type=jnp.float32) + w["fc1_b"]
    h1 = h1 * jax.nn.sigmoid(1.702 * h1)
    h2 = jnp.dot(_bf16(h1), w["fc2_w"], preferred_element_type=jnp.float32) + w["fc2_b"]
    return x + h2


# ------------------------------- fused kernel --------------------------------
def _encoder_kernel(x_ref, prompt_ref, cvec_ref, proj_ref,
                    in_w_ref, out_w_ref, fc1_w_ref, fc2_w_ref,
                    vec_d_ref, vec_w_ref,
                    o_ref, x_sc, *, Bn, S1, L1, L2):
    l = pl.program_id(1)
    D = x_ref.shape[-1]

    # ---- init: ln_pre(x) into rows [:S1], raw prompt appended at the end ----
    @pl.when(l == 0)
    def _():
        pre_w = cvec_ref[0:1, :]
        pre_b = cvec_ref[1:2, :]
        for b in range(Bn):
            x_sc[b, :S1, :] = _layernorm(x_ref[b], pre_w, pre_b)
            x_sc[b, S1:, :] = prompt_ref[b]          # prompt is NOT pre-normalized

    # ---- this layer's weights: loaded once, reused for all Bn batch elems ----
    w = dict(
        ln1_w=vec_d_ref[0, 0:1, :], ln1_b=vec_d_ref[0, 1:2, :],
        out_b=vec_d_ref[0, 2:3, :],
        ln2_w=vec_d_ref[0, 3:4, :], ln2_b=vec_d_ref[0, 4:5, :],
        fc2_b=vec_d_ref[0, 5:6, :],
        fc1_b=vec_w_ref[0, 0:1, :],
        in_b=vec_w_ref[0, 1:2, :3 * D],
        in_w=in_w_ref[0], out_w=out_w_ref[0],
        fc1_w=fc1_w_ref[0], fc2_w=fc2_w_ref[0])

    # ---- stage 1: layers [0, L1) act on the first S1 rows only ----
    @pl.when(l < L1)
    def _():
        for b in range(Bn):
            x_sc[b, :S1, :] = _resblock(x_sc[b, :S1, :], w)

    # ---- stage 2: layers [L1, L1+L2) act on the full S2-row sequence ----
    @pl.when(l >= L1)
    def _():
        for b in range(Bn):
            x_sc[b, :, :] = _resblock(x_sc[b, :, :], w)

    # ---- finalize: gather CLS, ln_post on 1 row, project ----
    @pl.when(l == L1 + L2 - 1)
    def _():
        post_w = cvec_ref[2:3, :]
        post_b = cvec_ref[3:4, :]
        for b in range(Bn):
            cls = _layernorm(x_sc[b, 0:1, :], post_w, post_b)        # (1, D)
            o_ref[b] = jnp.dot(_bf16(cls), proj_ref[...],
                               preferred_element_type=jnp.float32)   # (1, P)


# --------------------------- pallas_call wrapper ------------------------------
def _compiler_params():
    # Per-generation VMEM budget: leave 16 MiB headroom on v7x (64 MiB physical),
    # use up to 100 MiB of v5e/v6e's 128 MiB.
    cap = 64 * 1024 * 1024
    try:
        info = pltpu.get_tpu_info()
        cap = int(getattr(info, "vmem_capacity_bytes", cap) or cap)
    except Exception:
        pass
    limit = min(max(cap - 16 * 1024 * 1024, 32 * 1024 * 1024), 100 * 1024 * 1024)
    return pltpu.CompilerParams(
        dimension_semantics=("parallel", "arbitrary"),   # batch tiles across TCs
        vmem_limit_bytes=int(limit))


def _pick_batch_tile(N):
    # Weight-DMA amortization factor.  Keep it modest so the (Bn, S2, D) scratch
    # plus double-buffered per-layer weights still fit v7x's 64 MiB VMEM.
    for bn in (4, 2, 1):
        if N % bn == 0:
            return bn
    return 1


def _pack_params(params):
    """Kernel-side layout: unified (L1+L2)-layer tower, bf16 matmul weights with
    the 1/sqrt(dh) q-scale folded into in_proj, and the 8 small per-layer
    vectors packed into two arrays (6 DMA descriptors/layer instead of 12)."""
    t1, t2 = params["t1"], params["t2"]
    t = {k: jnp.concatenate([t1[k], t2[k]], axis=0) for k in _LAYER_KEYS}
    nl, D, _ = t["in_w"].shape
    dh = D // N_HEADS
    scale = dh ** -0.5
    in_w = t["in_w"].at[:, :, :D].multiply(scale)
    in_b = t["in_b"].at[:, :, :D].multiply(scale)
    vec_d = jnp.concatenate(
        [t["ln1_w"], t["ln1_b"], t["out_b"], t["ln2_w"], t["ln2_b"], t["fc2_b"]],
        axis=1)                                                      # (nl, 6, D)
    in_b_pad = jnp.pad(in_b, ((0, 0), (0, 0), (0, D)))               # (nl, 1, 4D)
    vec_wide = jnp.concatenate([t["fc1_b"], in_b_pad], axis=1)       # (nl, 2, 4D)
    cvec = jnp.concatenate([params["pre_ln_w"], params["pre_ln_b"],
                            params["post_ln_w"], params["post_ln_b"]], axis=0)  # (4, D)
    return dict(
        cvec=cvec, vec_d=vec_d, vec_wide=vec_wide,
        in_w=in_w.astype(jnp.bfloat16),
        out_w=t["out_w"].astype(jnp.bfloat16),
        fc1_w=t["fc1_w"].astype(jnp.bfloat16),
        fc2_w=t["fc2_w"].astype(jnp.bfloat16),
        proj=params["proj"].astype(jnp.bfloat16))


def visual_encoder_int(params, x, prompt, *, batch_tile=None):
    """x: (N, S1, D) embedded visual tokens (CLS first); prompt: (N, n_ctx, D)."""
    N, S1, D = x.shape
    n_ctx = prompt.shape[1]
    S2 = S1 + n_ctx
    L1 = params["t1"]["ln1_w"].shape[0]
    L2 = params["t2"]["ln1_w"].shape[0]
    n_layers = L1 + L2
    P = params["proj"].shape[-1]
    Bn = batch_tile if batch_tile is not None else _pick_batch_tile(N)
    assert N % Bn == 0

    kp = _pack_params(params)
    kernel = functools.partial(_encoder_kernel, Bn=Bn, S1=S1, L1=L1, L2=L2)

    per_layer = [kp["in_w"], kp["out_w"], kp["fc1_w"], kp["fc2_w"],
                 kp["vec_d"], kp["vec_wide"]]

    def _pl_spec(a):
        nd = a.ndim
        return pl.BlockSpec((1,) + a.shape[1:],
                            lambda n, l, _nd=nd: (l,) + (0,) * (_nd - 1))

    def _const_spec(a):
        nd = a.ndim
        return pl.BlockSpec(a.shape, lambda n, l, _nd=nd: (0,) * _nd)

    in_specs = ([pl.BlockSpec((Bn, S1, D), lambda n, l: (n, 0, 0)),
                 pl.BlockSpec((Bn, n_ctx, D), lambda n, l: (n, 0, 0)),
                 _const_spec(kp["cvec"]), _const_spec(kp["proj"])]
                + [_pl_spec(a) for a in per_layer])

    out = pl.pallas_call(
        kernel,
        out_shape=jax.ShapeDtypeStruct((N, 1, P), jnp.float32),
        grid_spec=pltpu.PrefetchScalarGridSpec(
            num_scalar_prefetch=0,
            grid=(N // Bn, n_layers),
            in_specs=in_specs,
            out_specs=pl.BlockSpec((Bn, 1, P), lambda n, l: (n, 0, 0)),
            scratch_shapes=[pltpu.VMEM((Bn, S2, D), jnp.float32)]),
        compiler_params=_compiler_params(),
    )(x, prompt, kp["cvec"], kp["proj"], *per_layer)
    return out.reshape(N, P)


# ----------------------- deterministic parameter init ------------------------
def init_params(key, *, L1, L2, D, P):
    # TODO(synk): the PyTorch module loads pretrained CLIP weights via clip.load;
    # here the same parameter structure is random-initialized deterministically.
    H4 = 4 * D

    def nrm(k, shape, s=0.02):
        return (s * jax.random.normal(k, shape)).astype(jnp.float32)

    def tower(k, nl):
        ks = jax.random.split(k, 12)
        return dict(
            ln1_w=(1.0 + nrm(ks[0], (nl, 1, D))), ln1_b=nrm(ks[1], (nl, 1, D)),
            in_w=nrm(ks[2], (nl, D, 3 * D)), in_b=nrm(ks[3], (nl, 1, 3 * D)),
            out_w=nrm(ks[4], (nl, D, D)), out_b=nrm(ks[5], (nl, 1, D)),
            ln2_w=(1.0 + nrm(ks[6], (nl, 1, D))), ln2_b=nrm(ks[7], (nl, 1, D)),
            fc1_w=nrm(ks[8], (nl, D, H4)), fc1_b=nrm(ks[9], (nl, 1, H4)),
            fc2_w=nrm(ks[10], (nl, H4, D)), fc2_b=nrm(ks[11], (nl, 1, D)))

    k1, k2, k3 = jax.random.split(key, 3)
    ks = jax.random.split(k3, 5)
    return dict(
        pre_ln_w=(1.0 + nrm(ks[0], (1, D))), pre_ln_b=nrm(ks[1], (1, D)),
        t1=tower(k1, L1), t2=tower(k2, L2),
        post_ln_w=(1.0 + nrm(ks[2], (1, D))), post_ln_b=nrm(ks[3], (1, D)),
        proj=nrm(ks[4], (D, P)))


# ----------------------------- pure-JAX reference ----------------------------
# The reference keeps the original insert-after-CLS ordering, so it also
# validates the prompt-append reordering used inside the kernel.
def _ref_block(x, t, l):
    D = x.shape[-1]
    dh = D // N_HEADS
    scale = dh ** -0.5
    y = _layernorm(x, t["ln1_w"][l], t["ln1_b"][l])
    qkv = y @ t["in_w"][l] + t["in_b"][l]
    q, k, v = qkv[:, :D], qkv[:, D:2 * D], qkv[:, 2 * D:]
    heads = []
    for h in range(N_HEADS):
        qh = q[:, h * dh:(h + 1) * dh]
        kh = k[:, h * dh:(h + 1) * dh]
        vh = v[:, h * dh:(h + 1) * dh]
        p = jax.nn.softmax(qh @ kh.T * scale, axis=-1)
        heads.append(p @ vh)
    attn = jnp.concatenate(heads, axis=-1) @ t["out_w"][l] + t["out_b"][l]
    x = x + attn
    y = _layernorm(x, t["ln2_w"][l], t["ln2_b"][l])
    h1 = y @ t["fc1_w"][l] + t["fc1_b"][l]
    h1 = h1 * jax.nn.sigmoid(1.702 * h1)
    return x + h1 @ t["fc2_w"][l] + t["fc2_b"][l]


def reference_single(params, x1, prompt1):
    x = _layernorm(x1, params["pre_ln_w"], params["pre_ln_b"])
    for l in range(params["t1"]["ln1_w"].shape[0]):
        x = _ref_block(x, params["t1"], l)
    x = jnp.concatenate([x[:1], prompt1, x[1:]], axis=0)
    for l in range(params["t2"]["ln1_w"].shape[0]):
        x = _ref_block(x, params["t2"], l)
    cls = _layernorm(x[0:1], params["post_ln_w"], params["post_ln_b"])
    return (cls @ params["proj"])[0]


if __name__ == "__main__":
    # Small shapes consistent with the module: N batch, S1 visual tokens
    # (CLS + patches), n_ctx prompt tokens inserted after CLS, width D,
    # projection dim P, L1 blocks before insertion, L2 after.
    N, S1, n_ctx, D, P = 2, 12, 4, 32, 16
    L1, L2 = 2, 2

    key = jax.random.PRNGKey(0)
    kparam, kx, kpr = jax.random.split(key, 3)
    params = init_params(kparam, L1=L1, L2=L2, D=D, P=P)
    x = jax.random.normal(kx, (N, S1, D), dtype=jnp.float32)
    prompt = jax.random.normal(kpr, (N, n_ctx, D), dtype=jnp.float32)

    out = jax.jit(visual_encoder_int)(params, x, prompt)
    out = jax.block_until_ready(out)

    ref = jax.vmap(lambda x1, p1: reference_single(params, x1, p1))(x, prompt)
    assert out.shape == (N, P)
    assert jnp.allclose(out, ref, rtol=2e-2, atol=2e-2), (
        "mismatch vs reference: max abs err = %e"
        % float(jnp.max(jnp.abs(out - ref))))

    print("KERNEL_OK")
</pallas_src>

<mosaic_0001>
module attributes {stable_mosaic.version = 11 : i64} {
  func.func @_encoder_kernel(%arg0: i32, %arg1: i32, %arg2: memref<2x12x32xf32, #tpu.memory_space<vmem>>, %arg3: memref<2x4x32xf32, #tpu.memory_space<vmem>>, %arg4: memref<4x32xf32, #tpu.memory_space<vmem>>, %arg5: memref<32x16xbf16, #tpu.memory_space<vmem>>, %arg6: memref<1x32x96xbf16, #tpu.memory_space<vmem>>, %arg7: memref<1x32x32xbf16, #tpu.memory_space<vmem>>, %arg8: memref<1x32x128xbf16, #tpu.memory_space<vmem>>, %arg9: memref<1x128x32xbf16, #tpu.memory_space<vmem>>, %arg10: memref<1x6x32xf32, #tpu.memory_space<vmem>>, %arg11: memref<1x2x128xf32, #tpu.memory_space<vmem>>, %arg12: memref<2x1x16xf32, #tpu.memory_space<vmem>>, %arg13: memref<2x16x32xf32, #tpu.memory_space<vmem>>) attributes {dimension_semantics = [#tpu.dimension_semantics<parallel>, #tpu.dimension_semantics<arbitrary>], iteration_bounds = array<i64: 1, 4>, scalar_prefetch = 0 : i64, scratch_operands = 1 : i64, tpu.core_type = #tpu.core_type<tc>, window_params = [{transform_indices = @transform_0, window_bounds = array<i64: 2, 12, 32>}, {transform_indices = @transform_1, window_bounds = array<i64: 2, 4, 32>}, {pipeline_mode = #tpu.pipeline_mode<synchronous>, transform_indices = @transform_2, window_bounds = array<i64: 4, 32>}, {pipeline_mode = #tpu.pipeline_mode<synchronous>, transform_indices = @transform_3, window_bounds = array<i64: 32, 16>}, {transform_indices = @transform_4, window_bounds = array<i64: 1, 32, 96>}, {transform_indices = @transform_5, window_bounds = array<i64: 1, 32, 32>}, {transform_indices = @transform_6, window_bounds = array<i64: 1, 32, 128>}, {transform_indices = @transform_7, window_bounds = array<i64: 1, 128, 32>}, {transform_indices = @transform_8, window_bounds = array<i64: 1, 6, 32>}, {transform_indices = @transform_9, window_bounds = array<i64: 1, 2, 128>}, {transform_indices = @transform_10, window_bounds = array<i64: 2, 1, 16>}]} {
    %c0_i32 = arith.constant 0 : i32
    %0 = arith.cmpi eq, %arg1, %c0_i32 : i32
    %1 = arith.extui %0 : i1 to i32
    %c0_i32_0 = arith.constant 0 : i32
    %2 = arith.cmpi ne, %1, %c0_i32_0 : i32
    scf.if %2 {
      %c0_35 = arith.constant 0 : index
      %c0_36 = arith.constant 0 : index
      %36 = vector.load %arg4[%c0_35, %c0_36] : memref<4x32xf32, #tpu.memory_space<vmem>>, vector<1x32xf32>
      %c1_37 = arith.constant 1 : index
      %c0_38 = arith.constant 0 : index
      %37 = vector.load %arg4[%c1_37, %c0_38] : memref<4x32xf32, #tpu.memory_space<vmem>>, vector<1x32xf32>
      %c0_39 = arith.constant 0 : index
      %c0_40 = arith.constant 0 : index
      %c0_41 = arith.constant 0 : index
      %38 = vector.load %arg2[%c0_39, %c0_40, %c0_41] : memref<2x12x32xf32, #tpu.memory_space<vmem>>, vector<1x12x32xf32>
      %39 = vector.shape_cast %38 : vector<1x12x32xf32> to vector<12x32xf32>
      %cst = arith.constant dense<0.000000e+00> : vector<12xf32>
      %40 = vector.multi_reduction <add>, %39, %cst [1] : vector<12x32xf32> to vector<12xf32>
      %41 = vector.shape_cast %40 : vector<12xf32> to vector<12x1xf32>
      %cst_42 = arith.constant 3.200000e+01 : f32
      %42 = vector.broadcast %cst_42 : f32 to vector<12x1xf32>
      %43 = arith.divf %41, %42 : vector<12x1xf32>
      %44 = vector.broadcast %43 : vector<12x1xf32> to vector<12x32xf32>
      %45 = arith.subf %39, %44 : vector<12x32xf32>
      %46 = arith.mulf %45, %45 : vector<12x32xf32>
      %cst_43 = arith.constant dense<0.000000e+00> : vector<12xf32>
      %47 = vector.multi_reduction <add>, %46, %cst_43 [1] : vector<12x32xf32> to vector<12xf32>
      %48 = vector.shape_cast %47 : vector<12xf32> to vector<12x1xf32>
      %cst_44 = arith.constant 3.200000e+01 : f32
      %49 = vector.broadcast %cst_44 : f32 to vector<12x1xf32>
      %50 = arith.divf %48, %49 : vector<12x1xf32>
      %51 = vector.broadcast %43 : vector<12x1xf32> to vector<12x32xf32>
      %52 = arith.subf %39, %51 : vector<12x32xf32>
      %cst_45 = arith.constant 9.99999974E-6 : f32
      %53 = vector.broadcast %cst_45 : f32 to vector<12x1xf32>
      %54 = arith.addf %50, %53 : vector<12x1xf32>
      %55 = math.rsqrt %54 : vector<12x1xf32>
      %56 = vector.broadcast %55 : vector<12x1xf32> to vector<12x32xf32>
      %57 = arith.mulf %52, %56 : vector<12x32xf32>
      %58 = vector.broadcast %36 : vector<1x32xf32> to vector<12x32xf32>
      %59 = arith.mulf %57, %58 : vector<12x32xf32>
      %60 = vector.broadcast %37 : vector<1x32xf32> to vector<12x32xf32>
      %61 = arith.addf %59, %60 : vector<12x32xf32>
      %c0_46 = arith.constant 0 : index
      %c0_47 = arith.constant 0 : index
      %c0_48 = arith.constant 0 : index
      %62 = vector.load %arg13[%c0_46, %c0_47, %c0_48] : memref<2x16x32xf32, #tpu.memory_space<vmem>>, vector<1x12x32xf32>
      %63 = vector.shape_cast %62 : vector<1x12x32xf32> to vector<12x32xf32>
      %64 = vector.shape_cast %61 : vector<12x32xf32> to vector<1x12x32xf32>
      tpu.vector_store %arg13[%c0_46, %c0_47, %c0_48], %64 {strides = array<i32>} : memref<2x16x32xf32, #tpu.memory_space<vmem>>, vector<1x12x32xf32>,
      %c0_49 = arith.constant 0 : index
      %c0_50 = arith.constant 0 : index
      %c0_51 = arith.constant 0 : index
      %65 = vector.load %arg3[%c0_49, %c0_50, %c0_51] : memref<2x4x32xf32, #tpu.memory_space<vmem>>, vector<1x4x32xf32>
      %66 = vector.shape_cast %65 : vector<1x4x32xf32> to vector<4x32xf32>
      %c0_52 = arith.constant 0 : index
      %c12 = arith.constant 12 : index
      %c0_53 = arith.constant 0 : index
      %67 = vector.load %arg13[%c0_52, %c12, %c0_53] : memref<2x16x32xf32, #tpu.memory_space<vmem>>, vector<1x4x32xf32>
      %68 = vector.shape_cast %67 : vector<1x4x32xf32> to vector<4x32xf32>
      %69 = vector.shape_cast %66 : vector<4x32xf32> to vector<1x4x32xf32>
      tpu.vector_store %arg13[%c0_52, %c12, %c0_53], %69 {strides = array<i32>} : memref<2x16x32xf32, #tpu.memory_space<vmem>>, vector<1x4x32xf32>,
      %c1_54 = arith.constant 1 : index
      %c0_55 = arith.constant 0 : index
      %c0_56 = arith.constant 0 : index
      %70 = vector.load %arg2[%c1_54, %c0_55, %c0_56] : memref<2x12x32xf32, #tpu.memory_space<vmem>>, vector<1x12x32xf32>
      %71 = vector.shape_cast %70 : vector<1x12x32xf32> to vector<12x32xf32>
      %cst_57 = arith.constant dense<0.000000e+00> : vector<12xf32>
      %72 = vector.multi_reduction <add>, %71, %cst_57 [1] : vector<12x32xf32> to vector<12xf32>
      %73 = vector.shape_cast %72 : vector<12xf32> to vector<12x1xf32>
      %cst_58 = arith.constant 3.200000e+01 : f32
      %74 = vector.broadcast %cst_58 : f32 to vector<12x1xf32>
      %75 = arith.divf %73, %74 : vector<12x1xf32>
      %76 = vector.broadcast %75 : vector<12x1xf32> to vector<12x32xf32>
      %77 = arith.subf %71, %76 : vector<12x32xf32>
      %78 = arith.mulf %77, %77 : vector<12x32xf32>
      %cst_59 = arith.constant dense<0.000000e+00> : vector<12xf32>
      %79 = vector.multi_reduction <add>, %78, %cst_59 [1] : vector<12x32xf32> to vector<12xf32>
      %80 = vector.shape_cast %79 : vector<12xf32> to vector<12x1xf32>
      %cst_60 = arith.constant 3.200000e+01 : f32
      %81 = vector.broadcast %cst_60 : f32 to vector<12x1xf32>
      %82 = arith.divf %80, %81 : vector<12x1xf32>
      %83 = vector.broadcast %75 : vector<12x1xf32> to vector<12x32xf32>
      %84 = arith.subf %71, %83 : vector<12x32xf32>
      %cst_61 = arith.constant 9.99999974E-6 : f32
      %85 = vector.broadcast %cst_61 : f32 to vector<12x1xf32>
      %86 = arith.addf %82, %85 : vector<12x1xf32>
      %87 = math.rsqrt %86 : vector<12x1xf32>
      %88 = vector.broadcast %87 : vector<12x1xf32> to vector<12x32xf32>
      %89 = arith.mulf %84, %88 : vector<12x32xf32>
      %90 = vector.broadcast %36 : vector<1x32xf32> to vector<12x32xf32>
      %91 = arith.mulf %89, %90 : vector<12x32xf32>
      %92 = vector.broadcast %37 : vector<1x32xf32> to vector<12x32xf32>
      %93 = arith.addf %91, %92 : vector<12x32xf32>
      %c1_62 = arith.constant 1 : index
      %c0_63 = arith.constant 0 : index
      %c0_64 = arith.constant 0 : index
      %94 = vector.load %arg13[%c1_62, %c0_63, %c0_64] : memref<2x16x32xf32, #tpu.memory_space<vmem>>, vector<1x12x32xf32>
      %95 = vector.shape_cast %94 : vector<1x12x32xf32> to vector<12x32xf32>
      %96 = vector.shape_cast %93 : vector<12x32xf32> to vector<1x12x32xf32>
      tpu.vector_store %arg13[%c1_62, %c0_63, %c0_64], %96 {strides = array<i32>} : memref<2x16x32xf32, #tpu.memory_space<vmem>>, vector<1x12x32xf32>,
      %c1_65 = arith.constant 1 : index
      %c0_66 = arith.constant 0 : index
      %c0_67 = arith.constant 0 : index
      %97 = vector.load %arg3[%c1_65, %c0_66, %c0_67] : memref<2x4x32xf32, #tpu.memory_space<vmem>>, vector<1x4x32xf32>
      %98 = vector.shape_cast %97 : vector<1x4x32xf32> to vector<4x32xf32>
      %c1_68 = arith.constant 1 : index
      %c12_69 = arith.constant 12 : index
      %c0_70 = arith.constant 0 : index
      %99 = vector.load %arg13[%c1_68, %c12_69, %c0_70] : memref<2x16x32xf32, #tpu.memory_space<vmem>>, vector<1x4x32xf32>
      %100 = vector.shape_cast %99 : vector<1x4x32xf32> to vector<4x32xf32>
      %101 = vector.shape_cast %98 : vector<4x32xf32> to vector<1x4x32xf32>
      tpu.vector_store %arg13[%c1_68, %c12_69, %c0_70], %101 {strides = array<i32>} : memref<2x16x32xf32, #tpu.memory_space<vmem>>, vector<1x4x32xf32>,
    } else {
    }
    %c0 = arith.constant 0 : index
    %c0_1 = arith.constant 0 : index
    %c0_2 = arith.constant 0 : index
    %3 = vector.load %arg10[%c0, %c0_1, %c0_2] : memref<1x6x32xf32, #tpu.memory_space<vmem>>, vector<1x1x32xf32>
    %4 = vector.shape_cast %3 : vector<1x1x32xf32> to vector<1x32xf32>
    %c0_3 = arith.constant 0 : index
    %c1 = arith.constant 1 : index
    %c0_4 = arith.constant 0 : index
    %5 = vector.load %arg10[%c0_3, %c1, %c0_4] : memref<1x6x32xf32, #tpu.memory_space<vmem>>, vector<1x1x32xf32>
    %6 = vector.shape_cast %5 : vector<1x1x32xf32> to vector<1x32xf32>
    %c0_5 = arith.constant 0 : index
    %c2 = arith.constant 2 : index
    %c0_6 = arith.constant 0 : index
    %7 = vector.load %arg10[%c0_5, %c2, %c0_6] : memref<1x6x32xf32, #tpu.memory_space<vmem>>, vector<1x1x32xf32>
    %8 = vector.shape_cast %7 : vector<1x1x32xf32> to vector<1x32xf32>
    %c0_7 = arith.constant 0 : index
    %c3 = arith.constant 3 : index
    %c0_8 = arith.constant 0 : index
    %9 = vector.load %arg10[%c0_7, %c3, %c0_8] : memref<1x6x32xf32, #tpu.memory_space<vmem>>, vector<1x1x32xf32>
    %10 = vector.shape_cast %9 : vector<1x1x32xf32> to vector<1x32xf32>
    %c0_9 = arith.constant 0 : index
    %c4 = arith.constant 4 : index
    %c0_10 = arith.constant 0 : index
    %11 = vector.load %arg10[%c0_9, %c4, %c0_10] : memref<1x6x32xf32, #tpu.memory_space<vmem>>, vector<1x1x32xf32>
    %12 = vector.shape_cast %11 : vector<1x1x32xf32> to vector<1x32xf32>
    %c0_11 = arith.constant 0 : index
    %c5 = arith.constant 5 : index
    %c0_12 = arith.constant 0 : index
    %13 = vector.load %arg10[%c0_11, %c5, %c0_12] : memref<1x6x32xf32, #tpu.memory_space<vmem>>, vector<1x1x32xf32>
    %14 = vector.shape_cast %13 : vector<1x1x32xf32> to vector<1x32xf32>
    %c0_13 = arith.constant 0 : index
    %c0_14 = arith.constant 0 : index
    %c0_15 = arith.constant 0 : index
    %15 = vector.load %arg11[%c0_13, %c0_14, %c0_15] : memref<1x2x128xf32, #tpu.memory_space<vmem>>, vector<1x1x128xf32>
    %16 = vector.shape_cast %15 : vector<1x1x128xf32> to vector<1x128xf32>
    %c0_16 = arith.constant 0 : index
    %c1_17 = arith.constant 1 : index
    %c0_18 = arith.constant 0 : index
    %17 = vector.load %arg11[%c0_16, %c1_17, %c0_18] : memref<1x2x128xf32, #tpu.memory_space<vmem>>, vector<1x1x96xf32>
    %18 = vector.shape_cast %17 : vector<1x1x96xf32> to vector<1x96xf32>
    %c0_19 = arith.constant 0 : index
    %c0_20 = arith.constant 0 : index
    %c0_21 = arith.constant 0 : index
    %19 = vector.load %arg6[%c0_19, %c0_20, %c0_21] : memref<1x32x96xbf16, #tpu.memory_space<vmem>>, vector<1x32x96xbf16>
    %20 = vector.shape_cast %19 : vector<1x32x96xbf16> to vector<32x96xbf16>
    %c0_22 = arith.constant 0 : index
    %c0_23 = arith.constant 0 : index
    %c0_24 = arith.constant 0 : index
    %21 = vector.load %arg7[%c0_22, %c0_23, %c0_24] : memref<1x32x32xbf16, #tpu.memory_space<vmem>>, vector<1x32x32xbf16>
    %22 = vector.shape_cast %21 : vector<1x32x32xbf16> to vector<32x32xbf16>
    %c0_25 = arith.constant 0 : index
    %c0_26 = arith.constant 0 : index
    %c0_27 = arith.constant 0 : index
    %23 = vector.load %arg8[%c0_25, %c0_26, %c0_27] : memref<1x32x128xbf16, #tpu.memory_space<vmem>>, vector<1x32x128xbf16>
    %24 = vector.shape_cast %23 : vector<1x32x128xbf16> to vector<32x128xbf16>
    %c0_28 = arith.constant 0 : index
    %c0_29 = arith.constant 0 : index
    %c0_30 = arith.constant 0 : index
    %25 = vector.load %arg9[%c0_28, %c0_29, %c0_30] : memref<1x128x32xbf16, #tpu.memory_space<vmem>>, vector<1x128x32xbf16>
    %26 = vector.shape_cast %25 : vector<1x128x32xbf16> to vector<128x32xbf16>
    %c2_i32 = arith.constant 2 : i32
    %27 = arith.cmpi slt, %arg1, %c2_i32 : i32
    %28 = arith.extui %27 : i1 to i32
    %c0_i32_31 = arith.constant 0 : i32
    %29 = arith.cmpi ne, %28, %c0_i32_31 : i32
    scf.if %29 {
      %c0_35 = arith.constant 0 : index
      %c0_36 = arith.constant 0 : index
      %c0_37 = arith.constant 0 : index
      %36 = vector.load %arg13[%c0_35, %c0_36, %c0_37] : memref<2x16x32xf32, #tpu.memory_space<vmem>>, vector<1x12x32xf32>
      %37 = vector.shape_cast %36 : vector<1x12x32xf32> to vector<12x32xf32>
      %cst = arith.constant dense<0.000000e+00> : vector<12xf32>
      %38 = vector.multi_reduction <add>, %37, %cst [1] : vector<12x32xf32> to vector<12xf32>
      %39 = vector.shape_cast %38 : vector<12xf32> to vector<12x1xf32>
      %cst_38 = arith.constant 3.200000e+01 : f32
      %40 = vector.broadcast %cst_38 : f32 to vector<12x1xf32>
      %41 = arith.divf %39, %40 : vector<12x1xf32>
      %42 = vector.broadcast %41 : vector<12x1xf32> to vector<12x32xf32>
      %43 = arith.subf %37, %42 : vector<12x32xf32>
      %44 = arith.mulf %43, %43 : vector<12x32xf32>
      %cst_39 = arith.constant dense<0.000000e+00> : vector<12xf32>
      %45 = vector.multi_reduction <add>, %44, %cst_39 [1] : vector<12x32xf32> to vector<12xf32>
      %46 = vector.shape_cast %45 : vector<12xf32> to vector<12x1xf32>
      %cst_40 = arith.constant 3.200000e+01 : f32
      %47 = vector.broadcast %cst_40 : f32 to vector<12x1xf32>
      %48 = arith.divf %46, %47 : vector<12x1xf32>
      %49 = vector.broadcast %41 : vector<12x1xf32> to vector<12x32xf32>
      %50 = arith.subf %37, %49 : vector<12x32xf32>
      %cst_41 = arith.constant 9.99999974E-6 : f32
      %51 = vector.broadcast %cst_41 : f32 to vector<12x1xf32>
      %52 = arith.addf %48, %51 : vector<12x1xf32>
      %53 = math.rsqrt %52 : vector<12x1xf32>
      %54 = vector.broadcast %53 : vector<12x1xf32> to vector<12x32xf32>
      %55 = arith.mulf %50, %54 : vector<12x32xf32>
      %56 = vector.broadcast %4 : vector<1x32xf32> to vector<12x32xf32>
      %57 = arith.mulf %55, %56 : vector<12x32xf32>
      %58 = vector.broadcast %6 : vector<1x32xf32> to vector<12x32xf32>
      %59 = arith.addf %57, %58 : vector<12x32xf32>
      %60 = arith.truncf %59 : vector<12x32xf32> to vector<12x32xbf16>
      %cst_42 = arith.constant dense<0.000000e+00> : vector<12x96xf32>
      %61 = tpu.matmul %60, %20, %cst_42 {dimension_numbers = #tpu.dot_dimension_numbers<[1], [0], [0], [1], [0, 0, 1, 1], [], []>} : vector<12x32xbf16>, vector<32x96xbf16>, vector<12x96xf32> -> vector<12x96xf32>
      %62 = vector.broadcast %18 : vector<1x96xf32> to vector<12x96xf32>
      %63 = arith.addf %61, %62 : vector<12x96xf32>
      %64 = arith.truncf %63 : vector<12x96xf32> to vector<12x96xbf16>
      %65 = vector.extract_strided_slice %64 {offsets = [0, 0], sizes = [12, 8], strides = [1, 1]} : vector<12x96xbf16> to vector<12x8xbf16>
      %66 = vector.extract_strided_slice %64 {offsets = [0, 32], sizes = [12, 8], strides = [1, 1]} : vector<12x96xbf16> to vector<12x8xbf16>
      %67 = vector.extract_strided_slice %64 {offsets = [0, 64], sizes = [12, 8], strides = [1, 1]} : vector<12x96xbf16> to vector<12x8xbf16>
      %cst_43 = arith.constant dense<0.000000e+00> : vector<12x12xf32>
      %68 = tpu.matmul %65, %66, %cst_43 {dimension_numbers = #tpu.dot_dimension_numbers<[1], [1], [0], [0], [0, 0, 1, 0], [], []>} : vector<12x8xbf16>, vector<12x8xbf16>, vector<12x12xf32> -> vector<12x12xf32>
      %cst_44 = arith.constant dense<0xFF800000> : vector<12xf32>
      %69 = vector.multi_reduction <maximumf>, %68, %cst_44 [1] : vector<12x12xf32> to vector<12xf32>
      %70 = vector.shape_cast %69 : vector<12xf32> to vector<12x1xf32>
      %71 = vector.broadcast %70 : vector<12x1xf32> to vector<12x12xf32>
      %72 = arith.subf %68, %71 : vector<12x12xf32>
      %73 = math.exp %72 : vector<12x12xf32>
      %cst_45 = arith.constant dense<0.000000e+00> : vector<12xf32>
      %74 = vector.multi_reduction <add>, %73, %cst_45 [1] : vector<12x12xf32> to vector<12xf32>
      %75 = vector.shape_cast %74 : vector<12xf32> to vector<12x1xf32>
      %76 = tpu.reciprocal %75 {approx = true} : vector<12x1xf32> -> vector<12x1xf32>
      %77 = vector.broadcast %76 : vector<12x1xf32> to vector<12x12xf32>
      %78 = arith.mulf %73, %77 : vector<12x12xf32>
      %79 = arith.truncf %78 : vector<12x12xf32> to vector<12x12xbf16>
      %cst_46 = arith.constant dense<0.000000e+00> : vector<12x8xf32>
      %80 = tpu.matmul %79, %67, %cst_46 {dimension_numbers = #tpu.dot_dimension_numbers<[1], [0], [0], [1], [0, 0, 1, 1], [], []>} : vector<12x12xbf16>, vector<12x8xbf16>, vector<12x8xf32> -> vector<12x8xf32>
      %81 = vector.extract_strided_slice %64 {offsets = [0, 8], sizes = [12, 8], strides = [1, 1]} : vector<12x96xbf16> to vector<12x8xbf16>
      %82 = vector.extract_strided_slice %64 {offsets = [0, 40], sizes = [12, 8], strides = [1, 1]} : vector<12x96xbf16> to vector<12x8xbf16>
      %83 = vector.extract_strided_slice %64 {offsets = [0, 72], sizes = [12, 8], strides = [1, 1]} : vector<12x96xbf16> to vector<12x8xbf16>
      %cst_47 = arith.constant dense<0.000000e+00> : vector<12x12xf32>
      %84 = tpu.matmul %81, %82, %cst_47 {dimension_numbers = #tpu.dot_dimension_numbers<[1], [1], [0], [0], [0, 0, 1, 0], [], []>} : vector<12x8xbf16>, vector<12x8xbf16>, vector<12x12xf32> -> vector<12x12xf32>
      %cst_48 = arith.constant dense<0xFF800000> : vector<12xf32>
      %85 = vector.multi_reduction <maximumf>, %84, %cst_48 [1] : vector<12x12xf32> to vector<12xf32>
      %86 = vector.shape_cast %85 : vector<12xf32> to vector<12x1xf32>
      %87 = vector.broadcast %86 : vector<12x1xf32> to vector<12x12xf32>
      %88 = arith.subf %84, %87 : vector<12x12xf32>
      %89 = math.exp %88 : vector<12x12xf32>
      %cst_49 = arith.constant dense<0.000000e+00> : vector<12xf32>
      %90 = vector.multi_reduction <add>, %89, %cst_49 [1] : vector<12x12xf32> to vector<12xf32>
      %91 = vector.shape_cast %90 : vector<12xf32> to vector<12x1xf32>
      %92 = tpu.reciprocal %91 {approx = true} : vector<12x1xf32> -> vector<12x1xf32>
      %93 = vector.broadcast %92 : vector<12x1xf32> to vector<12x12xf32>
      %94 = arith.mulf %89, %93 : vector<12x12xf32>
      %95 = arith.truncf %94 : vector<12x12xf32> to vector<12x12xbf16>
      %cst_50 = arith.constant dense<0.000000e+00> : vector<12x8xf32>
      %96 = tpu.matmul %95, %83, %cst_50 {dimension_numbers = #tpu.dot_dimension_numbers<[1], [0], [0], [1], [0, 0, 1, 1], [], []>} : vector<12x12xbf16>, vector<12x8xbf16>, vector<12x8xf32> -> vector<12x8xf32>
      %97 = vector.extract_strided_slice %64 {offsets = [0, 16], sizes = [12, 8], strides = [1, 1]} : vector<12x96xbf16> to vector<12x8xbf16>
      %98 = vector.extract_strided_slice %64 {offsets = [0, 48], sizes = [12, 8], strides = [1, 1]} : vector<12x96xbf16> to vector<12x8xbf16>
      %99 = vector.extract_strided_slice %64 {offsets = [0, 80], sizes = [12, 8], strides = [1, 1]} : vector<12x96xbf16> to vector<12x8xbf16>
      %cst_51 = arith.constant dense<0.000000e+00> : vector<12x12xf32>
      %100 = tpu.matmul %97, %98, %cst_51 {dimension_numbers = #tpu.dot_dimension_numbers<[1], [1], [0], [0], [0, 0, 1, 0], [], []>} : vector<12x8xbf16>, vector<12x8xbf16>, vector<12x12xf32> -> vector<12x12xf32>
      %cst_52 = arith.constant dense<0xFF800000> : vector<12xf32>
      %101 = vector.multi_reduction <maximumf>, %100, %cst_52 [1] : vector<12x12xf32> to vector<12xf32>
      %102 = vector.shape_cast %101 : vector<12xf32> to vector<12x1xf32>
      %103 = vector.broadcast %102 : vector<12x1xf32> to vector<12x12xf32>
      %104 = arith.subf %100, %103 : vector<12x12xf32>
      %105 = math.exp %104 : vector<12x12xf32>
      %cst_53 = arith.constant dense<0.000000e+00> : vector<12xf32>
      %106 = vector.multi_reduction <add>, %105, %cst_53 [1] : vector<12x12xf32> to vector<12xf32>
      %107 = vector.shape_cast %106 : vector<12xf32> to vector<12x1xf32>
      %108 = tpu.reciprocal %107 {approx = true} : vector<12x1xf32> -> vector<12x1xf32>
      %109 = vector.broadcast %108 : vector<12x1xf32> to vector<12x12xf32>
      %110 = arith.mulf %105, %109 : vector<12x12xf32>
      %111 = arith.truncf %110 : vector<12x12xf32> to vector<12x12xbf16>
      %cst_54 = arith.constant dense<0.000000e+00> : vector<12x8xf32>
      %112 = tpu.matmul %111, %99, %cst_54 {dimension_numbers = #tpu.dot_dimension_numbers<[1], [0], [0], [1], [0, 0, 1, 1], [], []>} : vector<12x12xbf16>, vector<12x8xbf16>, vector<12x8xf32> -> vector<12x8xf32>
      %113 = vector.extract_strided_slice %64 {offsets = [0, 24], sizes = [12, 8], strides = [1, 1]} : vector<12x96xbf16> to vector<12x8xbf16>
      %114 = vector.extract_strided_slice %64 {offsets = [0, 56], sizes = [12, 8], strides = [1, 1]} : vector<12x96xbf16> to vector<12x8xbf16>
      %115 = vector.extract_strided_slice %64 {offsets = [0, 88], sizes = [12, 8], strides = [1, 1]} : vector<12x96xbf16> to vector<12x8xbf16>
      %cst_55 = arith.constant dense<0.000000e+00> : vector<12x12xf32>
      %116 = tpu.matmul %113, %114, %cst_55 {dimension_numbers = #tpu.dot_dimension_numbers<[1], [1], [0], [0], [0, 0, 1, 0], [], []>} : vector<12x8xbf16>, vector<12x8xbf16>, vector<12x12xf32> -> vector<12x12xf32>
      %cst_56 = arith.constant dense<0xFF800000> : vector<12xf32>
      %117 = vector.multi_reduction <maximumf>, %116, %cst_56 [1] : vector<12x12xf32> to vector<12xf32>
      %118 = vector.shape_cast %117 : vector<12xf32> to vector<12x1xf32>
      %119 = vector.broadcast %118 : vector<12x1xf32> to vector<12x12xf32>
      %120 = arith.subf %116, %119 : vector<12x12xf32>
      %121 = math.exp %120 : vector<12x12xf32>
      %cst_57 = arith.constant dense<0.000000e+00> : vector<12xf32>
      %122 = vector.multi_reduction <add>, %121, %cst_57 [1] : vector<12x12xf32> to vector<12xf32>
      %123 = vector.shape_cast %122 : vector<12xf32> to vector<12x1xf32>
      %124 = tpu.reciprocal %123 {approx = true} : vector<12x1xf32> -> vector<12x1xf32>
      %125 = vector.broadcast %124 : vector<12x1xf32> to vector<12x12xf32>
      %126 = arith.mulf %121, %125 : vector<12x12xf32>
      %127 = arith.truncf %126 : vector<12x12xf32> to vector<12x12xbf16>
      %cst_58 = arith.constant dense<0.000000e+00> : vector<12x8xf32>
      %128 = tpu.matmul %127, %115, %cst_58 {dimension_numbers = #tpu.dot_dimension_numbers<[1], [0], [0], [1], [0, 0, 1, 1], [], []>} : vector<12x12xbf16>, vector<12x8xbf16>, vector<12x8xf32> -> vector<12x8xf32>
      %129 = tpu.concatenate %80, %96, %112, %128 in 1 : vector<12x8xf32>, vector<12x8xf32>, vector<12x8xf32>, vector<12x8xf32> -> vector<12x32xf32>
      %130 = arith.truncf %129 : vector<12x32xf32> to vector<12x32xbf16>
      %cst_59 = arith.constant dense<0.000000e+00> : vector<12x32xf32>
      %131 = tpu.matmul %130, %22, %cst_59 {dimension_numbers = #tpu.dot_dimension_numbers<[1], [0], [0], [1], [0, 0, 1, 1], [], []>} : vector<12x32xbf16>, vector<32x32xbf16>, vector<12x32xf32> -> vector<12x32xf32>
      %132 = vector.broadcast %8 : vector<1x32xf32> to vector<12x32xf32>
      %133 = arith.addf %131, %132 : vector<12x32xf32>
      %134 = arith.addf %37, %133 : vector<12x32xf32>
      %cst_60 = arith.constant dense<0.000000e+00> : vector<12xf32>
      %135 = vector.multi_reduction <add>, %134, %cst_60 [1] : vector<12x32xf32> to vector<12xf32>
      %136 = vector.shape_cast %135 : vector<12xf32> to vector<12x1xf32>
      %cst_61 = arith.constant 3.200000e+01 : f32
      %137 = vector.broadcast %cst_61 : f32 to vector<12x1xf32>
      %138 = arith.divf %136, %137 : vector<12x1xf32>
      %139 = vector.broadcast %138 : vector<12x1xf32> to vector<12x32xf32>
      %140 = arith.subf %134, %139 : vector<12x32xf32>
      %141 = arith.mulf %140, %140 : vector<12x32xf32>
      %cst_62 = arith.constant dense<0.000000e+00> : vector<12xf32>
      %142 = vector.multi_reduction <add>, %141, %cst_62 [1] : vector<12x32xf32> to vector<12xf32>
      %143 = vector.shape_cast %142 : vector<12xf32> to vector<12x1xf32>
      %cst_63 = arith.constant 3.200000e+01 : f32
      %144 = vector.broadcast %cst_63 : f32 to vector<12x1xf32>
      %145 = arith.divf %143, %144 : vector<12x1xf32>
      %146 = vector.broadcast %138 : vector<12x1xf32> to vector<12x32xf32>
      %147 = arith.subf %134, %146 : vector<12x32xf32>
      %cst_64 = arith.constant 9.99999974E-6 : f32
      %148 = vector.broadcast %cst_64 : f32 to vector<12x1xf32>
      %149 = arith.addf %145, %148 : vector<12x1xf32>
      %150 = math.rsqrt %149 : vector<12x1xf32>
      %151 = vector.broadcast %150 : vector<12x1xf32> to vector<12x32xf32>
      %152 = arith.mulf %147, %151 : vector<12x32xf32>
      %153 = vector.broadcast %10 : vector<1x32xf32> to vector<12x32xf32>
      %154 = arith.mulf %152, %153 : vector<12x32xf32>
      %155 = vector.broadcast %12 : vector<1x32xf32> to vector<12x32xf32>
      %156 = arith.addf %154, %155 : vector<12x32xf32>
      %157 = arith.truncf %156 : vector<12x32xf32> to vector<12x32xbf16>
      %cst_65 = arith.constant dense<0.000000e+00> : vector<12x128xf32>
      %158 = tpu.matmul %157, %24, %cst_65 {dimension_numbers = #tpu.dot_dimension_numbers<[1], [0], [0], [1], [0, 0, 1, 1], [], []>} : vector<12x32xbf16>, vector<32x128xbf16>, vector<12x128xf32> -> vector<12x128xf32>
      %159 = vector.broadcast %16 : vector<1x128xf32> to vector<12x128xf32>
      %160 = arith.addf %158, %159 : vector<12x128xf32>
      %cst_66 = arith.constant 1.702000e+00 : f32
      %161 = vector.broadcast %cst_66 : f32 to vector<12x128xf32>
      %162 = arith.mulf %161, %160 : vector<12x128xf32>
      %163 = arith.negf %162 : vector<12x128xf32>
      %164 = math.exp %163 : vector<12x128xf32>
      %cst_67 = arith.constant 1.000000e+00 : f32
      %165 = vector.broadcast %cst_67 : f32 to vector<12x128xf32>
      %166 = arith.addf %165, %164 : vector<12x128xf32>
      %167 = arith.divf %165, %166 : vector<12x128xf32>
      %168 = arith.mulf %160, %167 : vector<12x128xf32>
      %169 = arith.truncf %168 : vector<12x128xf32> to vector<12x128xbf16>
      %cst_68 = arith.constant dense<0.000000e+00> : vector<12x32xf32>
      %170 = tpu.matmul %169, %26, %cst_68 {dimension_numbers = #tpu.dot_dimension_numbers<[1], [0], [0], [1], [0, 0, 1, 1], [], []>} : vector<12x128xbf16>, vector<128x32xbf16>, vector<12x32xf32> -> vector<12x32xf32>
      %171 = vector.broadcast %14 : vector<1x32xf32> to vector<12x32xf32>
      %172 = arith.addf %170, %171 : vector<12x32xf32>
      %173 = arith.addf %134, %172 : vector<12x32xf32>
      %c0_69 = arith.constant 0 : index
      %c0_70 = arith.constant 0 : index
      %c0_71 = arith.constant 0 : index
      %174 = vector.load %arg13[%c0_69, %c0_70, %c0_71] : memref<2x16x32xf32, #tpu.memory_space<vmem>>, vector<1x12x32xf32>
      %175 = vector.shape_cast %174 : vector<1x12x32xf32> to vector<12x32xf32>
      %176 = vector.shape_cast %173 : vector<12x32xf32> to vector<1x12x32xf32>
      tpu.vector_store %arg13[%c0_69, %c0_70, %c0_71], %176 {strides = array<i32>} : memref<2x16x32xf32, #tpu.memory_space<vmem>>, vector<1x12x32xf32>,
      %c1_72 = arith.constant 1 : index
      %c0_73 = arith.constant 0 : index
      %c0_74 = arith.constant 0 : index
      %177 = vector.load %arg13[%c1_72, %c0_73, %c0_74] : memref<2x16x32xf32, #tpu.memory_space<vmem>>, vector<1x12x32xf32>
      %178 = vector.shape_cast %177 : vector<1x12x32xf32> to vector<12x32xf32>
      %cst_75 = arith.constant dense<0.000000e+00> : vector<12xf32>
      %179 = vector.multi_reduction <add>, %178, %cst_75 [1] : vector<12x32xf32> to vector<12xf32>
      %180 = vector.shape_cast %179 : vector<12xf32> to vector<12x1xf32>
      %cst_76 = arith.constant 3.200000e+01 : f32
      %181 = vector.broadcast %cst_76 : f32 to vector<12x1xf32>
      %182 = arith.divf %180, %181 : vector<12x1xf32>
      %183 = vector.broadcast %182 : vector<12x1xf32> to vector<12x32xf32>
      %184 = arith.subf %178, %183 : vector<12x32xf32>
      %185 = arith.mulf %184, %184 : vector<12x32xf32>
      %cst_77 = arith.constant dense<0.000000e+00> : vector<12xf32>
      %186 = vector.multi_reduction <add>, %185, %cst_77 [1] : vector<12x32xf32> to vector<12xf32>
      %187 = vector.shape_cast %186 : vector<12xf32> to vector<12x1xf32>
      %cst_78 = arith.constant 3.200000e+01 : f32
      %188 = vector.broadcast %cst_78 : f32 to vector<12x1xf32>
      %189 = arith.divf %187, %188 : vector<12x1xf32>
      %190 = vector.broadcast %182 : vector<12x1xf32> to vector<12x32xf32>
      %191 = arith.subf %178, %190 : vector<12x32xf32>
      %cst_79 = arith.constant 9.99999974E-6 : f32
      %192 = vector.broadcast %cst_79 : f32 to vector<12x1xf32>
      %193 = arith.addf %189, %192 : vector<12x1xf32>
      %194 = math.rsqrt %193 : vector<12x1xf32>
      %195 = vector.broadcast %194 : vector<12x1xf32> to vector<12x32xf32>
      %196 = arith.mulf %191, %195 : vector<12x32xf32>
      %197 = vector.broadcast %4 : vector<1x32xf32> to vector<12x32xf32>
      %198 = arith.mulf %196, %197 : vector<12x32xf32>
      %199 = vector.broadcast %6 : vector<1x32xf32> to vector<12x32xf32>
      %200 = arith.addf %198, %199 : vector<12x32xf32>
      %201 = arith.truncf %200 : vector<12x32xf32> to vector<12x32xbf16>
      %cst_80 = arith.constant dense<0.000000e+00> : vector<12x96xf32>
      %202 = tpu.matmul %201, %20, %cst_80 {dimension_numbers = #tpu.dot_dimension_numbers<[1], [0], [0], [1], [0, 0, 1, 1], [], []>} : vector<12x32xbf16>, vector<32x96xbf16>, vector<12x96xf32> -> vector<12x96xf32>
      %203 = vector.broadcast %18 : vector<1x96xf32> to vector<12x96xf32>
      %204 = arith.addf %202, %203 : vector<12x96xf32>
      %205 = arith.truncf %204 : vector<12x96xf32> to vector<12x96xbf16>
      %206 = vector.extract_strided_slice %205 {offsets = [0, 0], sizes = [12, 8], strides = [1, 1]} : vector<12x96xbf16> to vector<12x8xbf16>
      %207 = vector.extract_strided_slice %205 {offsets = [0, 32], sizes = [12, 8], strides = [1, 1]} : vector<12x96xbf16> to vector<12x8xbf16>
      %208 = vector.extract_strided_slice %205 {offsets = [0, 64], sizes = [12, 8], strides = [1, 1]} : vector<12x96xbf16> to vector<12x8xbf16>
      %cst_81 = arith.constant dense<0.000000e+00> : vector<12x12xf32>
      %209 = tpu.matmul %206, %207, %cst_81 {dimension_numbers = #tpu.dot_dimension_numbers<[1], [1], [0], [0], [0, 0, 1, 0], [], []>} : vector<12x8xbf16>, vector<12x8xbf16>, vector<12x12xf32> -> vector<12x12xf32>
      %cst_82 = arith.constant dense<0xFF800000> : vector<12xf32>
      %210 = vector.multi_reduction <maximumf>, %209, %cst_82 [1] : vector<12x12xf32> to vector<12xf32>
      %211 = vector.shape_cast %210 : vector<12xf32> to vector<12x1xf32>
      %212 = vector.broadcast %211 : vector<12x1xf32> to vector<12x12xf32>
      %213 = arith.subf %209, %212 : vector<12x12xf32>
      %214 = math.exp %213 : vector<12x12xf32>
      %cst_83 = arith.constant dense<0.000000e+00> : vector<12xf32>
      %215 = vector.multi_reduction <add>, %214, %cst_83 [1] : vector<12x12xf32> to vector<12xf32>
      %216 = vector.shape_cast %215 : vector<12xf32> to vector<12x1xf32>
      %217 = tpu.reciprocal %216 {approx = true} : vector<12x1xf32> -> vector<12x1xf32>
      %218 = vector.broadcast %217 : vector<12x1xf32> to vector<12x12xf32>
      %219 = arith.mulf %214, %218 : vector<12x12xf32>
      %220 = arith.truncf %219 : vector<12x12xf32> to vector<12x12xbf16>
      %cst_84 = arith.constant dense<0.000000e+00> : vector<12x8xf32>
      %221 = tpu.matmul %220, %208, %cst_84 {dimension_numbers = #tpu.dot_dimension_numbers<[1], [0], [0], [1], [0, 0, 1, 1], [], []>} : vector<12x12xbf16>, vector<12x8xbf16>, vector<12x8xf32> -> vector<12x8xf32>
      %222 = vector.extract_strided_slice %205 {offsets = [0, 8], sizes = [12, 8], strides = [1, 1]} : vector<12x96xbf16> to vector<12x8xbf16>
      %223 = vector.extract_strided_slice %205 {offsets = [0, 40], sizes = [12, 8], strides = [1, 1]} : vector<12x96xbf16> to vector<12x8xbf16>
      %224 = vector.extract_strided_slice %205 {offsets = [0, 72], sizes = [12, 8], strides = [1, 1]} : vector<12x96xbf16> to vector<12x8xbf16>
      %cst_85 = arith.constant dense<0.000000e+00> : vector<12x12xf32>
      %225 = tpu.matmul %222, %223, %cst_85 {dimension_numbers = #tpu.dot_dimension_numbers<[1], [1], [0], [0], [0, 0, 1, 0], [], []>} : vector<12x8xbf16>, vector<12x8xbf16>, vector<12x12xf32> -> vector<12x12xf32>
      %cst_86 = arith.constant dense<0xFF800000> : vector<12xf32>
      %226 = vector.multi_reduction <maximumf>, %225, %cst_86 [1] : vector<12x12xf32> to vector<12xf32>
      %227 = vector.shape_cast %226 : vector<12xf32> to vector<12x1xf32>
      %228 = vector.broadcast %227 : vector<12x1xf32> to vector<12x12xf32>
      %229 = arith.subf %225, %228 : vector<12x12xf32>
      %230 = math.exp %229 : vector<12x12xf32>
      %cst_87 = arith.constant dense<0.000000e+00> : vector<12xf32>
      %231 = vector.multi_reduction <add>, %230, %cst_87 [1] : vector<12x12xf32> to vector<12xf32>
      %232 = vector.shape_cast %231 : vector<12xf32> to vector<12x1xf32>
      %233 = tpu.reciprocal %232 {approx = true} : vector<12x1xf32> -> vector<12x1xf32>
      %234 = vector.broadcast %233 : vector<12x1xf32> to vector<12x12xf32>
      %235 = arith.mulf %230, %234 : vector<12x12xf32>
      %236 = arith.truncf %235 : vector<12x12xf32> to vector<12x12xbf16>
      %cst_88 = arith.constant dense<0.000000e+00> : vector<12x8xf32>
      %237 = tpu.matmul %236, %224, %cst_88 {dimension_numbers = #tpu.dot_dimension_numbers<[1], [0], [0], [1], [0, 0, 1, 1], [], []>} : vector<12x12xbf16>, vector<12x8xbf16>, vector<12x8xf32> -> vector<12x8xf32>
      %238 = vector.extract_strided_slice %205 {offsets = [0, 16], sizes = [12, 8], strides = [1, 1]} : vector<12x96xbf16> to vector<12x8xbf16>
      %239 = vector.extract_strided_slice %205 {offsets = [0, 48], sizes = [12, 8], strides = [1, 1]} : vector<12x96xbf16> to vector<12x8xbf16>
      %240 = vector.extract_strided_slice %205 {offsets = [0, 80], sizes = [12, 8], strides = [1, 1]} : vector<12x96xbf16> to vector<12x8xbf16>
      %cst_89 = arith.constant dense<0.000000e+00> : vector<12x12xf32>
      %241 = tpu.matmul %238, %239, %cst_89 {dimension_numbers = #tpu.dot_dimension_numbers<[1], [1], [0], [0], [0, 0, 1, 0], [], []>} : vector<12x8xbf16>, vector<12x8xbf16>, vector<12x12xf32> -> vector<12x12xf32>
      %cst_90 = arith.constant dense<0xFF800000> : vector<12xf32>
      %242 = vector.multi_reduction <maximumf>, %241, %cst_90 [1] : vector<12x12xf32> to vector<12xf32>
      %243 = vector.shape_cast %242 : vector<12xf32> to vector<12x1xf32>
      %244 = vector.broadcast %243 : vector<12x1xf32> to vector<12x12xf32>
      %245 = arith.subf %241, %244 : vector<12x12xf32>
      %246 = math.exp %245 : vector<12x12xf32>
      %cst_91 = arith.constant dense<0.000000e+00> : vector<12xf32>
      %247 = vector.multi_reduction <add>, %246, %cst_91 [1] : vector<12x12xf32> to vector<12xf32>
      %248 = vector.shape_cast %247 : vector<12xf32> to vector<12x1xf32>
      %249 = tpu.reciprocal %248 {approx = true} : vector<12x1xf32> -> vector<12x1xf32>
      %250 = vector.broadcast %249 : vector<12x1xf32> to vector<12x12xf32>
      %251 = arith.mulf %246, %250 : vector<12x12xf32>
      %252 = arith.truncf %251 : vector<12x12xf32> to vector<12x12xbf16>
      %cst_92 = arith.constant dense<0.000000e+00> : vector<12x8xf32>
      %253 = tpu.matmul %252, %240, %cst_92 {dimension_numbers = #tpu.dot_dimension_numbers<[1], [0], [0], [1], [0, 0, 1, 1], [], []>} : vector<12x12xbf16>, vector<12x8xbf16>, vector<12x8xf32> -> vector<12x8xf32>
      %254 = vector.extract_strided_slice %205 {offsets = [0, 24], sizes = [12, 8], strides = [1, 1]} : vector<12x96xbf16> to vector<12x8xbf16>
      %255 = vector.extract_strided_slice %205 {offsets = [0, 56], sizes = [12, 8], strides = [1, 1]} : vector<12x96xbf16> to vector<12x8xbf16>
      %256 = vector.extract_strided_slice %205 {offsets = [0, 88], sizes = [12, 8], strides = [1, 1]} : vector<12x96xbf16> to vector<12x8xbf16>
      %cst_93 = arith.constant dense<0.000000e+00> : vector<12x12xf32>
      %257 = tpu.matmul %254, %255, %cst_93 {dimension_numbers = #tpu.dot_dimension_numbers<[1], [1], [0], [0], [0, 0, 1, 0], [], []>} : vector<12x8xbf16>, vector<12x8xbf16>, vector<12x12xf32> -> vector<12x12xf32>
      %cst_94 = arith.constant dense<0xFF800000> : vector<12xf32>
      %258 = vector.multi_reduction <maximumf>, %257, %cst_94 [1] : vector<12x12xf32> to vector<12xf32>
      %259 = vector.shape_cast %258 : vector<12xf32> to vector<12x1xf32>
      %260 = vector.broadcast %259 : vector<12x1xf32> to vector<12x12xf32>
      %261 = arith.subf %257, %260 : vector<12x12xf32>
      %262 = math.exp %261 : vector<12x12xf32>
      %cst_95 = arith.constant dense<0.000000e+00> : vector<12xf32>
      %263 = vector.multi_reduction <add>, %262, %cst_95 [1] : vector<12x12xf32> to vector<12xf32>
      %264 = vector.shape_cast %263 : vector<12xf32> to vector<12x1xf32>
      %265 = tpu.reciprocal %264 {approx = true} : vector<12x1xf32> -> vector<12x1xf32>
      %266 = vector.broadcast %265 : vector<12x1xf32> to vector<12x12xf32>
      %267 = arith.mulf %262, %266 : vector<12x12xf32>
      %268 = arith.truncf %267 : vector<12x12xf32> to vector<12x12xbf16>
      %cst_96 = arith.constant dense<0.000000e+00> : vector<12x8xf32>
      %269 = tpu.matmul %268, %256, %cst_96 {dimension_numbers = #tpu.dot_dimension_numbers<[1], [0], [0], [1], [0, 0, 1, 1], [], []>} : vector<12x12xbf16>, vector<12x8xbf16>, vector<12x8xf32> -> vector<12x8xf32>
      %270 = tpu.concatenate %221, %237, %253, %269 in 1 : vector<12x8xf32>, vector<12x8xf32>, vector<12x8xf32>, vector<12x8xf32> -> vector<12x32xf32>
      %271 = arith.truncf %270 : vector<12x32xf32> to vector<12x32xbf16>
      %cst_97 = arith.constant dense<0.000000e+00> : vector<12x32xf32>
      %272 = tpu.matmul %271, %22, %cst_97 {dimension_numbers = #tpu.dot_dimension_numbers<[1], [0], [0], [1], [0, 0, 1, 1], [], []>} : vector<12x32xbf16>, vector<32x32xbf16>, vector<12x32xf32> -> vector<12x32xf32>
      %273 = vector.broadcast %8 : vector<1x32xf32> to vector<12x32xf32>
      %274 = arith.addf %272, %273 : vector<12x32xf32>
      %275 = arith.addf %178, %274 : vector<12x32xf32>
      %cst_98 = arith.constant dense<0.000000e+00> : vector<12xf32>
      %276 = vector.multi_reduction <add>, %275, %cst_98 [1] : vector<12x32xf32> to vector<12xf32>
      %277 = vector.shape_cast %276 : vector<12xf32> to vector<12x1xf32>
      %cst_99 = arith.constant 3.200000e+01 : f32
      %278 = vector.broadcast %cst_99 : f32 to vector<12x1xf32>
      %279 = arith.divf %277, %278 : vector<12x1xf32>
      %280 = vector.broadcast %279 : vector<12x1xf32> to vector<12x32xf32>
      %281 = arith.subf %275, %280 : vector<12x32xf32>
      %282 = arith.mulf %281, %281 : vector<12x32xf32>
      %cst_100 = arith.constant dense<0.000000e+00> : vector<12xf32>
      %283 = vector.multi_reduction <add>, %282, %cst_100 [1] : vector<12x32xf32> to vector<12xf32>
      %284 = vector.shape_cast %283 : vector<12xf32> to vector<12x1xf32>
      %cst_101 = arith.constant 3.200000e+01 : f32
      %285 = vector.broadcast %cst_101 : f32 to vector<12x1xf32>
      %286 = arith.divf %284, %285 : vector<12x1xf32>
      %287 = vector.broadcast %279 : vector<12x1xf32> to vector<12x32xf32>
      %288 = arith.subf %275, %287 : vector<12x32xf32>
      %cst_102 = arith.constant 9.99999974E-6 : f32
      %289 = vector.broadcast %cst_102 : f32 to vector<12x1xf32>
      %290 = arith.addf %286, %289 : vector<12x1xf32>
      %291 = math.rsqrt %290 : vector<12x1xf32>
      %292 = vector.broadcast %291 : vector<12x1xf32> to vector<12x32xf32>
      %293 = arith.mulf %288, %292 : vector<12x32xf32>
      %294 = vector.broadcast %10 : vector<1x32xf32> to vector<12x32xf32>
      %295 = arith.mulf %293, %294 : vector<12x32xf32>
      %296 = vector.broadcast %12 : vector<1x32xf32> to vector<12x32xf32>
      %297 = arith.addf %295, %296 : vector<12x32xf32>
      %298 = arith.truncf %297 : vector<12x32xf32> to vector<12x32xbf16>
      %cst_103 = arith.constant dense<0.000000e+00> : vector<12x128xf32>
      %299 = tpu.matmul %298, %24, %cst_103 {dimension_numbers = #tpu.dot_dimension_numbers<[1], [0], [0], [1], [0, 0, 1, 1], [], []>} : vector<12x32xbf16>, vector<32x128xbf16>, vector<12x128xf32> -> vector<12x128xf32>
      %300 = vector.broadcast %16 : vector<1x128xf32> to vector<12x128xf32>
      %301 = arith.addf %299, %300 : vector<12x128xf32>
      %cst_104 = arith.constant 1.702000e+00 : f32
      %302 = vector.broadcast %cst_104 : f32 to vector<12x128xf32>
      %303 = arith.mulf %302, %301 : vector<12x128xf32>
      %304 = arith.negf %303 : vector<12x128xf32>
      %305 = math.exp %304 : vector<12x128xf32>
      %cst_105 = arith.constant 1.000000e+00 : f32
      %306 = vector.broadcast %cst_105 : f32 to vector<12x128xf32>
      %307 = arith.addf %306, %305 : vector<12x128xf32>
      %308 = arith.divf %306, %307 : vector<12x128xf32>
      %309 = arith.mulf %301, %308 : vector<12x128xf32>
      %310 = arith.truncf %309 : vector<12x128xf32> to vector<12x128xbf16>
      %cst_106 = arith.constant dense<0.000000e+00> : vector<12x32xf32>
      %311 = tpu.matmul %310, %26, %cst_106 {dimension_numbers = #tpu.dot_dimension_numbers<[1], [0], [0], [1], [0, 0, 1, 1], [], []>} : vector<12x128xbf16>, vector<128x32xbf16>, vector<12x32xf32> -> vector<12x32xf32>
      %312 = vector.broadcast %14 : vector<1x32xf32> to vector<12x32xf32>
      %313 = arith.addf %311, %312 : vector<12x32xf32>
      %314 = arith.addf %275, %313 : vector<12x32xf32>
      %c1_107 = arith.constant 1 : index
      %c0_108 = arith.constant 0 : index
      %c0_109 = arith.constant 0 : index
      %315 = vector.load %arg13[%c1_107, %c0_108, %c0_109] : memref<2x16x32xf32, #tpu.memory_space<vmem>>, vector<1x12x32xf32>
      %316 = vector.shape_cast %315 : vector<1x12x32xf32> to vector<12x32xf32>
      %317 = vector.shape_cast %314 : vector<12x32xf32> to vector<1x12x32xf32>
      tpu.vector_store %arg13[%c1_107, %c0_108, %c0_109], %317 {strides = array<i32>} : memref<2x16x32xf32, #tpu.memory_space<vmem>>, vector<1x12x32xf32>,
    } else {
    }
    %c2_i32_32 = arith.constant 2 : i32
    %30 = arith.cmpi sge, %arg1, %c2_i32_32 : i32
    %31 = arith.extui %30 : i1 to i32
    %c0_i32_33 = arith.constant 0 : i32
    %32 = arith.cmpi ne, %31, %c0_i32_33 : i32
    scf.if %32 {
      %c0_35 = arith.constant 0 : index
      %c0_36 = arith.constant 0 : index
      %c0_37 = arith.constant 0 : index
      %36 = vector.load %arg13[%c0_35, %c0_36, %c0_37] : memref<2x16x32xf32, #tpu.memory_space<vmem>>, vector<1x16x32xf32>
      %37 = vector.shape_cast %36 : vector<1x16x32xf32> to vector<16x32xf32>
      %cst = arith.constant dense<0.000000e+00> : vector<16xf32>
      %38 = vector.multi_reduction <add>, %37, %cst [1] : vector<16x32xf32> to vector<16xf32>
      %39 = vector.shape_cast %38 : vector<16xf32> to vector<16x1xf32>
      %cst_38 = arith.constant 3.200000e+01 : f32
      %40 = vector.broadcast %cst_38 : f32 to vector<16x1xf32>
      %41 = arith.divf %39, %40 : vector<16x1xf32>
      %42 = vector.broadcast %41 : vector<16x1xf32> to vector<16x32xf32>
      %43 = arith.subf %37, %42 : vector<16x32xf32>
      %44 = arith.mulf %43, %43 : vector<16x32xf32>
      %cst_39 = arith.constant dense<0.000000e+00> : vector<16xf32>
      %45 = vector.multi_reduction <add>, %44, %cst_39 [1] : vector<16x32xf32> to vector<16xf32>
      %46 = vector.shape_cast %45 : vector<16xf32> to vector<16x1xf32>
      %cst_40 = arith.constant 3.200000e+01 : f32
      %47 = vector.broadcast %cst_40 : f32 to vector<16x1xf32>
      %48 = arith.divf %46, %47 : vector<16x1xf32>
      %49 = vector.broadcast %41 : vector<16x1xf32> to vector<16x32xf32>
      %50 = arith.subf %37, %49 : vector<16x32xf32>
      %cst_41 = arith.constant 9.99999974E-6 : f32
      %51 = vector.broadcast %cst_41 : f32 to vector<16x1xf32>
      %52 = arith.addf %48, %51 : vector<16x1xf32>
      %53 = math.rsqrt %52 : vector<16x1xf32>
      %54 = vector.broadcast %53 : vector<16x1xf32> to vector<16x32xf32>
      %55 = arith.mulf %50, %54 : vector<16x32xf32>
      %56 = vector.broadcast %4 : vector<1x32xf32> to vector<16x32xf32>
      %57 = arith.mulf %55, %56 : vector<16x32xf32>
      %58 = vector.broadcast %6 : vector<1x32xf32> to vector<16x32xf32>
      %59 = arith.addf %57, %58 : vector<16x32xf32>
      %60 = arith.truncf %59 : vector<16x32xf32> to vector<16x32xbf16>
      %cst_42 = arith.constant dense<0.000000e+00> : vector<16x96xf32>
      %61 = tpu.matmul %60, %20, %cst_42 {dimension_numbers = #tpu.dot_dimension_numbers<[1], [0], [0], [1], [0, 0, 1, 1], [], []>} : vector<16x32xbf16>, vector<32x96xbf16>, vector<16x96xf32> -> vector<16x96xf32>
      %62 = vector.broadcast %18 : vector<1x96xf32> to vector<16x96xf32>
      %63 = arith.addf %61, %62 : vector<16x96xf32>
      %64 = arith.truncf %63 : vector<16x96xf32> to vector<16x96xbf16>
      %65 = vector.extract_strided_slice %64 {offsets = [0, 0], sizes = [16, 8], strides = [1, 1]} : vector<16x96xbf16> to vector<16x8xbf16>
      %66 = vector.extract_strided_slice %64 {offsets = [0, 32], sizes = [16, 8], strides = [1, 1]} : vector<16x96xbf16> to vector<16x8xbf16>
      %67 = vector.extract_strided_slice %64 {offsets = [0, 64], sizes = [16, 8], strides = [1, 1]} : vector<16x96xbf16> to vector<16x8xbf16>
      %cst_43 = arith.constant dense<0.000000e+00> : vector<16x16xf32>
      %68 = tpu.matmul %65, %66, %cst_43 {dimension_numbers = #tpu.dot_dimension_numbers<[1], [1], [0], [0], [0, 0, 1, 0], [], []>} : vector<16x8xbf16>, vector<16x8xbf16>, vector<16x16xf32> -> vector<16x16xf32>
      %cst_44 = arith.constant dense<0xFF800000> : vector<16xf32>
      %69 = vector.multi_reduction <maximumf>, %68, %cst_44 [1] : vector<16x16xf32> to vector<16xf32>
      %70 = vector.shape_cast %69 : vector<16xf32> to vector<16x1xf32>
      %71 = vector.broadcast %70 : vector<16x1xf32> to vector<16x16xf32>
      %72 = arith.subf %68, %71 : vector<16x16xf32>
      %73 = math.exp %72 : vector<16x16xf32>
      %cst_45 = arith.constant dense<0.000000e+00> : vector<16xf32>
      %74 = vector.multi_reduction <add>, %73, %cst_45 [1] : vector<16x16xf32> to vector<16xf32>
      %75 = vector.shape_cast %74 : vector<16xf32> to vector<16x1xf32>
      %76 = tpu.reciprocal %75 {approx = true} : vector<16x1xf32> -> vector<16x1xf32>
      %77 = vector.broadcast %76 : vector<16x1xf32> to vector<16x16xf32>
      %78 = arith.mulf %73, %77 : vector<16x16xf32>
      %79 = arith.truncf %78 : vector<16x16xf32> to vector<16x16xbf16>
      %cst_46 = arith.constant dense<0.000000e+00> : vector<16x8xf32>
      %80 = tpu.matmul %79, %67, %cst_46 {dimension_numbers = #tpu.dot_dimension_numbers<[1], [0], [0], [1], [0, 0, 1, 1], [], []>} : vector<16x16xbf16>, vector<16x8xbf16>, vector<16x8xf32> -> vector<16x8xf32>
      %81 = vector.extract_strided_slice %64 {offsets = [0, 8], sizes = [16, 8], strides = [1, 1]} : vector<16x96xbf16> to vector<16x8xbf16>
      %82 = vector.extract_strided_slice %64 {offsets = [0, 40], sizes = [16, 8], strides = [1, 1]} : vector<16x96xbf16> to vector<16x8xbf16>
      %83 = vector.extract_strided_slice %64 {offsets = [0, 72], sizes = [16, 8], strides = [1, 1]} : vector<16x96xbf16> to vector<16x8xbf16>
      %cst_47 = arith.constant dense<0.000000e+00> : vector<16x16xf32>
      %84 = tpu.matmul %81, %82, %cst_47 {dimension_numbers = #tpu.dot_dimension_numbers<[1], [1], [0], [0], [0, 0, 1, 0], [], []>} : vector<16x8xbf16>, vector<16x8xbf16>, vector<16x16xf32> -> vector<16x16xf32>
      %cst_48 = arith.constant dense<0xFF800000> : vector<16xf32>
      %85 = vector.multi_reduction <maximumf>, %84, %cst_48 [1] : vector<16x16xf32> to vector<16xf32>
      %86 = vector.shape_cast %85 : vector<16xf32> to vector<16x1xf32>
      %87 = vector.broadcast %86 : vector<16x1xf32> to vector<16x16xf32>
      %88 = arith.subf %84, %87 : vector<16x16xf32>
      %89 = math.exp %88 : vector<16x16xf32>
      %cst_49 = arith.constant dense<0.000000e+00> : vector<16xf32>
      %90 = vector.multi_reduction <add>, %89, %cst_49 [1] : vector<16x16xf32> to vector<16xf32>
      %91 = vector.shape_cast %90 : vector<16xf32> to vector<16x1xf32>
      %92 = tpu.reciprocal %91 {approx = true} : vector<16x1xf32> -> vector<16x1xf32>
      %93 = vector.broadcast %92 : vector<16x1xf32> to vector<16x16xf32>
      %94 = arith.mulf %89, %93 : vector<16x16xf32>
      %95 = arith.truncf %94 : vector<16x16xf32> to vector<16x16xbf16>
      %cst_50 = arith.constant dense<0.000000e+00> : vector<16x8xf32>
      %96 = tpu.matmul %95, %83, %cst_50 {dimension_numbers = #tpu.dot_dimension_numbers<[1], [0], [0], [1], [0, 0, 1, 1], [], []>} : vector<16x16xbf16>, vector<16x8xbf16>, vector<16x8xf32> -> vector<16x8xf32>
      %97 = vector.extract_strided_slice %64 {offsets = [0, 16], sizes = [16, 8], strides = [1, 1]} : vector<16x96xbf16> to vector<16x8xbf16>
      %98 = vector.extract_strided_slice %64 {offsets = [0, 48], sizes = [16, 8], strides = [1, 1]} : vector<16x96xbf16> to vector<16x8xbf16>
      %99 = vector.extract_strided_slice %64 {offsets = [0, 80], sizes = [16, 8], strides = [1, 1]} : vector<16x96xbf16> to vector<16x8xbf16>
      %cst_51 = arith.constant dense<0.000000e+00> : vector<16x16xf32>
      %100 = tpu.matmul %97, %98, %cst_51 {dimension_numbers = #tpu.dot_dimension_numbers<[1], [1], [0], [0], [0, 0, 1, 0], [], []>} : vector<16x8xbf16>, vector<16x8xbf16>, vector<16x16xf32> -> vector<16x16xf32>
      %cst_52 = arith.constant dense<0xFF800000> : vector<16xf32>
      %101 = vector.multi_reduction <maximumf>, %100, %cst_52 [1] : vector<16x16xf32> to vector<16xf32>
      %102 = vector.shape_cast %101 : vector<16xf32> to vector<16x1xf32>
      %103 = vector.broadcast %102 : vector<16x1xf32> to vector<16x16xf32>
      %104 = arith.subf %100, %103 : vector<16x16xf32>
      %105 = math.exp %104 : vector<16x16xf32>
      %cst_53 = arith.constant dense<0.000000e+00> : vector<16xf32>
      %106 = vector.multi_reduction <add>, %105, %cst_53 [1] : vector<16x16xf32> to vector<16xf32>
      %107 = vector.shape_cast %106 : vector<16xf32> to vector<16x1xf32>
      %108 = tpu.reciprocal %107 {approx = true} : vector<16x1xf32> -> vector<16x1xf32>
      %109 = vector.broadcast %108 : vector<16x1xf32> to vector<16x16xf32>
      %110 = arith.mulf %105, %109 : vector<16x16xf32>
      %111 = arith.truncf %110 : vector<16x16xf32> to vector<16x16xbf16>
      %cst_54 = arith.constant dense<0.000000e+00> : vector<16x8xf32>
      %112 = tpu.matmul %111, %99, %cst_54 {dimension_numbers = #tpu.dot_dimension_numbers<[1], [0], [0], [1], [0, 0, 1, 1], [], []>} : vector<16x16xbf16>, vector<16x8xbf16>, vector<16x8xf32> -> vector<16x8xf32>
      %113 = vector.extract_strided_slice %64 {offsets = [0, 24], sizes = [16, 8], strides = [1, 1]} : vector<16x96xbf16> to vector<16x8xbf16>
      %114 = vector.extract_strided_slice %64 {offsets = [0, 56], sizes = [16, 8], strides = [1, 1]} : vector<16x96xbf16> to vector<16x8xbf16>
      %115 = vector.extract_strided_slice %64 {offsets = [0, 88], sizes = [16, 8], strides = [1, 1]} : vector<16x96xbf16> to vector<16x8xbf16>
      %cst_55 = arith.constant dense<0.000000e+00> : vector<16x16xf32>
      %116 = tpu.matmul %113, %114, %cst_55 {dimension_numbers = #tpu.dot_dimension_numbers<[1], [1], [0], [0], [0, 0, 1, 0], [], []>} : vector<16x8xbf16>, vector<16x8xbf16>, vector<16x16xf32> -> vector<16x16xf32>
      %cst_56 = arith.constant dense<0xFF800000> : vector<16xf32>
      %117 = vector.multi_reduction <maximumf>, %116, %cst_56 [1] : vector<16x16xf32> to vector<16xf32>
      %118 = vector.shape_cast %117 : vector<16xf32> to vector<16x1xf32>
      %119 = vector.broadcast %118 : vector<16x1xf32> to vector<16x16xf32>
      %120 = arith.subf %116, %119 : vector<16x16xf32>
      %121 = math.exp %120 : vector<16x16xf32>
      %cst_57 = arith.constant dense<0.000000e+00> : vector<16xf32>
      %122 = vector.multi_reduction <add>, %121, %cst_57 [1] : vector<16x16xf32> to vector<16xf32>
      %123 = vector.shape_cast %122 : vector<16xf32> to vector<16x1xf32>
      %124 = tpu.reciprocal %123 {approx = true} : vector<16x1xf32> -> vector<16x1xf32>
      %125 = vector.broadcast %124 : vector<16x1xf32> to vector<16x16xf32>
      %126 = arith.mulf %121, %125 : vector<16x16xf32>
      %127 = arith.truncf %126 : vector<16x16xf32> to vector<16x16xbf16>
      %cst_58 = arith.constant dense<0.000000e+00> : vector<16x8xf32>
      %128 = tpu.matmul %127, %115, %cst_58 {dimension_numbers = #tpu.dot_dimension_numbers<[1], [0], [0], [1], [0, 0, 1, 1], [], []>} : vector<16x16xbf16>, vector<16x8xbf16>, vector<16x8xf32> -> vector<16x8xf32>
      %129 = tpu.concatenate %80, %96, %112, %128 in 1 : vector<16x8xf32>, vector<16x8xf32>, vector<16x8xf32>, vector<16x8xf32> -> vector<16x32xf32>
      %130 = arith.truncf %129 : vector<16x32xf32> to vector<16x32xbf16>
      %cst_59 = arith.constant dense<0.000000e+00> : vector<16x32xf32>
      %131 = tpu.matmul %130, %22, %cst_59 {dimension_numbers = #tpu.dot_dimension_numbers<[1], [0], [0], [1], [0, 0, 1, 1], [], []>} : vector<16x32xbf16>, vector<32x32xbf16>, vector<16x32xf32> -> vector<16x32xf32>
      %132 = vector.broadcast %8 : vector<1x32xf32> to vector<16x32xf32>
      %133 = arith.addf %131, %132 : vector<16x32xf32>
      %134 = arith.addf %37, %133 : vector<16x32xf32>
      %cst_60 = arith.constant dense<0.000000e+00> : vector<16xf32>
      %135 = vector.multi_reduction <add>, %134, %cst_60 [1] : vector<16x32xf32> to vector<16xf32>
      %136 = vector.shape_cast %135 : vector<16xf32> to vector<16x1xf32>
      %cst_61 = arith.constant 3.200000e+01 : f32
      %137 = vector.broadcast %cst_61 : f32 to vector<16x1xf32>
      %138 = arith.divf %136, %137 : vector<16x1xf32>
      %139 = vector.broadcast %138 : vector<16x1xf32> to vector<16x32xf32>
      %140 = arith.subf %134, %139 : vector<16x32xf32>
      %141 = arith.mulf %140, %140 : vector<16x32xf32>
      %cst_62 = arith.constant dense<0.000000e+00> : vector<16xf32>
      %142 = vector.multi_reduction <add>, %141, %cst_62 [1] : vector<16x32xf32> to vector<16xf32>
      %143 = vector.shape_cast %142 : vector<16xf32> to vector<16x1xf32>
      %cst_63 = arith.constant 3.200000e+01 : f32
      %144 = vector.broadcast %cst_63 : f32 to vector<16x1xf32>
      %145 = arith.divf %143, %144 : vector<16x1xf32>
      %146 = vector.broadcast %138 : vector<16x1xf32> to vector<16x32xf32>
      %147 = arith.subf %134, %146 : vector<16x32xf32>
      %cst_64 = arith.constant 9.99999974E-6 : f32
      %148 = vector.broadcast %cst_64 : f32 to vector<16x1xf32>
      %149 = arith.addf %145, %148 : vector<16x1xf32>
      %150 = math.rsqrt %149 : vector<16x1xf32>
      %151 = vector.broadcast %150 : vector<16x1xf32> to vector<16x32xf32>
      %152 = arith.mulf %147, %151 : vector<16x32xf32>
      %153 = vector.broadcast %10 : vector<1x32xf32> to vector<16x32xf32>
      %154 = arith.mulf %152, %153 : vector<16x32xf32>
      %155 = vector.broadcast %12 : vector<1x32xf32> to vector<16x32xf32>
      %156 = arith.addf %154, %155 : vector<16x32xf32>
      %157 = arith.truncf %156 : vector<16x32xf32> to vector<16x32xbf16>
      %cst_65 = arith.constant dense<0.000000e+00> : vector<16x128xf32>
      %158 = tpu.matmul %157, %24, %cst_65 {dimension_numbers = #tpu.dot_dimension_numbers<[1], [0], [0], [1], [0, 0, 1, 1], [], []>} : vector<16x32xbf16>, vector<32x128xbf16>, vector<16x128xf32> -> vector<16x128xf32>
      %159 = vector.broadcast %16 : vector<1x128xf32> to vector<16x128xf32>
      %160 = arith.addf %158, %159 : vector<16x128xf32>
      %cst_66 = arith.constant 1.702000e+00 : f32
      %161 = vector.broadcast %cst_66 : f32 to vector<16x128xf32>
      %162 = arith.mulf %161, %160 : vector<16x128xf32>
      %163 = arith.negf %162 : vector<16x128xf32>
      %164 = math.exp %163 : vector<16x128xf32>
      %cst_67 = arith.constant 1.000000e+00 : f32
      %165 = vector.broadcast %cst_67 : f32 to vector<16x128xf32>
      %166 = arith.addf %165, %164 : vector<16x128xf32>
      %167 = arith.divf %165, %166 : vector<16x128xf32>
      %168 = arith.mulf %160, %167 : vector<16x128xf32>
      %169 = arith.truncf %168 : vector<16x128xf32> to vector<16x128xbf16>
      %cst_68 = arith.constant dense<0.000000e+00> : vector<16x32xf32>
      %170 = tpu.matmul %169, %26, %cst_68 {dimension_numbers = #tpu.dot_dimension_numbers<[1], [0], [0], [1], [0, 0, 1, 1], [], []>} : vector<16x128xbf16>, vector<128x32xbf16>, vector<16x32xf32> -> vector<16x32xf32>
      %171 = vector.broadcast %14 : vector<1x32xf32> to vector<16x32xf32>
      %172 = arith.addf %170, %171 : vector<16x32xf32>
      %173 = arith.addf %134, %172 : vector<16x32xf32>
      %c0_69 = arith.constant 0 : index
      %c0_70 = arith.constant 0 : index
      %c0_71 = arith.constant 0 : index
      %174 = vector.load %arg13[%c0_69, %c0_70, %c0_71] : memref<2x16x32xf32, #tpu.memory_space<vmem>>, vector<1x16x32xf32>
      %175 = vector.shape_cast %174 : vector<1x16x32xf32> to vector<16x32xf32>
      %176 = vector.shape_cast %173 : vector<16x32xf32> to vector<1x16x32xf32>
      tpu.vector_store %arg13[%c0_69, %c0_70, %c0_71], %176 {strides = array<i32>} : memref<2x16x32xf32, #tpu.memory_space<vmem>>, vector<1x16x32xf32>,
      %c1_72 = arith.constant 1 : index
      %c0_73 = arith.constant 0 : index
      %c0_74 = arith.constant 0 : index
      %177 = vector.load %arg13[%c1_72, %c0_73, %c0_74] : memref<2x16x32xf32, #tpu.memory_space<vmem>>, vector<1x16x32xf32>
      %178 = vector.shape_cast %177 : vector<1x16x32xf32> to vector<16x32xf32>
      %cst_75 = arith.constant dense<0.000000e+00> : vector<16xf32>
      %179 = vector.multi_reduction <add>, %178, %cst_75 [1] : vector<16x32xf32> to vector<16xf32>
      %180 = vector.shape_cast %179 : vector<16xf32> to vector<16x1xf32>
      %cst_76 = arith.constant 3.200000e+01 : f32
      %181 = vector.broadcast %cst_76 : f32 to vector<16x1xf32>
      %182 = arith.divf %180, %181 : vector<16x1xf32>
      %183 = vector.broadcast %182 : vector<16x1xf32> to vector<16x32xf32>
      %184 = arith.subf %178, %183 : vector<16x32xf32>
      %185 = arith.mulf %184, %184 : vector<16x32xf32>
      %cst_77 = arith.constant dense<0.000000e+00> : vector<16xf32>
      %186 = vector.multi_reduction <add>, %185, %cst_77 [1] : vector<16x32xf32> to vector<16xf32>
      %187 = vector.shape_cast %186 : vector<16xf32> to vector<16x1xf32>
      %cst_78 = arith.constant 3.200000e+01 : f32
      %188 = vector.broadcast %cst_78 : f32 to vector<16x1xf32>
      %189 = arith.divf %187, %188 : vector<16x1xf32>
      %190 = vector.broadcast %182 : vector<16x1xf32> to vector<16x32xf32>
      %191 = arith.subf %178, %190 : vector<16x32xf32>
      %cst_79 = arith.constant 9.99999974E-6 : f32
      %192 = vector.broadcast %cst_79 : f32 to vector<16x1xf32>
      %193 = arith.addf %189, %192 : vector<16x1xf32>
      %194 = math.rsqrt %193 : vector<16x1xf32>
      %195 = vector.broadcast %194 : vector<16x1xf32> to vector<16x32xf32>
      %196 = arith.mulf %191, %195 : vector<16x32xf32>
      %197 = vector.broadcast %4 : vector<1x32xf32> to vector<16x32xf32>
      %198 = arith.mulf %196, %197 : vector<16x32xf32>
      %199 = vector.broadcast %6 : vector<1x32xf32> to vector<16x32xf32>
      %200 = arith.addf %198, %199 : vector<16x32xf32>
      %201 = arith.truncf %200 : vector<16x32xf32> to vector<16x32xbf16>
      %cst_80 = arith.constant dense<0.000000e+00> : vector<16x96xf32>
      %202 = tpu.matmul %201, %20, %cst_80 {dimension_numbers = #tpu.dot_dimension_numbers<[1], [0], [0], [1], [0, 0, 1, 1], [], []>} : vector<16x32xbf16>, vector<32x96xbf16>, vector<16x96xf32> -> vector<16x96xf32>
      %203 = vector.broadcast %18 : vector<1x96xf32> to vector<16x96xf32>
      %204 = arith.addf %202, %203 : vector<16x96xf32>
      %205 = arith.truncf %204 : vector<16x96xf32> to vector<16x96xbf16>
      %206 = vector.extract_strided_slice %205 {offsets = [0, 0], sizes = [16, 8], strides = [1, 1]} : vector<16x96xbf16> to vector<16x8xbf16>
      %207 = vector.extract_strided_slice %205 {offsets = [0, 32], sizes = [16, 8], strides = [1, 1]} : vector<16x96xbf16> to vector<16x8xbf16>
      %208 = vector.extract_strided_slice %205 {offsets = [0, 64], sizes = [16, 8], strides = [1, 1]} : vector<16x96xbf16> to vector<16x8xbf16>
      %cst_81 = arith.constant dense<0.000000e+00> : vector<16x16xf32>
      %209 = tpu.matmul %206, %207, %cst_81 {dimension_numbers = #tpu.dot_dimension_numbers<[1], [1], [0], [0], [0, 0, 1, 0], [], []>} : vector<16x8xbf16>, vector<16x8xbf16>, vector<16x16xf32> -> vector<16x16xf32>
      %cst_82 = arith.constant dense<0xFF800000> : vector<16xf32>
      %210 = vector.multi_reduction <maximumf>, %209, %cst_82 [1] : vector<16x16xf32> to vector<16xf32>
      %211 = vector.shape_cast %210 : vector<16xf32> to vector<16x1xf32>
      %212 = vector.broadcast %211 : vector<16x1xf32> to vector<16x16xf32>
      %213 = arith.subf %209, %212 : vector<16x16xf32>
      %214 = math.exp %213 : vector<16x16xf32>
      %cst_83 = arith.constant dense<0.000000e+00> : vector<16xf32>
      %215 = vector.multi_reduction <add>, %214, %cst_83 [1] : vector<16x16xf32> to vector<16xf32>
      %216 = vector.shape_cast %215 : vector<16xf32> to vector<16x1xf32>
      %217 = tpu.reciprocal %216 {approx = true} : vector<16x1xf32> -> vector<16x1xf32>
      %218 = vector.broadcast %217 : vector<16x1xf32> to vector<16x16xf32>
      %219 = arith.mulf %214, %218 : vector<16x16xf32>
      %220 = arith.truncf %219 : vector<16x16xf32> to vector<16x16xbf16>
      %cst_84 = arith.constant dense<0.000000e+00> : vector<16x8xf32>
      %221 = tpu.matmul %220, %208, %cst_84 {dimension_numbers = #tpu.dot_dimension_numbers<[1], [0], [0], [1], [0, 0, 1, 1], [], []>} : vector<16x16xbf16>, vector<16x8xbf16>, vector<16x8xf32> -> vector<16x8xf32>
      %222 = vector.extract_strided_slice %205 {offsets = [0, 8], sizes = [16, 8], strides = [1, 1]} : vector<16x96xbf16> to vector<16x8xbf16>
      %223 = vector.extract_strided_slice %205 {offsets = [0, 40], sizes = [16, 8], strides = [1, 1]} : vector<16x96xbf16> to vector<16x8xbf16>
      %224 = vector.extract_strided_slice %205 {offsets = [0, 72], sizes = [16, 8], strides = [1, 1]} : vector<16x96xbf16> to vector<16x8xbf16>
      %cst_85 = arith.constant dense<0.000000e+00> : vector<16x16xf32>
      %225 = tpu.matmul %222, %223, %cst_85 {dimension_numbers = #tpu.dot_dimension_numbers<[1], [1], [0], [0], [0, 0, 1, 0], [], []>} : vector<16x8xbf16>, vector<16x8xbf16>, vector<16x16xf32> -> vector<16x16xf32>
      %cst_86 = arith.constant dense<0xFF800000> : vector<16xf32>
      %226 = vector.multi_reduction <maximumf>, %225, %cst_86 [1] : vector<16x16xf32> to vector<16xf32>
      %227 = vector.shape_cast %226 : vector<16xf32> to vector<16x1xf32>
      %228 = vector.broadcast %227 : vector<16x1xf32> to vector<16x16xf32>
      %229 = arith.subf %225, %228 : vector<16x16xf32>
      %230 = math.exp %229 : vector<16x16xf32>
      %cst_87 = arith.constant dense<0.000000e+00> : vector<16xf32>
      %231 = vector.multi_reduction <add>, %230, %cst_87 [1] : vector<16x16xf32> to vector<16xf32>
      %232 = vector.shape_cast %231 : vector<16xf32> to vector<16x1xf32>
      %233 = tpu.reciprocal %232 {approx = true} : vector<16x1xf32> -> vector<16x1xf32>
      %234 = vector.broadcast %233 : vector<16x1xf32> to vector<16x16xf32>
      %235 = arith.mulf %230, %234 : vector<16x16xf32>
      %236 = arith.truncf %235 : vector<16x16xf32> to vector<16x16xbf16>
      %cst_88 = arith.constant dense<0.000000e+00> : vector<16x8xf32>
      %237 = tpu.matmul %236, %224, %cst_88 {dimension_numbers = #tpu.dot_dimension_numbers<[1], [0], [0], [1], [0, 0, 1, 1], [], []>} : vector<16x16xbf16>, vector<16x8xbf16>, vector<16x8xf32> -> vector<16x8xf32>
      %238 = vector.extract_strided_slice %205 {offsets = [0, 16], sizes = [16, 8], strides = [1, 1]} : vector<16x96xbf16> to vector<16x8xbf16>
      %239 = vector.extract_strided_slice %205 {offsets = [0, 48], sizes = [16, 8], strides = [1, 1]} : vector<16x96xbf16> to vector<16x8xbf16>
      %240 = vector.extract_strided_slice %205 {offsets = [0, 80], sizes = [16, 8], strides = [1, 1]} : vector<16x96xbf16> to vector<16x8xbf16>
      %cst_89 = arith.constant dense<0.000000e+00> : vector<16x16xf32>
      %241 = tpu.matmul %238, %239, %cst_89 {dimension_numbers = #tpu.dot_dimension_numbers<[1], [1], [0], [0], [0, 0, 1, 0], [], []>} : vector<16x8xbf16>, vector<16x8xbf16>, vector<16x16xf32> -> vector<16x16xf32>
      %cst_90 = arith.constant dense<0xFF800000> : vector<16xf32>
      %242 = vector.multi_reduction <maximumf>, %241, %cst_90 [1] : vector<16x16xf32> to vector<16xf32>
      %243 = vector.shape_cast %242 : vector<16xf32> to vector<16x1xf32>
      %244 = vector.broadcast %243 : vector<16x1xf32> to vector<16x16xf32>
      %245 = arith.subf %241, %244 : vector<16x16xf32>
      %246 = math.exp %245 : vector<16x16xf32>
      %cst_91 = arith.constant dense<0.000000e+00> : vector<16xf32>
      %247 = vector.multi_reduction <add>, %246, %cst_91 [1] : vector<16x16xf32> to vector<16xf32>
      %248 = vector.shape_cast %247 : vector<16xf32> to vector<16x1xf32>
      %249 = tpu.reciprocal %248 {approx = true} : vector<16x1xf32> -> vector<16x1xf32>
      %250 = vector.broadcast %249 : vector<16x1xf32> to vector<16x16xf32>
      %251 = arith.mulf %246, %250 : vector<16x16xf32>
      %252 = arith.truncf %251 : vector<16x16xf32> to vector<16x16xbf16>
      %cst_92 = arith.constant dense<0.000000e+00> : vector<16x8xf32>
      %253 = tpu.matmul %252, %240, %cst_92 {dimension_numbers = #tpu.dot_dimension_numbers<[1], [0], [0], [1], [0, 0, 1, 1], [], []>} : vector<16x16xbf16>, vector<16x8xbf16>, vector<16x8xf32> -> vector<16x8xf32>
      %254 = vector.extract_strided_slice %205 {offsets = [0, 24], sizes = [16, 8], strides = [1, 1]} : vector<16x96xbf16> to vector<16x8xbf16>
      %255 = vector.extract_strided_slice %205 {offsets = [0, 56], sizes = [16, 8], strides = [1, 1]} : vector<16x96xbf16> to vector<16x8xbf16>
      %256 = vector.extract_strided_slice %205 {offsets = [0, 88], sizes = [16, 8], strides = [1, 1]} : vector<16x96xbf16> to vector<16x8xbf16>
      %cst_93 = arith.constant dense<0.000000e+00> : vector<16x16xf32>
      %257 = tpu.matmul %254, %255, %cst_93 {dimension_numbers = #tpu.dot_dimension_numbers<[1], [1], [0], [0], [0, 0, 1, 0], [], []>} : vector<16x8xbf16>, vector<16x8xbf16>, vector<16x16xf32> -> vector<16x16xf32>
      %cst_94 = arith.constant dense<0xFF800000> : vector<16xf32>
      %258 = vector.multi_reduction <maximumf>, %257, %cst_94 [1] : vector<16x16xf32> to vector<16xf32>
      %259 = vector.shape_cast %258 : vector<16xf32> to vector<16x1xf32>
      %260 = vector.broadcast %259 : vector<16x1xf32> to vector<16x16xf32>
      %261 = arith.subf %257, %260 : vector<16x16xf32>
      %262 = math.exp %261 : vector<16x16xf32>
      %cst_95 = arith.constant dense<0.000000e+00> : vector<16xf32>
      %263 = vector.multi_reduction <add>, %262, %cst_95 [1] : vector<16x16xf32> to vector<16xf32>
      %264 = vector.shape_cast %263 : vector<16xf32> to vector<16x1xf32>
      %265 = tpu.reciprocal %264 {approx = true} : vector<16x1xf32> -> vector<16x1xf32>
      %266 = vector.broadcast %265 : vector<16x1xf32> to vector<16x16xf32>
      %267 = arith.mulf %262, %266 : vector<16x16xf32>
      %268 = arith.truncf %267 : vector<16x16xf32> to vector<16x16xbf16>
      %cst_96 = arith.constant dense<0.000000e+00> : vector<16x8xf32>
      %269 = tpu.matmul %268, %256, %cst_96 {dimension_numbers = #tpu.dot_dimension_numbers<[1], [0], [0], [1], [0, 0, 1, 1], [], []>} : vector<16x16xbf16>, vector<16x8xbf16>, vector<16x8xf32> -> vector<16x8xf32>
      %270 = tpu.concatenate %221, %237, %253, %269 in 1 : vector<16x8xf32>, vector<16x8xf32>, vector<16x8xf32>, vector<16x8xf32> -> vector<16x32xf32>
      %271 = arith.truncf %270 : vector<16x32xf32> to vector<16x32xbf16>
      %cst_97 = arith.constant dense<0.000000e+00> : vector<16x32xf32>
      %272 = tpu.matmul %271, %22, %cst_97 {dimension_numbers = #tpu.dot_dimension_numbers<[1], [0], [0], [1], [0, 0, 1, 1], [], []>} : vector<16x32xbf16>, vector<32x32xbf16>, vector<16x32xf32> -> vector<16x32xf32>
      %273 = vector.broadcast %8 : vector<1x32xf32> to vector<16x32xf32>
      %274 = arith.addf %272, %273 : vector<16x32xf32>
      %275 = arith.addf %178, %274 : vector<16x32xf32>
      %cst_98 = arith.constant dense<0.000000e+00> : vector<16xf32>
      %276 = vector.multi_reduction <add>, %275, %cst_98 [1] : vector<16x32xf32> to vector<16xf32>
      %277 = vector.shape_cast %276 : vector<16xf32> to vector<16x1xf32>
      %cst_99 = arith.constant 3.200000e+01 : f32
      %278 = vector.broadcast %cst_99 : f32 to vector<16x1xf32>
      %279 = arith.divf %277, %278 : vector<16x1xf32>
      %280 = vector.broadcast %279 : vector<16x1xf32> to vector<16x32xf32>
      %281 = arith.subf %275, %280 : vector<16x32xf32>
      %282 = arith.mulf %281, %281 : vector<16x32xf32>
      %cst_100 = arith.constant dense<0.000000e+00> : vector<16xf32>
      %283 = vector.multi_reduction <add>, %282, %cst_100 [1] : vector<16x32xf32> to vector<16xf32>
      %284 = vector.shape_cast %283 : vector<16xf32> to vector<16x1xf32>
      %cst_101 = arith.constant 3.200000e+01 : f32
      %285 = vector.broadcast %cst_101 : f32 to vector<16x1xf32>
      %286 = arith.divf %284, %285 : vector<16x1xf32>
      %287 = vector.broadcast %279 : vector<16x1xf32> to vector<16x32xf32>
      %288 = arith.subf %275, %287 : vector<16x32xf32>
      %cst_102 = arith.constant 9.99999974E-6 : f32
      %289 = vector.broadcast %cst_102 : f32 to vector<16x1xf32>
      %290 = arith.addf %286, %289 : vector<16x1xf32>
      %291 = math.rsqrt %290 : vector<16x1xf32>
      %292 = vector.broadcast %291 : vector<16x1xf32> to vector<16x32xf32>
      %293 = arith.mulf %288, %292 : vector<16x32xf32>
      %294 = vector.broadcast %10 : vector<1x32xf32> to vector<16x32xf32>
      %295 = arith.mulf %293, %294 : vector<16x32xf32>
      %296 = vector.broadcast %12 : vector<1x32xf32> to vector<16x32xf32>
      %297 = arith.addf %295, %296 : vector<16x32xf32>
      %298 = arith.truncf %297 : vector<16x32xf32> to vector<16x32xbf16>
      %cst_103 = arith.constant dense<0.000000e+00> : vector<16x128xf32>
      %299 = tpu.matmul %298, %24, %cst_103 {dimension_numbers = #tpu.dot_dimension_numbers<[1], [0], [0], [1], [0, 0, 1, 1], [], []>} : vector<16x32xbf16>, vector<32x128xbf16>, vector<16x128xf32> -> vector<16x128xf32>
      %300 = vector.broadcast %16 : vector<1x128xf32> to vector<16x128xf32>
      %301 = arith.addf %299, %300 : vector<16x128xf32>
      %cst_104 = arith.constant 1.702000e+00 : f32
      %302 = vector.broadcast %cst_104 : f32 to vector<16x128xf32>
      %303 = arith.mulf %302, %301 : vector<16x128xf32>
      %304 = arith.negf %303 : vector<16x128xf32>
      %305 = math.exp %304 : vector<16x128xf32>
      %cst_105 = arith.constant 1.000000e+00 : f32
      %306 = vector.broadcast %cst_105 : f32 to vector<16x128xf32>
      %307 = arith.addf %306, %305 : vector<16x128xf32>
      %308 = arith.divf %306, %307 : vector<16x128xf32>
      %309 = arith.mulf %301, %308 : vector<16x128xf32>
      %310 = arith.truncf %309 : vector<16x128xf32> to vector<16x128xbf16>
      %cst_106 = arith.constant dense<0.000000e+00> : vector<16x32xf32>
      %311 = tpu.matmul %310, %26, %cst_106 {dimension_numbers = #tpu.dot_dimension_numbers<[1], [0], [0], [1], [0, 0, 1, 1], [], []>} : vector<16x128xbf16>, vector<128x32xbf16>, vector<16x32xf32> -> vector<16x32xf32>
      %312 = vector.broadcast %14 : vector<1x32xf32> to vector<16x32xf32>
      %313 = arith.addf %311, %312 : vector<16x32xf32>
      %314 = arith.addf %275, %313 : vector<16x32xf32>
      %c1_107 = arith.constant 1 : index
      %c0_108 = arith.constant 0 : index
      %c0_109 = arith.constant 0 : index
      %315 = vector.load %arg13[%c1_107, %c0_108, %c0_109] : memref<2x16x32xf32, #tpu.memory_space<vmem>>, vector<1x16x32xf32>
      %316 = vector.shape_cast %315 : vector<1x16x32xf32> to vector<16x32xf32>
      %317 = vector.shape_cast %314 : vector<16x32xf32> to vector<1x16x32xf32>
      tpu.vector_store %arg13[%c1_107, %c0_108, %c0_109], %317 {strides = array<i32>} : memref<2x16x32xf32, #tpu.memory_space<vmem>>, vector<1x16x32xf32>,
    } else {
    }
    %c3_i32 = arith.constant 3 : i32
    %33 = arith.cmpi eq, %arg1, %c3_i32 : i32
    %34 = arith.extui %33 : i1 to i32
    %c0_i32_34 = arith.constant 0 : i32
    %35 = arith.cmpi ne, %34, %c0_i32_34 : i32
    scf.if %35 {
      %c2_35 = arith.constant 2 : index
      %c0_36 = arith.constant 0 : index
      %36 = vector.load %arg4[%c2_35, %c0_36] : memref<4x32xf32, #tpu.memory_space<vmem>>, vector<1x32xf32>
      %c3_37 = arith.constant 3 : index
      %c0_38 = arith.constant 0 : index
      %37 = vector.load %arg4[%c3_37, %c0_38] : memref<4x32xf32, #tpu.memory_space<vmem>>, vector<1x32xf32>
      %c0_39 = arith.constant 0 : index
      %c0_40 = arith.constant 0 : index
      %c0_41 = arith.constant 0 : index
      %38 = vector.load %arg13[%c0_39, %c0_40, %c0_41] : memref<2x16x32xf32, #tpu.memory_space<vmem>>, vector<1x1x32xf32>
      %39 = vector.shape_cast %38 : vector<1x1x32xf32> to vector<1x32xf32>
      %cst = arith.constant dense<0.000000e+00> : vector<1xf32>
      %40 = vector.multi_reduction <add>, %39, %cst [1] : vector<1x32xf32> to vector<1xf32>
      %41 = vector.shape_cast %40 : vector<1xf32> to vector<1x1xf32>
      %cst_42 = arith.constant 3.200000e+01 : f32
      %42 = vector.broadcast %cst_42 : f32 to vector<1x1xf32>
      %43 = arith.divf %41, %42 : vector<1x1xf32>
      %44 = vector.broadcast %43 : vector<1x1xf32> to vector<1x32xf32>
      %45 = arith.subf %39, %44 : vector<1x32xf32>
      %46 = arith.mulf %45, %45 : vector<1x32xf32>
      %cst_43 = arith.constant dense<0.000000e+00> : vector<1xf32>
      %47 = vector.multi_reduction <add>, %46, %cst_43 [1] : vector<1x32xf32> to vector<1xf32>
      %48 = vector.shape_cast %47 : vector<1xf32> to vector<1x1xf32>
      %cst_44 = arith.constant 3.200000e+01 : f32
      %49 = vector.broadcast %cst_44 : f32 to vector<1x1xf32>
      %50 = arith.divf %48, %49 : vector<1x1xf32>
      %51 = vector.broadcast %43 : vector<1x1xf32> to vector<1x32xf32>
      %52 = arith.subf %39, %51 : vector<1x32xf32>
      %cst_45 = arith.constant 9.99999974E-6 : f32
      %53 = vector.broadcast %cst_45 : f32 to vector<1x1xf32>
      %54 = arith.addf %50, %53 : vector<1x1xf32>
      %55 = math.rsqrt %54 : vector<1x1xf32>
      %56 = vector.broadcast %55 : vector<1x1xf32> to vector<1x32xf32>
      %57 = arith.mulf %52, %56 : vector<1x32xf32>
      %58 = arith.mulf %57, %36 : vector<1x32xf32>
      %59 = arith.addf %58, %37 : vector<1x32xf32>
      %60 = arith.truncf %59 : vector<1x32xf32> to vector<1x32xbf16>
      %c0_46 = arith.constant 0 : index
      %c0_47 = arith.constant 0 : index
      %61 = vector.load %arg5[%c0_46, %c0_47] : memref<32x16xbf16, #tpu.memory_space<vmem>>, vector<32x16xbf16>
      %cst_48 = arith.constant dense<0.000000e+00> : vector<1x16xf32>
      %62 = tpu.matmul %60, %61, %cst_48 {dimension_numbers = #tpu.dot_dimension_numbers<[1], [0], [0], [1], [0, 0, 1, 1], [], []>} : vector<1x32xbf16>, vector<32x16xbf16>, vector<1x16xf32> -> vector<1x16xf32>
      %c0_49 = arith.constant 0 : index
      %c0_50 = arith.constant 0 : index
      %c0_51 = arith.constant 0 : index
      %63 = vector.load %arg12[%c0_49, %c0_50, %c0_51] : memref<2x1x16xf32, #tpu.memory_space<vmem>>, vector<1x1x16xf32>
      %64 = vector.shape_cast %63 : vector<1x1x16xf32> to vector<1x16xf32>
      %65 = vector.shape_cast %62 : vector<1x16xf32> to vector<1x1x16xf32>
      tpu.vector_store %arg12[%c0_49, %c0_50, %c0_51], %65 {strides = array<i32>} : memref<2x1x16xf32, #tpu.memory_space<vmem>>, vector<1x1x16xf32>,
      %c1_52 = arith.constant 1 : index
      %c0_53 = arith.constant 0 : index
      %c0_54 = arith.constant 0 : index
      %66 = vector.load %arg13[%c1_52, %c0_53, %c0_54] : memref<2x16x32xf32, #tpu.memory_space<vmem>>, vector<1x1x32xf32>
      %67 = vector.shape_cast %66 : vector<1x1x32xf32> to vector<1x32xf32>
      %cst_55 = arith.constant dense<0.000000e+00> : vector<1xf32>
      %68 = vector.multi_reduction <add>, %67, %cst_55 [1] : vector<1x32xf32> to vector<1xf32>
      %69 = vector.shape_cast %68 : vector<1xf32> to vector<1x1xf32>
      %cst_56 = arith.constant 3.200000e+01 : f32
      %70 = vector.broadcast %cst_56 : f32 to vector<1x1xf32>
      %71 = arith.divf %69, %70 : vector<1x1xf32>
      %72 = vector.broadcast %71 : vector<1x1xf32> to vector<1x32xf32>
      %73 = arith.subf %67, %72 : vector<1x32xf32>
      %74 = arith.mulf %73, %73 : vector<1x32xf32>
      %cst_57 = arith.constant dense<0.000000e+00> : vector<1xf32>
      %75 = vector.multi_reduction <add>, %74, %cst_57 [1] : vector<1x32xf32> to vector<1xf32>
      %76 = vector.shape_cast %75 : vector<1xf32> to vector<1x1xf32>
      %cst_58 = arith.constant 3.200000e+01 : f32
      %77 = vector.broadcast %cst_58 : f32 to vector<1x1xf32>
      %78 = arith.divf %76, %77 : vector<1x1xf32>
      %79 = vector.broadcast %71 : vector<1x1xf32> to vector<1x32xf32>
      %80 = arith.subf %67, %79 : vector<1x32xf32>
      %cst_59 = arith.constant 9.99999974E-6 : f32
      %81 = vector.broadcast %cst_59 : f32 to vector<1x1xf32>
      %82 = arith.addf %78, %81 : vector<1x1xf32>
      %83 = math.rsqrt %82 : vector<1x1xf32>
      %84 = vector.broadcast %83 : vector<1x1xf32> to vector<1x32xf32>
      %85 = arith.mulf %80, %84 : vector<1x32xf32>
      %86 = arith.mulf %85, %36 : vector<1x32xf32>
      %87 = arith.addf %86, %37 : vector<1x32xf32>
      %88 = arith.truncf %87 : vector<1x32xf32> to vector<1x32xbf16>
      %c0_60 = arith.constant 0 : index
      %c0_61 = arith.constant 0 : index
      %89 = vector.load %arg5[%c0_60, %c0_61] : memref<32x16xbf16, #tpu.memory_space<vmem>>, vector<32x16xbf16>
      %cst_62 = arith.constant dense<0.000000e+00> : vector<1x16xf32>
      %90 = tpu.matmul %88, %89, %cst_62 {dimension_numbers = #tpu.dot_dimension_numbers<[1], [0], [0], [1], [0, 0, 1, 1], [], []>} : vector<1x32xbf16>, vector<32x16xbf16>, vector<1x16xf32> -> vector<1x16xf32>
      %c1_63 = arith.constant 1 : index
      %c0_64 = arith.constant 0 : index
      %c0_65 = arith.constant 0 : index
      %91 = vector.load %arg12[%c1_63, %c0_64, %c0_65] : memref<2x1x16xf32, #tpu.memory_space<vmem>>, vector<1x1x16xf32>
      %92 = vector.shape_cast %91 : vector<1x1x16xf32> to vector<1x16xf32>
      %93 = vector.shape_cast %90 : vector<1x16xf32> to vector<1x1x16xf32>
      tpu.vector_store %arg12[%c1_63, %c0_64, %c0_65], %93 {strides = array<i32>} : memref<2x1x16xf32, #tpu.memory_space<vmem>>, vector<1x1x16xf32>,
    } else {
    }
    return
  }
  func.func @transform_0(%arg0: i32, %arg1: i32) -> (i32, i32, i32) {
    %c0_i32 = arith.constant 0 : i32
    %c0_i32_0 = arith.constant 0 : i32
    %c0_i32_1 = arith.constant 0 : i32
    return %arg0, %c0_i32, %c0_i32_0 : i32, i32, i32
  }
  func.func @transform_1(%arg0: i32, %arg1: i32) -> (i32, i32, i32) {
    %c0_i32 = arith.constant 0 : i32
    %c0_i32_0 = arith.constant 0 : i32
    %c0_i32_1 = arith.constant 0 : i32
    return %arg0, %c0_i32, %c0_i32_0 : i32, i32, i32
  }
  func.func @transform_2(%arg0: i32, %arg1: i32) -> (i32, i32) {
    %c0_i32 = arith.constant 0 : i32
    %c0_i32_0 = arith.constant 0 : i32
    %c0_i32_1 = arith.constant 0 : i32
    return %c0_i32, %c0_i32_0 : i32, i32
  }
  func.func @transform_3(%arg0: i32, %arg1: i32) -> (i32, i32) {
    %c0_i32 = arith.constant 0 : i32
    %c0_i32_0 = arith.constant 0 : i32
    %c0_i32_1 = arith.constant 0 : i32
    return %c0_i32, %c0_i32_0 : i32, i32
  }
  func.func @transform_4(%arg0: i32, %arg1: i32) -> (i32, i32, i32) {
    %c0_i32 = arith.constant 0 : i32
    %c0_i32_0 = arith.constant 0 : i32
    %c0_i32_1 = arith.constant 0 : i32
    return %arg1, %c0_i32, %c0_i32_0 : i32, i32, i32
  }
  func.func @transform_5(%arg0: i32, %arg1: i32) -> (i32, i32, i32) {
    %c0_i32 = arith.constant 0 : i32
    %c0_i32_0 = arith.constant 0 : i32
    %c0_i32_1 = arith.constant 0 : i32
    return %arg1, %c0_i32, %c0_i32_0 : i32, i32, i32
  }
  func.func @transform_6(%arg0: i32, %arg1: i32) -> (i32, i32, i32) {
    %c0_i32 = arith.constant 0 : i32
    %c0_i32_0 = arith.constant 0 : i32
    %c0_i32_1 = arith.constant 0 : i32
    return %arg1, %c0_i32, %c0_i32_0 : i32, i32, i32
  }
  func.func @transform_7(%arg0: i32, %arg1: i32) -> (i32, i32, i32) {
    %c0_i32 = arith.constant 0 : i32
    %c0_i32_0 = arith.constant 0 : i32
    %c0_i32_1 = arith.constant 0 : i32
    return %arg1, %c0_i32, %c0_i32_0 : i32, i32, i32
  }
  func.func @transform_8(%arg0: i32, %arg1: i32) -> (i32, i32, i32) {
    %c0_i32 = arith.constant 0 : i32
    %c0_i32_0 = arith.constant 0 : i32
    %c0_i32_1 = arith.constant 0 : i32
    return %arg1, %c0_i32, %c0_i32_0 : i32, i32, i32
  }
  func.func @transform_9(%arg0: i32, %arg1: i32) -> (i32, i32, i32) {
    %c0_i32 = arith.constant 0 : i32
    %c0_i32_0 = arith.constant 0 : i32
    %c0_i32_1 = arith.constant 0 : i32
    return %arg1, %c0_i32, %c0_i32_0 : i32, i32, i32
  }
  func.func @transform_10(%arg0: i32, %arg1: i32) -> (i32, i32, i32) {
    %c0_i32 = arith.constant 0 : i32
    %c0_i32_0 = arith.constant 0 : i32
    %c0_i32_1 = arith.constant 0 : i32
    return %arg0, %c0_i32, %c0_i32_0 : i32, i32, i32
  }
}

</mosaic_0001>

<bundles_post_ra>
// kernel: visual_encoder_int.1
= control target key start
LH: loop header
LB: loop body
LE: loop exit
PB: predicated region body
PF: predicated region fallthrough
CT: control target
= control target key end

     0   :  { %s6608_s0 = inlined_call_operand.vmem [shape: f32[2,12,32], index: 0, kind: input, shape index: {}]   ;;  %s6609_s1 = inlined_call_operand.vmem [shape: f32[2,4,32], index: 1, kind: input, shape index: {}]   ;;  %s6610_s2 = inlined_call_operand.vmem [shape: f32[4,32], index: 2, kind: input, shape index: {}]   ;;  %s6611_s3 = inlined_call_operand.vmem [shape: bf16[32,16], index: 3, kind: input, shape index: {}]   ;;  %s6612_s4 = inlined_call_operand.vmem [shape: bf16[4,32,96], index: 4, kind: input, shape index: {}]   ;;  %s6613_s5 = inlined_call_operand.vmem [shape: bf16[4,32,32], index: 5, kind: input, shape index: {}]   ;;  %s6614_s6 = inlined_call_operand.vmem [shape: bf16[4,32,128], index: 6, kind: input, shape index: {}]   ;;  %s6615_s7 = inlined_call_operand.vmem [shape: bf16[4,128,32], index: 7, kind: input, shape index: {}]   ;;  %s6616_s8 = inlined_call_operand.vmem [shape: f32[4,6,32], index: 8, kind: input, shape index: {}]   ;;  %s6617_s9 = inlined_call_operand.vmem [shape: f32[4,2,128], index: 9, kind: input, shape index: {}]   ;;  %s6618_s10 = inlined_call_operand.hbm [shape: f32[2,1,16], index: 10, kind: output, shape index: {}]  }
   0x1   :  { %6636 = sst [smem:[#allocation22_spill]] %s6612_s4 }
   0x2   :  { %6637 = sst [smem:[#allocation23_spill]] %s6613_s5 }
   0x3   :  { %15 = vsyncpa [#allocation4], 0  ;;  %s5450_s13 = smov 0   ;;  %s5452_s14 = smov 0  }
   0x4   :  { %s5454_s15 = smov 0  }
   0x5 LB: > { %s30_s17 = sadd.s32 1, %s5352_s14  ;;  %p4329_p1 = scmp.ge.s32.totalorder %s5356_s15, 1  ;;  %s5356_s15 = sphi %s5454_s15, %s21_s15   ;;  %s5352_s14 = sphi %s5452_s14, %s6676_s14   ;;  %s5348_s13 = sphi %s5450_s13, %s6675_s13  }
   0x6   : > { %p31_p0 = scmp.ge.s32.totalorder %s30_s17, 4  ;;  %p396_p2 = scmp.lt.s32.totalorder %s5356_s15, 5 }
   0x8   : > { %s6678_s17 = smov (%p31_p0, %s30_s17), 0  ;;  %p397_p3 = pnand %p4329_p1, %p396_p2 }
   0x9   : > { %6638 = sst [smem:[#allocation6_spill]] %s6678_s17 }
   0xa   : > { %400 = sbr.rel (%p397_p3) target bundleno = 11886 (0x2e6e), region = 60 }
  0x11   : > { %p476_p4 = scmp.lt.s32.totalorder %s5348_s13, 3  ;;  %s6639_s4 = sld [smem:[#allocation22_spill]] }
  0x12   : > { %s6640_s5 = sld [smem:[#allocation23_spill]]  ;;  %p4340_p5 = scmp.ne.s32.totalorder %s5348_s13, 0 }
  0x13   : > { %s477_s18 = scalar_select %p476_p4, %s5348_s13, 3 }
  0x14   : > { %509 = sbr.rel (%p4340_p5) target bundleno = 343 (0x157), region = 64  ;;  %v512_v0 = vld [vmem:[%s6608_s0] sm:$0xff] (!%p4340_p5)  ;;  %vm514_vm0 = vcmask (!%p4340_p5), 261120   ;;  %v4343_v1 = vld [vmem:[%s6608_s0 + $0x10] sm:$0xff] (!%p4340_p5)  ;;  %v513_v2 = vld [vmem:[%s6608_s0 + $0x8] sm:$0xf] (!%p4340_p5) }
  0x15   : > { %s4439_s19 = sshll.u32 %s477_s18, 4  ;;  %s4442_s20 = sshll.u32 %s477_s18, 6  ;;  %vm518_vm1 = vcmask (!%p4340_p5), 257024   ;;  %v515_v3 = vsel (!%p4340_p5), %vm514_vm0, %v512_v0, 0.0  ;;  %v562_v4 = vsel (!%p4340_p5), %vm514_vm0, %v4343_v1, 0.0 }
  0x16   : > { %s5486_s29 = scalar_lea.vmem %s6614_s6, %s4439_s19  ;;  %s5491_s12 = scalar_lea.vmem %s6615_s7, %s4442_s20  ;;  %v557_v5 = vld [vmem:[%s6609_s1] sm:$0xf] (!%p4340_p5)  ;;  %516 = vadd.xlane.f32.xlu0 (!%p4340_p5), %v515_v3  ;;  %563 = vadd.xlane.f32.xlu1 (!%p4340_p5), %v562_v4  ;;  %v4345_v6 = vld [vmem:[%s6609_s1 + $0x4] sm:$0xf] (!%p4340_p5)  ;;  %v4344_v7 = vld [vmem:[%s6608_s0 + $0x18] sm:$0xf] (!%p4340_p5) }
  0x17   : > { %s5476_s23 = scalar_lea.vmem %s6639_s4, %s4439_s19  ;;  %s4338_s16 = sshll.u32 %s477_s18, 3  ;;  %558 = vst.msk [vmem:[#allocation2 + $0xc] sm:$0xf] (!%p4340_p5), %vm518_vm1, %v557_v5  ;;  %v519_v8 = vsel (!%p4340_p5), %vm518_vm1, %v513_v2, 0.0  ;;  %597 = vst.msk [vmem:[#allocation2 + $0x1c] sm:$0xf] (!%p4340_p5), %vm518_vm1, %v4345_v6 }
  0x18   : > { %s5481_s26 = scalar_lea.vmem %s6640_s5, %s4439_s19  ;;  %s4339_s17 = sshll.u32 %s477_s18, 1  ;;  %v565_v9 = vsel (!%p4340_p5), %vm518_vm1, %v4344_v7, 0.0  ;;  %v4341_v43 = vld [vmem:[%s6610_s2] ss:$0 sm:$0xff] (!%p4340_p5)  ;;  %v4342_v45 = vld [vmem:[%s6610_s2 + $0x1] ss:$0 sm:$0xff] (!%p4340_p5) }
  0x19   : > { %s5496_s4 = scalar_lea.vmem %s6616_s8, %s4338_s16  ;;  %s5501_s5 = scalar_lea.vmem %s6617_s9, %s4339_s17 }
  0x1a   : > { %520 = vadd.xlane.f32.xlu0 (!%p4340_p5), %v519_v8  ;;  %566 = vadd.xlane.f32.xlu1 (!%p4340_p5), %v565_v9 }
  0xa3   : > { %v517_v10 = vpop.xlane.xlu0 %516  ;;  %v564_v11 = vpop.xlane.xlu1 %563 }
  0xa4   : > { %v523_v12 = vmul.f32 0.03125, %v517_v10  ;;  %v568_v13 = vmul.f32 0.03125, %v564_v11 }
  0xa6   : > { %v525_v14 = vsub.f32 %v512_v0, %v523_v12  ;;  %v570_v15 = vsub.f32 %v4343_v1, %v568_v13 }
  0xa7   : > { %v521_v16 = vpop.xlane.xlu0 %520  ;;  %v567_v17 = vpop.xlane.xlu1 %566 }
  0xa8   : > { %v524_v18 = vmul.f32 0.03125, %v521_v16  ;;  %v569_v19 = vmul.f32 0.03125, %v567_v17  ;;  %v527_v20 = vmul.f32 %v525_v14, %v525_v14  ;;  %v572_v21 = vmul.f32 %v570_v15, %v570_v15 }
  0xaa   : > { %v526_v22 = vsub.f32 %v513_v2, %v524_v18  ;;  %v571_v23 = vsub.f32 %v4344_v7, %v569_v19  ;;  %v529_v24 = vsel %vm514_vm0, %v527_v20, 0.0  ;;  %v574_v25 = vsel %vm514_vm0, %v572_v21, 0.0 }
  0xab   : > { %530 = vadd.xlane.f32.xlu0 %v529_v24 }
  0xac   : > { %v528_v26 = vmul.f32 %v526_v22, %v526_v22  ;;  %v573_v27 = vmul.f32 %v571_v23, %v571_v23 }
  0xae   : > { %v532_v28 = vsel %vm518_vm1, %v528_v26, 0.0  ;;  %v577_v29 = vsel %vm518_vm1, %v573_v27, 0.0 }
  0xaf   : > { %575 = vadd.xlane.f32.xlu0 %v574_v25  ;;  %533 = vadd.xlane.f32.xlu1 %v532_v28 }
  0xb3   : > { %578 = vadd.xlane.f32.xlu1 %v577_v29 }
 0x138   : > { %v531_v30 = vpop.xlane.xlu0 %530 }
 0x139   : > { %v535_v31 = vmul.f32 0.03125, %v531_v30 }
 0x13b   : > { %v537_v32 = vadd.f32 1e-05, %v535_v31 }
 0x13c   : > { %v534_v33 = vpop.xlane.xlu1 %533  ;;  %v576_v34 = vpop.xlane.xlu0 %575 }
 0x13d   : > { %5036 = vrsqrt.f32 %v537_v32  ;;  %v536_v35 = vmul.f32 0.03125, %v534_v33  ;;  %v580_v36 = vmul.f32 0.03125, %v576_v34 }
 0x13f   : > { %v538_v37 = vadd.f32 1e-05, %v536_v35  ;;  %v582_v38 = vadd.f32 1e-05, %v580_v36 }
 0x140   : > { %v579_v39 = vpop.xlane.xlu1 %578 }
 0x141   : > { %5038 = vrsqrt.f32 %v538_v37  ;;  %v581_v40 = vmul.f32 0.03125, %v579_v39 }
 0x142   : > { %5040 = vrsqrt.f32 %v582_v38 }
 0x143   : > { %v583_v41 = vadd.f32 1e-05, %v581_v40 }
 0x145   : > { %5042 = vrsqrt.f32 %v583_v41 }
 0x147   : > { %v5037_v42 = vpop.eup %5036 }
 0x148   : > { %v541_v44 = vmul.f32 %v5037_v42, %v525_v14 }
 0x14a   : > { %v547_v46 = vmul.f32 %v4341_v43, %v541_v44 }
 0x14b   : > { %v5039_v47 = vpop.eup %5038 }
 0x14c   : > { %v5041_v48 = vpop.eup %5040  ;;  %v553_v49 = vadd.f32 %v4342_v45, %v547_v46  ;;  %v542_v50 = vmul.f32 %v5039_v47, %v526_v22 }
 0x14d   : > { %v586_v51 = vmul.f32 %v5041_v48, %v570_v15 }
 0x14e   : > { %555 = vst.msk [vmem:[#allocation2] sm:$0xff] %vm514_vm0, %v553_v49  ;;  %v548_v52 = vmul.f32 %v4341_v43, %v542_v50 }
 0x14f   : > { %v5043_v53 = vpop.eup %5042  ;;  %v588_v54 = vmul.f32 %v4341_v43, %v586_v51 }
 0x150   : > { %v554_v55 = vadd.f32 %v4342_v45, %v548_v52  ;;  %v587_v56 = vmul.f32 %v5043_v53, %v571_v23 }
 0x151   : > { %v590_v57 = vadd.f32 %v4342_v45, %v588_v54 }
 0x152   : > { %556 = vst.msk [vmem:[#allocation2 + $0x8] sm:$0xf] %vm518_vm1, %v554_v55  ;;  %v589_v58 = vmul.f32 %v4341_v43, %v587_v56 }
 0x153   : > { %593 = vst.msk [vmem:[#allocation2 + $0x10] sm:$0xff] %vm514_vm0, %v590_v57 }
 0x154   : > { %v591_v59 = vadd.f32 %v4342_v45, %v589_v58 }
 0x156   : > { %594 = vst.msk [vmem:[#allocation2 + $0x18] sm:$0xf] %vm518_vm1, %v591_v59 }
 0x157 PF: > { %v5543_v60 = vld [vmem:[%s5496_s4] sm:$0x1]  ;;  %v5546_v61 = vld [vmem:[%s5496_s4 + $0x1] sm:$0x1]  ;;  %v5549_v62 = vld [vmem:[%s5496_s4 + $0x2] sm:$0x1] }
 0x158   : > { %6641 = vst [vmem:[#allocation7_spill] sm:$0xff] %v5543_v60  ;;  %6642 = vst [vmem:[#allocation8_spill] sm:$0xff] %v5546_v61  ;;  %v5552_v63 = vld [vmem:[%s5496_s4 + $0x3] sm:$0x1]  ;;  %v5555_v0 = vld [vmem:[%s5496_s4 + $0x4] sm:$0x1] }
 0x159   : > { %v5558_v1 = vld [vmem:[%s5496_s4 + $0x5] sm:$0x1]  ;;  %v5561_v2 = vld [vmem:[%s5501_s5] sm:$0x1]  ;;  %v5564_v3 = vld [vmem:[%s5501_s5 + $0x1] sm:$0x1] }
 0x15a   : > { %6643 = vst [vmem:[#allocation9_spill] sm:$0xff] %v5558_v1  ;;  %6644 = vst [vmem:[#allocation10_spill] sm:$0xff] %v5561_v2  ;;  %v5567_v4 = vld [vmem:[%s5476_s23] sm:$0xf]  ;;  %v5570_v5 = vld [vmem:[%s5476_s23 + $0x4] sm:$0xf] }
 0x15b   : > { %6645 = vst [vmem:[#allocation11_spill] sm:$0xff] %v5564_v3  ;;  %v5573_v6 = vld [vmem:[%s5476_s23 + $0x8] sm:$0xf]  ;;  %v5576_v7 = vld [vmem:[%s5476_s23 + $0xc] sm:$0xf]  ;;  %p4346_p6 = scmp.ge.s32.totalorder %s5348_s13, 2 }
 0x15c   : > { %6646 = vst [vmem:[#allocation12_spill] sm:$0xff] %v5573_v6  ;;  %6647 = vst [vmem:[#allocation13_spill] sm:$0xff] %v5576_v7  ;;  %v5579_v8 = vld [vmem:[%s5481_s26] sm:$0xf]  ;;  %v5582_v9 = vld [vmem:[%s5481_s26 + $0x4] sm:$0xf]  ;;  %v5665_v46 = vcombine.low (!%p4346_p6), %v5567_v4, %v5570_v5  ;;  %v5672_v48 = vcombine.low (!%p4346_p6), %v5573_v6, %v5576_v7  ;;  %v669_v53 = vlaneseq (!%p4346_p6) }
 0x15d   : > { %v5585_v10 = vld [vmem:[%s5481_s26 + $0x8] sm:$0xf]  ;;  %v5588_v11 = vld [vmem:[%s5481_s26 + $0xc] sm:$0xf]  ;;  %v5591_v12 = vld [vmem:[%s5486_s29] sm:$0xf] }
 0x15e   : > { %v5594_v13 = vld [vmem:[%s5486_s29 + $0x4] sm:$0xf]  ;;  %v5597_v14 = vld [vmem:[%s5486_s29 + $0x8] sm:$0xf]  ;;  %v5600_v15 = vld [vmem:[%s5486_s29 + $0xc] sm:$0xf] }
 0x15f   : > { %6648 = vst [vmem:[#allocation14_spill] sm:$0xff] %v5597_v14  ;;  %6649 = vst [vmem:[#allocation15_spill] sm:$0xff] %v5600_v15  ;;  %v5603_v16 = vld [vmem:[%s5491_s12] sm:$0xf]  ;;  %v5606_v17 = vld [vmem:[%s5491_s12 + $0x4] sm:$0xf] }
 0x160   : > { %v5609_v18 = vld [vmem:[%s5491_s12 + $0x8] sm:$0xf]  ;;  %v5612_v19 = vld [vmem:[%s5491_s12 + $0xc] sm:$0xf]  ;;  %v5615_v20 = vld [vmem:[%s5491_s12 + $0x10] sm:$0xf] }
 0x161   : > { %v5618_v21 = vld [vmem:[%s5491_s12 + $0x14] sm:$0xf]  ;;  %v5621_v22 = vld [vmem:[%s5491_s12 + $0x18] sm:$0xf]  ;;  %v5624_v23 = vld [vmem:[%s5491_s12 + $0x1c] sm:$0xf] }
 0x162   : > { %v5627_v24 = vld [vmem:[%s5491_s12 + $0x20] sm:$0xf]  ;;  %v5630_v25 = vld [vmem:[%s5491_s12 + $0x24] sm:$0xf]  ;;  %v5633_v26 = vld [vmem:[%s5491_s12 + $0x28] sm:$0xf] }
 0x163   : > { %6650 = vst [vmem:[#allocation16_spill] sm:$0xff] %v5633_v26  ;;  %v5636_v27 = vld [vmem:[%s5491_s12 + $0x2c] sm:$0xf]  ;;  %v5639_v28 = vld [vmem:[%s5491_s12 + $0x30] sm:$0xf]  ;;  %637 = sbr.rel (%p4346_p6) target bundleno = 5840 (0x16d0), region = 68 }
 0x164   : > { %6651 = vst [vmem:[#allocation17_spill] sm:$0xff] %v5636_v27  ;;  %6652 = vst [vmem:[#allocation18_spill] sm:$0xff] %v5639_v28  ;;  %v5642_v29 = vld [vmem:[%s5491_s12 + $0x34] sm:$0xf]  ;;  %v5645_v30 = vld [vmem:[%s5491_s12 + $0x38] sm:$0xf] }
 0x165   : > { %6653 = vst [vmem:[#allocation19_spill] sm:$0xff] %v5642_v29  ;;  %6654 = vst [vmem:[#allocation20_spill] sm:$0xff] %v5645_v30  ;;  %v5648_v31 = vld [vmem:[%s5491_s12 + $0x3c] sm:$0xf]  ;;  %v5651_v32 = vld [vmem:[#allocation2] sm:$0xff] (!%p4346_p6)  ;;  %vm640_vm2 = vcmask (!%p4346_p6), 261120  }
 0x166   : > { %6655 = vst [vmem:[#allocation21_spill] sm:$0xff] %v5648_v31  ;;  %v5653_v33 = vld [vmem:[#allocation2 + $0x8] sm:$0xf] (!%p4346_p6)  ;;  %vm644_vm3 = vcmask (!%p4346_p6), 257024   ;;  %v641_v34 = vsel (!%p4346_p6), %vm640_vm2, %v5651_v32, 0.0  ;;  %v6619_v47 = vmov (!%p4346_p6), 0.0  }
 0x167   : > { %642 = vadd.xlane.f32.xlu0 (!%p4346_p6), %v641_v34  ;;  %v645_v35 = vsel (!%p4346_p6), %vm644_vm3, %v5653_v33, 0.0  ;;  %4585 = vmatprep.subr.bf16.mxu1 (!%p4346_p6), %v6619_v47  ;;  %vm5359_vm4 = vmmov (!%p4346_p6), 0   ;;  %v670_v56 = vshrl.u32 (!%p4346_p6), %v669_v53, 7  ;;  %s5360_s4 = smov (!%p4346_p6), 96   ;;  %s5361_s5 = smov (!%p4346_p6), 88   ;;  %vm746_vm5 = vcmask (!%p4346_p6), 64512  }
 0x168   : > { %4611 = vmatprep.subr.bf16.mxu0 (!%p4346_p6), %v6619_v47  ;;  %4586 = vmatpush3.bf16.msra.mxu1 (!%p4346_p6), %v5665_v46  ;;  %s5362_s23 = smov (!%p4346_p6), 120   ;;  %s5363_s26 = smov (!%p4346_p6), 80   ;;  %vm794_vm6 = vcmask (!%p4346_p6), 97280   ;;  %vm798_vm7 = vcmask (!%p4346_p6), 93184   ;;  %vm824_vm8 = vcmask (!%p4346_p6), 1045504   ;;  %vm1264_vm9 = vcmask (!%p4346_p6), 130048  }
 0x169   : > { %4589 = vmatprep.mubr.msk.bf16.mxu1 (!%p4346_p6), %vm5359_vm4, %v6619_v47  ;;  %4587 = vmatprep.subr.bf16.mxu1 (!%p4346_p6), %v6619_v47  ;;  %v5681_v57 = vsub.s32 (!%p4346_p6), 0, %v670_v56  ;;  %s5364_s29 = smov (!%p4346_p6), 72   ;;  %s5365_s12 = smov (!%p4346_p6), 64   ;;  %vm1267_vm10 = vcmask (!%p4346_p6), 195584  }
 0x16a   : > { %4613 = vmatprep.mubr.msk.bf16.mxu0 %vm5359_vm4, %v6619_v47  ;;  %s5366_s18 = smov 112   ;;  %s5367_s28 = smov 104  }
 0x16b   : > { %646 = vadd.xlane.f32.xlu0 %v645_v35  ;;  %v5685_v34 = vrot.slane %v5543_v60, %v5681_v57  ;;  %s5368_s16 = smov 48   ;;  %s5369_s17 = smov 56  }
 0x16c   : > { %4588 = vmatpush3.bf16.msra.mxu1 %v5672_v48  ;;  %s5370_s30 = smov 40   ;;  %s5371_s11 = smov 8  }
 0x16d   : > { %4593 = vmatprep.subr.bf16.mxu1 %v6619_v47  ;;  %s5372_s21 = smov 16   ;;  %s5373_s22 = smov 24  }
 0x1f4   : > { %v643_v36 = vpop.xlane.xlu0 %642 }
 0x1f5   : > { %v649_v37 = vmul.f32 0.03125, %v643_v36 }
 0x1f7   : > { %v651_v38 = vsub.f32 %v5651_v32, %v649_v37 }
 0x1f8   : > { %v647_v39 = vpop.xlane.xlu0 %646 }
 0x1f9   : > { %v650_v40 = vmul.f32 0.03125, %v647_v39  ;;  %v653_v41 = vmul.f32 %v651_v38, %v651_v38  ;;  %v5690_v39 = vrot.slane %v5546_v61, %v5681_v57 }
 0x1fb   : > { %v652_v42 = vsub.f32 %v5653_v33, %v650_v40  ;;  %v655_v43 = vsel %vm640_vm2, %v653_v41, 0.0 }
 0x1fc   : > { %656 = vadd.xlane.f32.xlu1 %v655_v43 }
 0x1fd   : > { %v654_v44 = vmul.f32 %v652_v42, %v652_v42 }
 0x1ff   : > { %v658_v45 = vsel %vm644_vm3, %v654_v44, 0.0 }
 0x200   : > { %659 = vadd.xlane.f32.xlu1 %v658_v45 }
 0x289   : > { %v657_v49 = vpop.xlane.xlu1 %656 }
 0x28a   : > { %v661_v50 = vmul.f32 0.03125, %v657_v49 }
 0x28c   : > { %v663_v51 = vadd.f32 1e-05, %v661_v50 }
 0x28d   : > { %v660_v52 = vpop.xlane.xlu1 %659 }
 0x28e   : > { %5074 = vrsqrt.f32 %v663_v51  ;;  %v662_v54 = vmul.f32 0.03125, %v660_v52 }
 0x290   : > { %v664_v55 = vadd.f32 1e-05, %v662_v54 }
 0x292   : > { %5076 = vrsqrt.f32 %v664_v55 }
 0x298   : > { %v5075_v58 = vpop.eup %5074 }
 0x299   : > { %v667_v59 = vmul.f32 %v5075_v58, %v651_v38  ;;  %v5700_v38 = vrot.slane %v5564_v3, %v5681_v57 }
 0x29b   : > { %v673_v37 = vmul.f32 %v5685_v34, %v667_v59 }
 0x29c   : > { %v5077_v35 = vpop.eup %5076 }
 0x29d   : > { %v668_v36 = vmul.f32 %v5077_v35, %v652_v42  ;;  %v679_v41 = vadd.f32 %v5690_v39, %v673_v37 }
 0x29f   : > { %v674_v40 = vmul.f32 %v5685_v34, %v668_v36 }
 0x2a1   : > { %v680_v43 = vadd.f32 %v5690_v39, %v674_v40 }
 0x2a3   : > { %v681_v44 = vpack.c.bf16 %v680_v43, %v679_v41 }
 0x2a5   : > { %4590 = vmatmul.mubr.msk.bf16.vlgmr.msra.gmra.mrb[0].mxu1 %vm640_vm2, %v681_v44 }
 0x2a6   : > { %4595 = vmatprep.mubr.msk.bf16.mxu1 %vm5359_vm4, %v6619_v47 }
 0x378   : > { %v735_v42 = vpop.f32.mrb[0].mxu1 }
 0x379   : > { %v4591_v45 = vpop.f32.mrb[1].mxu1  ;;  %v736_v50 = vadd.f32 %v735_v42, %v5700_v38 }
 0x37a   : > { %v738_v49 = vpop.f32.mrb[2].mxu1 }
 0x37b   : > { %v739_v51 = vadd.f32 %v738_v49, %v5700_v38  ;;  %v4592_v52 = vpop.f32.mrb[3].mxu1 }
 0x37d   : > { %v5704_v53 = vpack.c.bf16 %v739_v51, %v736_v50 }
 0x37f   : > { %744 = vrot.lane.b32.xlu0 %v5704_v53, %s5360_s4 }
 0x383   : > { %871 = vrot.lane.b32.xlu0 %v5704_v53, %s5361_s5 }
 0x387   : > { %869 = vrot.lane.b32.xlu0 %v5704_v53, %s5362_s23 }
 0x38b   : > { %994 = vrot.lane.b32.xlu0 %v5704_v53, %s5363_s26 }
 0x38f   : > { %1117 = vrot.lane.b32.xlu0 %v5704_v53, %s5364_s29 }
 0x3f1   : > { %v745_v54 = vpop.permute.xlu0 %744 }
 0x3f2   : > { %v751_v55 = vsel %vm746_vm5, %v745_v54, 0 }
 0x3f3   : > { %4594 = vmatpush3.bf16.xpose.msra.mxu1 %v751_v55 }
 0x3f4   : > { %4599 = vmatprep.subr.bf16.mxu1 %v6619_v47 }
 0x3fa   : > { %4596 = vmatmul.mubr.msk.bf16.vlgmr.msra.gmra.mrb[4].mxu1 %vm746_vm5, %v5704_v53 }
 0x3fb   : > { %4601 = vmatprep.mubr.msk.bf16.mxu1 %vm5359_vm4, %v6619_v47 }
 0x4cd   : > { %v787_v56 = vpop.f32.mrb[4].mxu1 }
 0x4ce   : > { %v4597_v58 = vpop.f32.mrb[5].mxu1  ;;  %v795_v59 = vsel %vm794_vm6, %v787_v56, -inf }
 0x4cf   : > { %796 = vmax.xlane.f32.xlu1 %v795_v59  ;;  %v790_v35 = vpop.f32.mrb[6].mxu1 }
 0x4d0   : > { %v4598_v36 = vpop.f32.mrb[7].mxu1  ;;  %v799_v37 = vsel %vm798_vm7, %v790_v35, -inf }
 0x4d3   : > { %800 = vmax.xlane.f32.xlu1 %v799_v37 }
 0x55c   : > { %v797_v40 = vpop.xlane.xlu1 %796 }
 0x55d   : > { %v802_v41 = vsub.f32 %v787_v56, %v797_v40 }
 0x55f   : > { %v804_v43 = vmul.f32 1.442695, %v802_v41 }
 0x560   : > { %v801_v44 = vpop.xlane.xlu1 %800 }
 0x561   : > { %5078 = vpow2.f32 %v804_v43  ;;  %v803_v42 = vsub.f32 %v790_v35, %v801_v44  ;;  %v872_v35 = vpop.permute.xlu0 %871 }
 0x562   : > { %v877_v44 = vsel %vm746_vm5, %v872_v35, 0 }
 0x563   : > { %v806_v45 = vmul.f32 1.442695, %v803_v42 }
 0x565   : > { %5080 = vpow2.f32 %v806_v45  ;;  %v870_v43 = vpop.permute.xlu0 %869 }
 0x569   : > { %v995_v42 = vpop.permute.xlu0 %994 }
 0x56a   : > { %v1000_v45 = vsel %vm746_vm5, %v995_v42, 0 }
 0x56b   : > { %v5079_v49 = vpop.eup %5078 }
 0x56c   : > { %v808_v50 = vsel %vm794_vm6, %v5079_v49, 0.0 }
 0x56d   : > { %809 = vadd.xlane.f32.xlu1 %v808_v50 }
 0x56f   : > { %v5081_v51 = vpop.eup %5080 }
 0x570   : > { %v811_v52 = vsel %vm798_vm7, %v5081_v51, 0.0 }
 0x571   : > { %812 = vadd.xlane.f32.xlu1 %v811_v52 }
 0x582   : > { %819 = vrot.lane.b32.xlu1 %v5704_v53, %s5365_s12 }
 0x586   : > { %992 = vrot.lane.b32.xlu1 %v5704_v53, %s5366_s18 }
 0x58a   : > { %1115 = vrot.lane.b32.xlu1 %v5704_v53, %s5367_s28 }
 0x5fa   : > { %v810_v54 = vpop.xlane.xlu1 %809 }
 0x5fb   : > { %5082 = vrcp.f32 %v810_v54 }
 0x5fe   : > { %v813_v55 = vpop.xlane.xlu1 %812 }
 0x5ff   : > { %5084 = vrcp.f32 %v813_v55 }
 0x602   : > { %v820_v56 = vpop.permute.xlu1 %819 }
 0x603   : > { %v826_v58 = vsel %vm824_vm8, %v820_v56, 0 }
 0x604   : > { %4600 = vmatpush3.bf16.msra.mxu1 %v826_v58 }
 0x605   : > { %4605 = vmatprep.subr.bf16.mxu1 %v6619_v47  ;;  %v5083_v59 = vpop.eup %5082 }
 0x606   : > { %v816_v37 = vmul.f32 %v5083_v59, %v5079_v49  ;;  %v1118_v49 = vpop.permute.xlu0 %1117  ;;  %v993_v50 = vpop.permute.xlu1 %992 }
 0x609   : > { %v5085_v36 = vpop.eup %5084 }
 0x60a   : > { %v817_v40 = vmul.f32 %v5085_v36, %v5081_v51  ;;  %v1123_v51 = vsel %vm746_vm5, %v1118_v49, 0  ;;  %v1116_v52 = vpop.permute.xlu1 %1115 }
 0x60c   : > { %v818_v41 = vpack.c.bf16 %v817_v40, %v816_v37 }
 0x60e   : > { %4602 = vmatmul.mubr.msk.bf16.vlgmr.msra.gmra.mrb[8].mxu1 %vm794_vm6, %v818_v41 }
 0x60f   : > { %4606 = vmatpush3.bf16.xpose.msra.mxu1 %v877_v44  ;;  %4607 = vmatprep.mubr.msk.bf16.mxu1 %vm5359_vm4, %v6619_v47 }
 0x610   : > { %4617 = vmatprep.subr.bf16.mxu1 %v6619_v47 }
 0x616   : > { %4608 = vmatmul.mubr.msk.bf16.vlgmr.msra.gmra.mrb[12].mxu1 %vm746_vm5, %v870_v43 }
 0x617   : > { %4618 = vmatpush3.bf16.xpose.msra.mxu1 %v1000_v45  ;;  %4619 = vmatprep.mubr.msk.bf16.mxu1 %vm5359_vm4, %v6619_v47 }
 0x618   : > { %4629 = vmatprep.subr.bf16.mxu1 %v6619_v47 }
 0x61e   : > { %4620 = vmatmul.mubr.msk.bf16.vlgmr.msra.gmra.mrb[16].mxu1 %vm746_vm5, %v993_v50 }
 0x61f   : > { %4630 = vmatpush3.bf16.xpose.msra.mxu1 %v1123_v51  ;;  %4631 = vmatprep.mubr.msk.bf16.mxu1 %vm5359_vm4, %v6619_v47 }
 0x620   : > { %4641 = vmatprep.subr.bf16.mxu1 %v6619_v47 }
 0x626   : > { %4632 = vmatmul.mubr.msk.bf16.vlgmr.msra.gmra.mrb[20].mxu1 %vm746_vm5, %v1116_v52 }
 0x627   : > { %4645 = vmatprep.mubr.msk.bf16.mxu1 %vm5359_vm4, %v6619_v47 }
 0x6e1   : > { %v5752_v54 = vpop.f32.mrb[8].mxu1 }
 0x6e2   : > { %v4603_v55 = vpop.f32.mrb[9].mxu1 }
 0x6e3   : > { %v5754_v56 = vpop.f32.mrb[10].mxu1 }
 0x6e4   : > { %v4604_v58 = vpop.f32.mrb[11].mxu1 }
 0x6e9   : > { %v913_v59 = vpop.f32.mrb[12].mxu1 }
 0x6ea   : > { %v4609_v35 = vpop.f32.mrb[13].mxu1  ;;  %v920_v36 = vsel %vm794_vm6, %v913_v59, -inf }
 0x6eb   : > { %921 = vmax.xlane.f32.xlu0 %v920_v36  ;;  %v916_v37 = vpop.f32.mrb[14].mxu1 }
 0x6ec   : > { %v4610_v40 = vpop.f32.mrb[15].mxu1  ;;  %v923_v41 = vsel %vm798_vm7, %v916_v37, -inf }
 0x6ed   : > { %924 = vmax.xlane.f32.xlu1 %v923_v41 }
 0x6f1   : > { %v1036_v43 = vpop.f32.mrb[16].mxu1 }
 0x6f2   : > { %v4621_v44 = vpop.f32.mrb[17].mxu1  ;;  %v1043_v42 = vsel %vm794_vm6, %v1036_v43, -inf }
 0x6f3   : > { %1044 = vmax.xlane.f32.xlu0 %v1043_v42  ;;  %v1039_v45 = vpop.f32.mrb[18].mxu1 }
 0x6f4   : > { %v4622_v49 = vpop.f32.mrb[19].mxu1  ;;  %v1046_v50 = vsel %vm798_vm7, %v1039_v45, -inf }
 0x6f7   : > { %1047 = vmax.xlane.f32.xlu0 %v1046_v50 }
 0x6f9   : > { %v1159_v51 = vpop.f32.mrb[20].mxu1 }
 0x6fa   : > { %v4633_v52 = vpop.f32.mrb[21].mxu1  ;;  %v1166_v55 = vsel %vm794_vm6, %v1159_v51, -inf }
 0x6fb   : > { %1167 = vmax.xlane.f32.xlu0 %v1166_v55  ;;  %v1162_v58 = vpop.f32.mrb[22].mxu1 }
 0x6fc   : > { %v4634_v35 = vpop.f32.mrb[23].mxu1  ;;  %v1169_v36 = vsel %vm798_vm7, %v1162_v58, -inf }
 0x6fd   : > { %1170 = vmax.xlane.f32.xlu1 %v1169_v36 }
 0x778   : > { %v922_v40 = vpop.xlane.xlu0 %921 }
 0x779   : > { %v926_v41 = vsub.f32 %v913_v59, %v922_v40 }
 0x77a   : > { %v925_v44 = vpop.xlane.xlu1 %924 }
 0x77b   : > { %v928_v47 = vmul.f32 1.442695, %v926_v41  ;;  %v927_v42 = vsub.f32 %v916_v37, %v925_v44 }
 0x77d   : > { %5086 = vpow2.f32 %v928_v47  ;;  %v930_v49 = vmul.f32 1.442695, %v927_v42 }
 0x77f   : > { %5088 = vpow2.f32 %v930_v49 }
 0x780   : > { %v1045_v3 = vpop.xlane.xlu0 %1044 }
 0x781   : > { %v1049_v50 = vsub.f32 %v1036_v43, %v1045_v3 }
 0x783   : > { %v1051_v61 = vmul.f32 1.442695, %v1049_v50 }
 0x784   : > { %v1048_v52 = vpop.xlane.xlu0 %1047 }
 0x785   : > { %5090 = vpow2.f32 %v1051_v61  ;;  %v1050_v60 = vsub.f32 %v1039_v45, %v1048_v52 }
 0x787   : > { %v5087_v55 = vpop.eup %5086  ;;  %v1053_v6 = vmul.f32 1.442695, %v1050_v60 }
 0x788   : > { %v1168_v35 = vpop.xlane.xlu0 %1167  ;;  %v932_v7 = vsel %vm794_vm6, %v5087_v55, 0.0 }
 0x789   : > { %v5089_v36 = vpop.eup %5088  ;;  %5092 = vpow2.f32 %v1053_v6  ;;  %v1172_v59 = vsub.f32 %v1159_v51, %v1168_v35  ;;  %933 = vadd.xlane.f32.xlu0 %v932_v7 }
 0x78a   : > { %v935_v37 = vsel %vm798_vm7, %v5089_v36, 0.0  ;;  %v1171_v6 = vpop.xlane.xlu1 %1170 }
 0x78b   : > { %v1174_v47 = vmul.f32 1.442695, %v1172_v59  ;;  %936 = vadd.xlane.f32.xlu1 %v935_v37  ;;  %v1173_v7 = vsub.f32 %v1162_v58, %v1171_v6 }
 0x78d   : > { %5094 = vpow2.f32 %v1174_v47  ;;  %v1176_v51 = vmul.f32 1.442695, %v1173_v7 }
 0x78f   : > { %v5091_v40 = vpop.eup %5090  ;;  %5096 = vpow2.f32 %v1176_v51 }
 0x790   : > { %v1055_v3 = vsel %vm794_vm6, %v5091_v40, 0.0 }
 0x791   : > { %1056 = vadd.xlane.f32.xlu0 %v1055_v3 }
 0x793   : > { %v5093_v61 = vpop.eup %5092 }
 0x794   : > { %v1058_v43 = vsel %vm798_vm7, %v5093_v61, 0.0 }
 0x795   : > { %1059 = vadd.xlane.f32.xlu1 %v1058_v43 }
 0x797   : > { %v5095_v60 = vpop.eup %5094 }
 0x798   : > { %v1178_v45 = vsel %vm794_vm6, %v5095_v60, 0.0 }
 0x799   : > { %1179 = vadd.xlane.f32.xlu0 %v1178_v45  ;;  %v5097_v41 = vpop.eup %5096 }
 0x79a   : > { %v1181_v44 = vsel %vm798_vm7, %v5097_v41, 0.0 }
 0x7a6   : > { %1066 = vrot.lane.b32.xlu1 %v5704_v53, %s5368_s16 }
 0x7af   : > { %943 = vrot.lane.b32.xlu0 %v5704_v53, %s5369_s17 }
 0x7ca   : > { %1182 = vadd.xlane.f32.xlu1 %v1181_v44 }
 0x7db   : > { %1189 = vrot.lane.b32.xlu1 %v5704_v53, %s5370_s30  ;;  %v6656_v53 = vmov 0.0  }
 0x816   : > { %v934_v49 = vpop.xlane.xlu0 %933 }
 0x818   : > { %v937_v42 = vpop.xlane.xlu1 %936 }
 0x819   : > { %5098 = vrcp.f32 %v937_v42 }
 0x81a   : > { %5100 = vrcp.f32 %v934_v49 }
 0x81e   : > { %v1057_v50 = vpop.xlane.xlu0 %1056 }
 0x822   : > { %v1060_v52 = vpop.xlane.xlu1 %1059 }
 0x823   : > { %5102 = vrcp.f32 %v1060_v52  ;;  %v5099_v35 = vpop.eup %5098 }
 0x824   : > { %5104 = vrcp.f32 %v1057_v50  ;;  %v5101_v59 = vpop.eup %5100  ;;  %v941_v37 = vmul.f32 %v5099_v35, %v5089_v36 }
 0x825   : > { %v940_v43 = vmul.f32 %v5101_v59, %v5087_v55 }
 0x826   : > { %v1180_v58 = vpop.xlane.xlu0 %1179  ;;  %v1067_v45 = vpop.permute.xlu1 %1066 }
 0x827   : > { %v942_v6 = vpack.c.bf16 %v941_v37, %v940_v43  ;;  %v1072_v51 = vsel %vm824_vm8, %v1067_v45, 0  ;;  %5106 = vrcp.f32 %v1180_v58  ;;  %v5791_v43 = vcombine.low %v5579_v8, %v5582_v9 }
 0x829   : > { %4642 = vmatpush3.bf16.msra.mxu1 %v5791_v43 }
 0x82a   : > { %v944_v47 = vpop.permute.xlu0 %943  ;;  %4643 = vmatprep.subr.bf16.mxu1 %v6656_v53 }
 0x82b   : > { %v949_v3 = vsel %vm824_vm8, %v944_v47, 0 }
 0x82c   : > { %4612 = vmatpush3.bf16.msra.mxu0 %v949_v3 }
 0x82d   : > { %4623 = vmatprep.subr.bf16.mxu0 %v6656_v53  ;;  %v5103_v7 = vpop.eup %5102 }
 0x82e   : > { %v5105_v44 = vpop.eup %5104  ;;  %v1064_v36 = vmul.f32 %v5103_v7, %v5093_v61 }
 0x82f   : > { %4614 = vmatmul.mubr.msk.bf16.vlgmr.msra.gmra.mrb[0].mxu0 %vm794_vm6, %v942_v6  ;;  %v1063_v42 = vmul.f32 %v5105_v44, %v5091_v40 }
 0x830   : > { %4624 = vmatpush3.bf16.msra.mxu0 %v1072_v51  ;;  %4625 = vmatprep.mubr.msk.bf16.mxu0 %vm5359_vm4, %v6656_v53 }
 0x831   : > { %4635 = vmatprep.subr.bf16.mxu0 %v6656_v53  ;;  %v1065_v55 = vpack.c.bf16 %v1064_v36, %v1063_v42  ;;  %v5107_v35 = vpop.eup %5106  ;;  %v5799_v36 = vcombine.low %v5585_v10, %v5588_v11 }
 0x832   : > { %v1186_v59 = vmul.f32 %v5107_v35, %v5095_v60 }
 0x833   : > { %4644 = vmatpush3.bf16.msra.mxu1 %v5799_v36 }
 0x834   : > { %4657 = vmatprep.subr.bf16.mxu1 %v6656_v53 }
 0x837   : > { %4626 = vmatmul.mubr.msk.bf16.vlgmr.msra.gmra.mrb[4].mxu0 %vm794_vm6, %v1065_v55 }
 0x838   : > { %4637 = vmatprep.mubr.msk.bf16.mxu0 %vm5359_vm4, %v6656_v53 }
 0x857   : > { %v1183_v49 = vpop.xlane.xlu1 %1182 }
 0x858   : > { %5108 = vrcp.f32 %v1183_v49 }
 0x85b   : > { %v1190_v50 = vpop.permute.xlu1 %1189 }
 0x85c   : > { %v1195_v52 = vsel %vm824_vm8, %v1190_v50, 0 }
 0x85d   : > { %4636 = vmatpush3.bf16.msra.mxu0 %v1195_v52 }
 0x85e   : > { %4649 = vmatprep.subr.bf16.mxu0 %v6656_v53 }
 0x862   : > { %v5109_v61 = vpop.eup %5108 }
 0x863   : > { %v1187_v37 = vmul.f32 %v5109_v61, %v5097_v41 }
 0x865   : > { %v1188_v40 = vpack.c.bf16 %v1187_v37, %v1186_v59 }
 0x867   : > { %4638 = vmatmul.mubr.msk.bf16.vlgmr.msra.gmra.mrb[8].mxu0 %vm794_vm6, %v1188_v40 }
 0x868   : > { %4653 = vmatprep.mubr.msk.bf16.mxu0 %vm5359_vm4, %v6656_v53 }
 0x902   : > { %v985_v47 = vpop.f32.mrb[0].mxu0 }
 0x903   : > { %v4615_v58 = vpop.f32.mrb[1].mxu0 }
 0x904   : > { %v988_v3 = vpop.f32.mrb[2].mxu0 }
 0x905   : > { %v5044_v45 = vpack.i.bf16 %v988_v3, %v985_v47  ;;  %v4616_v6 = vpop.f32.mrb[3].mxu0 }
 0x907   : > { %5045 = vrot.lane.b32.xlu1 %v5044_v45, %s5371_s11 }
 0x90a   : > { %v1108_v60 = vpop.f32.mrb[4].mxu0 }
 0x90b   : > { %v4627_v41 = vpop.f32.mrb[5].mxu0 }
 0x90c   : > { %v1111_v7 = vpop.f32.mrb[6].mxu0 }
 0x90d   : > { %v5049_v51 = vpack.i.bf16 %v1111_v7, %v1108_v60  ;;  %v4628_v44 = vpop.f32.mrb[7].mxu0 }
 0x90f   : > { %5050 = vrot.lane.b32.xlu0 %v5049_v51, %s5372_s21 }
 0x93a   : > { %v1231_v42 = vpop.f32.mrb[8].mxu0 }
 0x93b   : > { %v4639_v55 = vpop.f32.mrb[9].mxu0 }
 0x93c   : > { %v1234_v49 = vpop.f32.mrb[10].mxu0 }
 0x93d   : > { %v5054_v50 = vpack.i.bf16 %v1234_v49, %v1231_v42  ;;  %v4640_v52 = vpop.f32.mrb[11].mxu0 }
 0x93f   : > { %5055 = vrot.lane.b32.xlu1 %v5054_v50, %s5373_s22 }
 0x979   : > { %v5046_v35 = vpop.permute.xlu1 %5045 }
 0x97a   : > { %v5048_v59 = vunpack.i.h.bf16 %v5046_v35  ;;  %v5047_v37 = vunpack.i.l.bf16 %v5046_v35 }
 0x97c   : > { %v1263_v3 = vsel %vm746_vm5, %v5754_v56, %v5048_v59  ;;  %v1262_v45 = vsel %vm746_vm5, %v5752_v54, %v5047_v37  ;;  %v5817_v56 = vrot.slane %v5549_v62, %v5681_v57  ;;  %v5824_v59 = vld [vmem:[#allocation2 + $0x10] sm:$0xff] }
 0x981   : > { %v5051_v61 = vpop.permute.xlu0 %5050 }
 0x982   : > { %v5053_v40 = vunpack.i.h.bf16 %v5051_v61  ;;  %v5052_v47 = vunpack.i.l.bf16 %v5051_v61 }
 0x984   : > { %v1265_v41 = vsel %vm1264_vm9, %v1262_v45, %v5052_v47  ;;  %v1266_v7 = vsel %vm1264_vm9, %v1263_v3, %v5053_v40 }
 0x9b1   : > { %v5056_v58 = vpop.permute.xlu1 %5055 }
 0x9b2   : > { %v5058_v6 = vunpack.i.h.bf16 %v5056_v58  ;;  %v5057_v60 = vunpack.i.l.bf16 %v5056_v58  ;;  %v1549_v58 = vsel %vm640_vm2, %v5824_v59, 0.0 }
 0x9b4   : > { %v1268_v51 = vsel %vm1267_vm10, %v1265_v41, %v5057_v60  ;;  %v1269_v44 = vsel %vm1267_vm10, %v1266_v7, %v5058_v6 }
 0x9b5   : > { %v1270_v42 = vpack.c.bf16 %v1269_v44, %v1268_v51 }
 0x9b7   : > { %4646 = vmatmul.mubr.msk.bf16.vlgmr.msra.gmra.mrb[24].mxu1 %vm640_vm2, %v1270_v42 }
 0x9b8   : > { %4673 = vmatprep.mubr.msk.bf16.mxu1 %vm5359_vm4, %v6656_v53 }
 0xa8a   : > { %v1324_v54 = vpop.f32.mrb[24].mxu1 }
 0xa8b   : > { %v1325_v55 = vadd.f32 %v1324_v54, %v5817_v56  ;;  %v4647_v49 = vpop.f32.mrb[25].mxu1 }
 0xa8c   : > { %v1327_v50 = vpop.f32.mrb[26].mxu1 }
 0xa8d   : > { %v5821_v52 = vadd.f32 %v1325_v55, %v5651_v32  ;;  %v1328_v35 = vadd.f32 %v1327_v50, %v5817_v56  ;;  %v4648_v61 = vpop.f32.mrb[27].mxu1  ;;  %v5835_v32 = vld [vmem:[#allocation2 + $0x18] sm:$0xf] }
 0xa8e   : > { %v1552_v3 = vsel %vm644_vm3, %v5835_v32, 0.0 }
 0xa8f   : > { %v5827_v37 = vadd.f32 %v1328_v35, %v5653_v33  ;;  %v1333_v40 = vsel %vm640_vm2, %v5821_v52, 0.0 }
 0xa90   : > { %1334 = vadd.xlane.f32.xlu0 %v1333_v40 }
 0xa91   : > { %v1336_v47 = vsel %vm644_vm3, %v5827_v37, 0.0 }
 0xa92   : > { %1337 = vadd.xlane.f32.xlu1 %v1336_v47 }
 0xa94   : > { %1550 = vadd.xlane.f32.xlu0 %v1549_v58 }
 0xa98   : > { %1553 = vadd.xlane.f32.xlu0 %v1552_v3 }
 0xb1d   : > { %v1335_v33 = vpop.xlane.xlu0 %1334 }
 0xb1e   : > { %v1339_v45 = vmul.f32 0.03125, %v1335_v33 }
 0xb1f   : > { %v1338_v6 = vpop.xlane.xlu1 %1337 }
 0xb20   : > { %v1341_v60 = vsub.f32 %v5821_v52, %v1339_v45  ;;  %v1340_v41 = vmul.f32 0.03125, %v1338_v6  ;;  %v5849_v45 = vcombine.low %v5591_v12, %v5594_v13  ;;  %v5855_v6 = vcombine.low %v5597_v14, %v5600_v15 }
 0xb21   : > { %v1551_v7 = vpop.xlane.xlu0 %1550 }
 0xb22   : > { %v1342_v51 = vsub.f32 %v5827_v37, %v1340_v41  ;;  %v1555_v44 = vmul.f32 0.03125, %v1551_v7  ;;  %v1343_v42 = vmul.f32 %v1341_v60, %v1341_v60  ;;  %4650 = vmatpush3.bf16.msra.mxu0 %v5849_v45 }
 0xb23   : > { %4651 = vmatprep.subr.bf16.mxu0 %v6656_v53 }
 0xb24   : > { %v1557_v54 = vsub.f32 %v5824_v59, %v1555_v44  ;;  %v1345_v55 = vsel %vm640_vm2, %v1343_v42, 0.0  ;;  %v1344_v49 = vmul.f32 %v1342_v51, %v1342_v51 }
 0xb25   : > { %1346 = vadd.xlane.f32.xlu0 %v1345_v55  ;;  %v1554_v50 = vpop.xlane.xlu0 %1553 }
 0xb26   : > { %v1556_v35 = vmul.f32 0.03125, %v1554_v50  ;;  %v1348_v61 = vsel %vm644_vm3, %v1344_v49, 0.0  ;;  %v1559_v40 = vmul.f32 %v1557_v54, %v1557_v54  ;;  %4652 = vmatpush3.bf16.msra.mxu0 %v5855_v6 }
 0xb27   : > { %1349 = vadd.xlane.f32.xlu1 %v1348_v61  ;;  %4677 = vmatprep.subr.bf16.mxu0 %v6656_v53 }
 0xb28   : > { %v1558_v47 = vsub.f32 %v5835_v32, %v1556_v35  ;;  %v1561_v58 = vsel %vm640_vm2, %v1559_v40, 0.0 }
 0xb29   : > { %1562 = vadd.xlane.f32.xlu0 %v1561_v58 }
 0xb2a   : > { %v1560_v3 = vmul.f32 %v1558_v47, %v1558_v47 }
 0xb2c   : > { %v1564_v33 = vsel %vm644_vm3, %v1560_v3, 0.0 }
 0xb2d   : > { %1565 = vadd.xlane.f32.xlu1 %v1564_v33  ;;  %v5861_v33 = vrot.slane %v5552_v63, %v5681_v57 }
 0xbb2   : > { %v1347_v41 = vpop.xlane.xlu0 %1346 }
 0xbb3   : > { %v1351_v7 = vmul.f32 0.03125, %v1347_v41 }
 0xbb4   : > { %v1350_v44 = vpop.xlane.xlu1 %1349 }
 0xbb5   : > { %v1353_v42 = vadd.f32 1e-05, %v1351_v7  ;;  %v1352_v55 = vmul.f32 0.03125, %v1350_v44 }
 0xbb6   : > { %v1563_v49 = vpop.xlane.xlu0 %1562 }
 0xbb7   : > { %5110 = vrsqrt.f32 %v1353_v42  ;;  %v1354_v50 = vadd.f32 1e-05, %v1352_v55  ;;  %v1567_v35 = vmul.f32 0.03125, %v1563_v49  ;;  %v5866_v42 = vrot.slane %v5555_v0, %v5681_v57 }
 0xbb9   : > { %5112 = vrsqrt.f32 %v1354_v50  ;;  %v1569_v61 = vadd.f32 1e-05, %v1567_v35 }
 0xbba   : > { %v1566_v40 = vpop.xlane.xlu1 %1565 }
 0xbbb   : > { %5114 = vrsqrt.f32 %v1569_v61  ;;  %v1568_v58 = vmul.f32 0.03125, %v1566_v40 }
 0xbbd   : > { %v1570_v3 = vadd.f32 1e-05, %v1568_v58 }
 0xbbf   : > { %5116 = vrsqrt.f32 %v1570_v3 }
 0xbc1   : > { %v5111_v14 = vpop.eup %5110 }
 0xbc2   : > { %v1357_v41 = vmul.f32 %v5111_v14, %v1341_v60 }
 0xbc3   : > { %v5113_v15 = vpop.eup %5112 }
 0xbc4   : > { %v1363_v7 = vmul.f32 %v5861_v33, %v1357_v41  ;;  %v1358_v44 = vmul.f32 %v5113_v15, %v1342_v51  ;;  %v5917_v41 = vcombine.low %v5633_v26, %v5636_v27 }
 0xbc5   : > { %v5115_v55 = vpop.eup %5114 }
 0xbc6   : > { %v1364_v49 = vmul.f32 %v5861_v33, %v1358_v44  ;;  %v1573_v50 = vmul.f32 %v5115_v55, %v1557_v54  ;;  %v1369_v35 = vadd.f32 %v5866_v42, %v1363_v7  ;;  %v5923_v7 = vcombine.low %v5639_v28, %v5642_v29 }
 0xbc7   : > { %v5929_v44 = vcombine.low %v5645_v30, %v5648_v31  ;;  %v5935_v55 = vrot.slane %v5561_v2, %v5681_v57 }
 0xbc8   : > { %v1370_v61 = vadd.f32 %v5866_v42, %v1364_v49  ;;  %v1575_v14 = vmul.f32 %v1573_v50, %v5685_v34 }
 0xbc9   : > { %v5117_v40 = vpop.eup %5116 }
 0xbca   : > { %v1574_v58 = vmul.f32 %v5117_v40, %v1558_v47  ;;  %v1371_v3 = vpack.c.bf16 %v1370_v61, %v1369_v35  ;;  %v1577_v51 = vadd.f32 %v1575_v14, %v5690_v39  ;;  %v5911_v47 = vcombine.low %v5627_v24, %v5630_v25 }
 0xbcc   : > { %v1576_v60 = vmul.f32 %v1574_v58, %v5685_v34  ;;  %4654 = vmatmul.mubr.msk.bf16.vlgmr.msra.gmra.mrb[12].mxu0 %vm640_vm2, %v1371_v3  ;;  %v5893_v34 = vcombine.low %v5609_v18, %v5612_v19 }
 0xbcd   : > { %4678 = vmatpush3.bf16.msra.mxu0 %v5665_v46  ;;  %4681 = vmatprep.mubr.msk.bf16.mxu0 %vm5359_vm4, %v6656_v53  ;;  %v5887_v46 = vcombine.low %v5603_v16, %v5606_v17 }
 0xbce   : > { %4679 = vmatprep.subr.bf16.mxu0 %v6656_v53  ;;  %v1578_v15 = vadd.f32 %v1576_v60, %v5690_v39  ;;  %v5905_v39 = vcombine.low %v5621_v22, %v5624_v23 }
 0xbcf   : > { %4658 = vmatpush3.bf16.msra.mxu1 %v5887_v46 }
 0xbd0   : > { %v1579_v54 = vpack.c.bf16 %v1578_v15, %v1577_v51  ;;  %4659 = vmatprep.subr.bf16.mxu1 %v6656_v53 }
 0xbd1   : > { %4680 = vmatpush3.bf16.msra.mxu0 %v5672_v48  ;;  %v5899_v48 = vcombine.low %v5615_v20, %v5618_v21 }
 0xbd2   : > { %4685 = vmatprep.subr.bf16.mxu0 %v6656_v53 }
 0xbd3   : > { %4660 = vmatpush3.bf16.msra.mxu1 %v5893_v34 }
 0xbd4   : > { %4682 = vmatmul.mubr.msk.bf16.vlgmr.msra.gmra.mrb[16].mxu0 %vm640_vm2, %v1579_v54  ;;  %4661 = vmatprep.subr.bf16.mxu1 %v6656_v53 }
 0xbd5   : > { %4687 = vmatprep.mubr.msk.bf16.mxu0 %vm5359_vm4, %v6656_v53 }
 0xbd7   : > { %4662 = vmatpush3.bf16.msra.mxu1 %v5899_v48 }
 0xbd8   : > { %4663 = vmatprep.subr.bf16.mxu1 %v6656_v53 }
 0xbdb   : > { %4664 = vmatpush3.bf16.msra.mxu1 %v5905_v39 }
 0xbdc   : > { %4665 = vmatprep.subr.bf16.mxu1 %v6656_v53 }
 0xbdf   : > { %4666 = vmatpush3.bf16.msra.mxu1 %v5911_v47 }
 0xbe0   : > { %4667 = vmatprep.subr.bf16.mxu1 %v6656_v53 }
 0xbe3   : > { %4668 = vmatpush3.bf16.msra.mxu1 %v5917_v41 }
 0xbe4   : > { %4669 = vmatprep.subr.bf16.mxu1 %v6656_v53 }
 0xbe7   : > { %4670 = vmatpush3.bf16.msra.mxu1 %v5923_v7 }
 0xbe8   : > { %4671 = vmatprep.subr.bf16.mxu1 %v6656_v53 }
 0xbeb   : > { %4672 = vmatpush3.bf16.msra.mxu1 %v5929_v44 }
 0xbec   : > { %4703 = vmatprep.subr.bf16.mxu1 %v6656_v53 }
 0xc9f   : > { %v1425_v49 = vpop.f32.mrb[12].mxu0 }
 0xca0   : > { %v1426_v50 = vadd.f32 %v1425_v49, %v5935_v55  ;;  %v4655_v35 = vpop.f32.mrb[13].mxu0 }
 0xca1   : > { %v1428_v61 = vpop.f32.mrb[14].mxu0 }
 0xca2   : > { %v4364_v40 = vmul.f32 -1.702, %v1426_v50  ;;  %v1429_v58 = vadd.f32 %v1428_v61, %v5935_v55  ;;  %v4656_v3 = vpop.f32.mrb[15].mxu0 }
 0xca4   : > { %v1436_v14 = vmul.f32 1.442695, %v4364_v40  ;;  %v4365_v60 = vmul.f32 -1.702, %v1429_v58 }
 0xca6   : > { %5118 = vpow2.f32 %v1436_v14  ;;  %v1438_v15 = vmul.f32 1.442695, %v4365_v60 }
 0xca7   : > { %v1617_v51 = vpop.f32.mrb[16].mxu0 }
 0xca8   : > { %5120 = vpow2.f32 %v1438_v15  ;;  %v4683_v54 = vpop.f32.mrb[17].mxu0  ;;  %v1618_v2 = vadd.f32 %v1617_v51, %v5700_v38 }
 0xca9   : > { %v1620_v30 = vpop.f32.mrb[18].mxu0 }
 0xcaa   : > { %v1621_v31 = vadd.f32 %v1620_v30, %v5700_v38  ;;  %v4684_v28 = vpop.f32.mrb[19].mxu0 }
 0xcac   : > { %v5941_v49 = vpack.c.bf16 %v1621_v31, %v1618_v2 }
 0xcae   : > { %1626 = vrot.lane.b32.xlu0 %v5941_v49, %s5360_s4 }
 0xcb0   : > { %v5119_v35 = vpop.eup %5118 }
 0xcb1   : > { %v1440_v61 = vadd.f32 1.0, %v5119_v35 }
 0xcb2   : > { %v5121_v40 = vpop.eup %5120  ;;  %1749 = vrot.lane.b32.xlu0 %v5941_v49, %s5361_s5 }
 0xcb3   : > { %5122 = vrcp.f32 %v1440_v61  ;;  %v1441_v3 = vadd.f32 1.0, %v5121_v40 }
 0xcb5   : > { %5124 = vrcp.f32 %v1441_v3 }
 0xcb6   : > { %1747 = vrot.lane.b32.xlu0 %v5941_v49, %s5362_s23 }
 0xcba   : > { %1872 = vrot.lane.b32.xlu0 %v5941_v49, %s5363_s26 }
 0xcbd   : > { %v5123_v2 = vpop.eup %5122 }
 0xcbe   : > { %1995 = vrot.lane.b32.xlu0 %v5941_v49, %s5364_s29  ;;  %v1446_v30 = vmul.f32 %v5123_v2, %v1426_v50  ;;  %v5963_v50 = vrot.slane %v5558_v1, %v5681_v57 }
 0xcbf   : > { %v5125_v28 = vpop.eup %5124 }
 0xcc0   : > { %v1447_v31 = vmul.f32 %v5125_v28, %v1429_v58 }
 0xcc2   : > { %v1448_v38 = vpack.c.bf16 %v1447_v31, %v1446_v30 }
 0xcc4   : > { %4674 = vmatmul.mubr.bf16.vlgmr.msra.gmra.mrb[28].mxu1 %v1448_v38 }
 0xcc5   : > { %4705 = vmatprep.mubr.msk.bf16.mxu1 %vm5359_vm4, %v6656_v53 }
 0xd20   : > { %v1627_v14 = vpop.permute.xlu0 %1626 }
 0xd21   : > { %v1632_v60 = vsel %vm746_vm5, %v1627_v14, 0 }
 0xd22   : > { %4686 = vmatpush3.bf16.xpose.msra.mxu0 %v1632_v60 }
 0xd23   : > { %4691 = vmatprep.subr.bf16.mxu0 %v6656_v53 }
 0xd29   : > { %4688 = vmatmul.mubr.msk.bf16.vlgmr.msra.gmra.mrb[20].mxu0 %vm746_vm5, %v5941_v49 }
 0xd2a   : > { %4693 = vmatprep.mubr.msk.bf16.mxu0 %vm5359_vm4, %v6656_v53 }
 0xd97   : > { %v1535_v58 = vpop.f32.mrb[28].mxu1 }
 0xd98   : > { %v1536_v15 = vadd.f32 %v1535_v58, %v5963_v50  ;;  %v4675_v51 = vpop.f32.mrb[29].mxu1 }
 0xd99   : > { %v1538_v54 = vpop.f32.mrb[30].mxu1 }
 0xd9a   : > { %v1542_v35 = vadd.f32 %v1536_v15, %v5821_v52  ;;  %v1539_v61 = vadd.f32 %v1538_v54, %v5963_v50  ;;  %v4676_v40 = vpop.f32.mrb[31].mxu1 }
 0xd9c   : > { %1544 = vst.msk [vmem:[#allocation2] sm:$0xff] %vm640_vm2, %v1542_v35  ;;  %v1543_v3 = vadd.f32 %v1539_v61, %v5827_v37 }
 0xd9e   : > { %1545 = vst.msk [vmem:[#allocation2 + $0x8] sm:$0xf] %vm644_vm3, %v1543_v3 }
 0xdfc   : > { %v1668_v2 = vpop.f32.mrb[20].mxu0 }
 0xdfd   : > { %v4689_v28 = vpop.f32.mrb[21].mxu0  ;;  %v1675_v57 = vsel %vm794_vm6, %v1668_v2, -inf }
 0xdfe   : > { %1676 = vmax.xlane.f32.xlu1 %v1675_v57  ;;  %v1671_v30 = vpop.f32.mrb[22].mxu0 }
 0xdff   : > { %v4690_v31 = vpop.f32.mrb[23].mxu0  ;;  %v1678_v38 = vsel %vm798_vm7, %v1671_v30, -inf }
 0xe02   : > { %1679 = vmax.xlane.f32.xlu1 %v1678_v38 }
 0xe8b   : > { %v1677_v52 = vpop.xlane.xlu1 %1676 }
 0xe8c   : > { %v1681_v14 = vsub.f32 %v1668_v2, %v1677_v52 }
 0xe8e   : > { %v1683_v60 = vmul.f32 1.442695, %v1681_v14 }
 0xe8f   : > { %v1680_v58 = vpop.xlane.xlu1 %1679 }
 0xe90   : > { %5126 = vpow2.f32 %v1683_v60  ;;  %v1682_v15 = vsub.f32 %v1671_v30, %v1680_v58  ;;  %v1750_v30 = vpop.permute.xlu0 %1749 }
 0xe91   : > { %v1755_v58 = vsel %vm746_vm5, %v1750_v30, 0 }
 0xe92   : > { %v1685_v51 = vmul.f32 1.442695, %v1682_v15 }
 0xe94   : > { %5128 = vpow2.f32 %v1685_v51  ;;  %v1748_v60 = vpop.permute.xlu0 %1747 }
 0xe98   : > { %v1873_v15 = vpop.permute.xlu0 %1872 }
 0xe99   : > { %v1878_v51 = vsel %vm746_vm5, %v1873_v15, 0 }
 0xe9a   : > { %v5127_v37 = vpop.eup %5126 }
 0xe9b   : > { %v1687_v54 = vsel %vm794_vm6, %v5127_v37, 0.0 }
 0xe9c   : > { %1688 = vadd.xlane.f32.xlu1 %v1687_v54 }
 0xe9e   : > { %v5129_v35 = vpop.eup %5128 }
 0xe9f   : > { %v1690_v61 = vsel %vm798_vm7, %v5129_v35, 0.0 }
 0xea0   : > { %1691 = vadd.xlane.f32.xlu1 %v1690_v61 }
 0xeb1   : > { %1698 = vrot.lane.b32.xlu1 %v5941_v49, %s5365_s12 }
 0xeb5   : > { %1870 = vrot.lane.b32.xlu1 %v5941_v49, %s5366_s18 }
 0xeb9   : > { %1993 = vrot.lane.b32.xlu1 %v5941_v49, %s5367_s28 }
 0xf29   : > { %v1689_v40 = vpop.xlane.xlu1 %1688 }
 0xf2a   : > { %5130 = vrcp.f32 %v1689_v40 }
 0xf2d   : > { %v1692_v3 = vpop.xlane.xlu1 %1691 }
 0xf2e   : > { %5132 = vrcp.f32 %v1692_v3 }
 0xf31   : > { %v1699_v2 = vpop.permute.xlu1 %1698 }
 0xf32   : > { %v1704_v28 = vsel %vm824_vm8, %v1699_v2, 0 }
 0xf33   : > { %4692 = vmatpush3.bf16.msra.mxu0 %v1704_v28 }
 0xf34   : > { %4697 = vmatprep.subr.bf16.mxu0 %v6656_v53  ;;  %v5131_v57 = vpop.eup %5130 }
 0xf35   : > { %v1695_v38 = vmul.f32 %v5131_v57, %v5127_v37  ;;  %v1996_v37 = vpop.permute.xlu0 %1995  ;;  %v1871_v54 = vpop.permute.xlu1 %1870 }
 0xf38   : > { %v5133_v31 = vpop.eup %5132 }
 0xf39   : > { %v1696_v52 = vmul.f32 %v5133_v31, %v5129_v35  ;;  %v2001_v35 = vsel %vm746_vm5, %v1996_v37, 0  ;;  %v1994_v61 = vpop.permute.xlu1 %1993 }
 0xf3b   : > { %v1697_v14 = vpack.c.bf16 %v1696_v52, %v1695_v38 }
 0xf3d   : > { %4694 = vmatmul.mubr.msk.bf16.vlgmr.msra.gmra.mrb[24].mxu0 %vm794_vm6, %v1697_v14 }
 0xf3e   : > { %4698 = vmatpush3.bf16.xpose.msra.mxu0 %v1755_v58  ;;  %4699 = vmatprep.mubr.msk.bf16.mxu0 %vm5359_vm4, %v6656_v53 }
 0xf3f   : > { %4709 = vmatprep.subr.bf16.mxu0 %v6656_v53 }
 0xf45   : > { %4700 = vmatmul.mubr.msk.bf16.vlgmr.msra.gmra.mrb[28].mxu0 %vm746_vm5, %v1748_v60 }
 0xf46   : > { %4710 = vmatpush3.bf16.xpose.msra.mxu0 %v1878_v51  ;;  %4711 = vmatprep.mubr.msk.bf16.mxu0 %vm5359_vm4, %v6656_v53 }
 0xf47   : > { %4721 = vmatprep.subr.bf16.mxu0 %v6656_v53 }
 0xf4d   : > { %4712 = vmatmul.mubr.msk.bf16.vlgmr.msra.gmra.mrb[32].mxu0 %vm746_vm5, %v1871_v54 }
 0xf4e   : > { %4722 = vmatpush3.bf16.xpose.msra.mxu0 %v2001_v35  ;;  %4723 = vmatprep.mubr.msk.bf16.mxu0 %vm5359_vm4, %v6656_v53 }
 0xf4f   : > { %4733 = vmatprep.subr.bf16.mxu0 %v6656_v53 }
 0xf55   : > { %4724 = vmatmul.mubr.msk.bf16.vlgmr.msra.gmra.mrb[36].mxu0 %vm746_vm5, %v1994_v61 }
 0xf56   : > { %4734 = vmatpush3.bf16.msra.mxu0 %v5791_v43  ;;  %4737 = vmatprep.mubr.msk.bf16.mxu0 %vm5359_vm4, %v6656_v53 }
 0xf57   : > { %4735 = vmatprep.subr.bf16.mxu0 %v6656_v53 }
 0xf5a   : > { %4736 = vmatpush3.bf16.msra.mxu0 %v5799_v36 }
 0xf5b   : > { %4749 = vmatprep.subr.bf16.mxu0 %v6656_v53 }
0x1010   : > { %v6005_v40 = vpop.f32.mrb[24].mxu0 }
0x1011   : > { %v4695_v3 = vpop.f32.mrb[25].mxu0 }
0x1012   : > { %v6007_v2 = vpop.f32.mrb[26].mxu0 }
0x1013   : > { %v4696_v28 = vpop.f32.mrb[27].mxu0 }
0x1018   : > { %v1791_v57 = vpop.f32.mrb[28].mxu0 }
0x1019   : > { %v4701_v30 = vpop.f32.mrb[29].mxu0  ;;  %v1798_v31 = vsel %vm794_vm6, %v1791_v57, -inf }
0x101a   : > { %1799 = vmax.xlane.f32.xlu0 %v1798_v31  ;;  %v1794_v43 = vpop.f32.mrb[30].mxu0 }
0x101b   : > { %v4702_v38 = vpop.f32.mrb[31].mxu0  ;;  %v1801_v52 = vsel %vm798_vm7, %v1794_v43, -inf }
0x101c   : > { %1802 = vmax.xlane.f32.xlu1 %v1801_v52 }
0x1020   : > { %v1914_v14 = vpop.f32.mrb[32].mxu0 }
0x1021   : > { %v4713_v36 = vpop.f32.mrb[33].mxu0  ;;  %v1921_v60 = vsel %vm794_vm6, %v1914_v14, -inf }
0x1022   : > { %1922 = vmax.xlane.f32.xlu0 %v1921_v60  ;;  %v1917_v58 = vpop.f32.mrb[34].mxu0 }
0x1023   : > { %v4714_v15 = vpop.f32.mrb[35].mxu0  ;;  %v1924_v51 = vsel %vm798_vm7, %v1917_v58, -inf }
0x1026   : > { %1925 = vmax.xlane.f32.xlu0 %v1924_v51 }
0x1028   : > { %v2037_v37 = vpop.f32.mrb[36].mxu0 }
0x1029   : > { %v4725_v54 = vpop.f32.mrb[37].mxu0  ;;  %v2044_v35 = vsel %vm794_vm6, %v2037_v37, -inf }
0x102a   : > { %2045 = vmax.xlane.f32.xlu0 %v2044_v35  ;;  %v2040_v61 = vpop.f32.mrb[38].mxu0 }
0x102b   : > { %v4726_v3 = vpop.f32.mrb[39].mxu0  ;;  %v2047_v28 = vsel %vm798_vm7, %v2040_v61, -inf }
0x102c   : > { %2048 = vmax.xlane.f32.xlu1 %v2047_v28 }
0x10a7   : > { %v1800_v30 = vpop.xlane.xlu0 %1799 }
0x10a8   : > { %v1804_v31 = vsub.f32 %v1791_v57, %v1800_v30 }
0x10a9   : > { %v1803_v38 = vpop.xlane.xlu1 %1802 }
0x10aa   : > { %v1806_v52 = vmul.f32 1.442695, %v1804_v31  ;;  %v1805_v36 = vsub.f32 %v1794_v43, %v1803_v38 }
0x10ac   : > { %5134 = vpow2.f32 %v1806_v52  ;;  %v1808_v60 = vmul.f32 1.442695, %v1805_v36 }
0x10ae   : > { %5136 = vpow2.f32 %v1808_v60 }
0x10af   : > { %v1923_v15 = vpop.xlane.xlu0 %1922 }
0x10b0   : > { %v1927_v51 = vsub.f32 %v1914_v14, %v1923_v15 }
0x10b2   : > { %v1929_v1 = vmul.f32 1.442695, %v1927_v51 }
0x10b3   : > { %v1926_v54 = vpop.xlane.xlu0 %1925 }
0x10b4   : > { %5138 = vpow2.f32 %v1929_v1  ;;  %v1928_v29 = vsub.f32 %v1917_v58, %v1926_v54 }
0x10b6   : > { %v5135_v35 = vpop.eup %5134  ;;  %v1931_v26 = vmul.f32 1.442695, %v1928_v29 }
0x10b7   : > { %v2046_v3 = vpop.xlane.xlu0 %2045  ;;  %v1810_v27 = vsel %vm794_vm6, %v5135_v35, 0.0 }
0x10b8   : > { %v5137_v28 = vpop.eup %5136  ;;  %5140 = vpow2.f32 %v1931_v26  ;;  %v2050_v57 = vsub.f32 %v2037_v37, %v2046_v3  ;;  %1811 = vadd.xlane.f32.xlu0 %v1810_v27 }
0x10b9   : > { %v1813_v43 = vsel %vm798_vm7, %v5137_v28, 0.0  ;;  %v2049_v26 = vpop.xlane.xlu1 %2048 }
0x10ba   : > { %v2052_v30 = vmul.f32 1.442695, %v2050_v57  ;;  %1814 = vadd.xlane.f32.xlu1 %v1813_v43  ;;  %v2051_v27 = vsub.f32 %v2040_v61, %v2049_v26 }
0x10bc   : > { %5142 = vpow2.f32 %v2052_v30  ;;  %v2054_v37 = vmul.f32 1.442695, %v2051_v27 }
0x10be   : > { %v5139_v31 = vpop.eup %5138  ;;  %5144 = vpow2.f32 %v2054_v37 }
0x10bf   : > { %v1933_v14 = vsel %vm794_vm6, %v5139_v31, 0.0 }
0x10c0   : > { %1934 = vadd.xlane.f32.xlu0 %v1933_v14 }
0x10c2   : > { %v5141_v1 = vpop.eup %5140 }
0x10c3   : > { %v1936_v58 = vsel %vm798_vm7, %v5141_v1, 0.0 }
0x10c4   : > { %1937 = vadd.xlane.f32.xlu1 %v1936_v58 }
0x10c6   : > { %v5143_v29 = vpop.eup %5142 }
0x10c7   : > { %v2056_v38 = vsel %vm794_vm6, %v5143_v29, 0.0 }
0x10c8   : > { %2057 = vadd.xlane.f32.xlu0 %v2056_v38  ;;  %v5145_v52 = vpop.eup %5144 }
0x10c9   : > { %v2059_v36 = vsel %vm798_vm7, %v5145_v52, 0.0 }
0x10d5   : > { %1944 = vrot.lane.b32.xlu1 %v5941_v49, %s5368_s16 }
0x10de   : > { %1821 = vrot.lane.b32.xlu0 %v5941_v49, %s5369_s17 }
0x10f9   : > { %2060 = vadd.xlane.f32.xlu1 %v2059_v36 }
0x110a   : > { %2067 = vrot.lane.b32.xlu1 %v5941_v49, %s5370_s30 }
0x1145   : > { %v1812_v15 = vpop.xlane.xlu0 %1811 }
0x1147   : > { %v1815_v60 = vpop.xlane.xlu1 %1814 }
0x1148   : > { %5146 = vrcp.f32 %v1815_v60 }
0x1149   : > { %5148 = vrcp.f32 %v1812_v15 }
0x114d   : > { %v1935_v51 = vpop.xlane.xlu0 %1934 }
0x1151   : > { %v1938_v54 = vpop.xlane.xlu1 %1937 }
0x1152   : > { %5150 = vrcp.f32 %v1938_v54  ;;  %v5147_v3 = vpop.eup %5146 }
0x1153   : > { %5152 = vrcp.f32 %v1935_v51  ;;  %v5149_v61 = vpop.eup %5148  ;;  %v1819_v43 = vmul.f32 %v5147_v3, %v5137_v28 }
0x1154   : > { %v1818_v14 = vmul.f32 %v5149_v61, %v5135_v35 }
0x1155   : > { %v2058_v57 = vpop.xlane.xlu0 %2057  ;;  %v1945_v38 = vpop.permute.xlu1 %1944 }
0x1156   : > { %v1820_v26 = vpack.c.bf16 %v1819_v43, %v1818_v14  ;;  %v1950_v27 = vsel %vm824_vm8, %v1945_v38, 0  ;;  %5154 = vrcp.f32 %v2058_v57 }
0x1159   : > { %v1822_v30 = vpop.permute.xlu0 %1821 }
0x115a   : > { %v1827_v58 = vsel %vm824_vm8, %v1822_v30, 0 }
0x115b   : > { %4704 = vmatpush3.bf16.msra.mxu1 %v1827_v58 }
0x115c   : > { %4715 = vmatprep.subr.bf16.mxu1 %v6656_v53  ;;  %v5151_v49 = vpop.eup %5150 }
0x115d   : > { %v5153_v37 = vpop.eup %5152  ;;  %v1942_v28 = vmul.f32 %v5151_v49, %v5141_v1 }
0x115e   : > { %4706 = vmatmul.mubr.msk.bf16.vlgmr.msra.gmra.mrb[32].mxu1 %vm794_vm6, %v1820_v26  ;;  %v1941_v35 = vmul.f32 %v5153_v37, %v5139_v31 }
0x115f   : > { %4716 = vmatpush3.bf16.msra.mxu1 %v1950_v27  ;;  %4717 = vmatprep.mubr.msk.bf16.mxu1 %vm5359_vm4, %v6656_v53 }
0x1160   : > { %4727 = vmatprep.subr.bf16.mxu1 %v6656_v53  ;;  %v1943_v36 = vpack.c.bf16 %v1942_v28, %v1941_v35  ;;  %v5155_v54 = vpop.eup %5154 }
0x1161   : > { %v2064_v3 = vmul.f32 %v5155_v54, %v5143_v29 }
0x1166   : > { %4718 = vmatmul.mubr.msk.bf16.vlgmr.msra.gmra.mrb[36].mxu1 %vm794_vm6, %v1943_v36 }
0x1167   : > { %4729 = vmatprep.mubr.msk.bf16.mxu1 %vm5359_vm4, %v6656_v53 }
0x1186   : > { %v2061_v60 = vpop.xlane.xlu1 %2060 }
0x1187   : > { %5156 = vrcp.f32 %v2061_v60 }
0x118a   : > { %v2068_v15 = vpop.permute.xlu1 %2067 }
0x118b   : > { %v2073_v51 = vsel %vm824_vm8, %v2068_v15, 0 }
0x118c   : > { %4728 = vmatpush3.bf16.msra.mxu1 %v2073_v51 }
0x118d   : > { %4741 = vmatprep.subr.bf16.mxu1 %v6656_v53 }
0x1191   : > { %v5157_v1 = vpop.eup %5156 }
0x1192   : > { %v2065_v61 = vmul.f32 %v5157_v1, %v5145_v52 }
0x1194   : > { %v2066_v31 = vpack.c.bf16 %v2065_v61, %v2064_v3 }
0x1196   : > { %4730 = vmatmul.mubr.msk.bf16.vlgmr.msra.gmra.mrb[40].mxu1 %vm794_vm6, %v2066_v31 }
0x1197   : > { %4742 = vmatpush3.bf16.msra.mxu1 %v5849_v45  ;;  %4745 = vmatprep.mubr.msk.bf16.mxu1 %vm5359_vm4, %v6656_v53 }
0x1198   : > { %4743 = vmatprep.subr.bf16.mxu1 %v6656_v53 }
0x119b   : > { %4744 = vmatpush3.bf16.msra.mxu1 %v5855_v6 }
0x1231   : > { %v1863_v57 = vpop.f32.mrb[32].mxu1 }
0x1232   : > { %v4707_v43 = vpop.f32.mrb[33].mxu1 }
0x1233   : > { %v1866_v30 = vpop.f32.mrb[34].mxu1 }
0x1234   : > { %v5059_v14 = vpack.i.bf16 %v1866_v30, %v1863_v57  ;;  %v4708_v58 = vpop.f32.mrb[35].mxu1 }
0x1236   : > { %5060 = vrot.lane.b32.xlu1 %v5059_v14, %s5371_s11 }
0x1239   : > { %v1986_v29 = vpop.f32.mrb[36].mxu1 }
0x123a   : > { %v4719_v52 = vpop.f32.mrb[37].mxu1 }
0x123b   : > { %v1989_v38 = vpop.f32.mrb[38].mxu1 }
0x123c   : > { %v5064_v26 = vpack.i.bf16 %v1989_v38, %v1986_v29  ;;  %v4720_v49 = vpop.f32.mrb[39].mxu1 }
0x123e   : > { %5065 = vrot.lane.b32.xlu0 %v5064_v26, %s5372_s21 }
0x1269   : > { %v2109_v45 = vpop.f32.mrb[40].mxu1 }
0x126a   : > { %v4731_v27 = vpop.f32.mrb[41].mxu1 }
0x126b   : > { %v2112_v37 = vpop.f32.mrb[42].mxu1 }
0x126c   : > { %v5069_v28 = vpack.i.bf16 %v2112_v37, %v2109_v45  ;;  %v4732_v35 = vpop.f32.mrb[43].mxu1 }
0x126e   : > { %5070 = vrot.lane.b32.xlu1 %v5069_v28, %s5373_s22 }
0x12a8   : > { %v5061_v6 = vpop.permute.xlu1 %5060 }
0x12a9   : > { %v5063_v60 = vunpack.i.h.bf16 %v5061_v6  ;;  %v5062_v15 = vunpack.i.l.bf16 %v5061_v6 }
0x12ab   : > { %v2141_v3 = vsel %vm746_vm5, %v6007_v2, %v5063_v60  ;;  %v2140_v61 = vsel %vm746_vm5, %v6005_v40, %v5062_v15 }
0x12b0   : > { %v5066_v36 = vpop.permute.xlu0 %5065 }
0x12b1   : > { %v5068_v51 = vunpack.i.h.bf16 %v5066_v36  ;;  %v5067_v54 = vunpack.i.l.bf16 %v5066_v36 }
0x12b3   : > { %v2143_v43 = vsel %vm1264_vm9, %v2141_v3, %v5068_v51  ;;  %v2142_v30 = vsel %vm1264_vm9, %v2140_v61, %v5067_v54 }
0x12e0   : > { %v5071_v1 = vpop.permute.xlu1 %5070 }
0x12e1   : > { %v5073_v31 = vunpack.i.h.bf16 %v5071_v1  ;;  %v5072_v57 = vunpack.i.l.bf16 %v5071_v1 }
0x12e3   : > { %v2145_v14 = vsel %vm1267_vm10, %v2143_v43, %v5073_v31  ;;  %v2144_v58 = vsel %vm1267_vm10, %v2142_v30, %v5072_v57 }
0x12e4   : > { %v2146_v29 = vpack.c.bf16 %v2145_v14, %v2144_v58 }
0x12e6   : > { %4738 = vmatmul.mubr.msk.bf16.vlgmr.msra.gmra.mrb[40].mxu0 %vm640_vm2, %v2146_v29 }
0x12e7   : > { %4750 = vmatpush3.bf16.msra.mxu0 %v5887_v46  ;;  %4765 = vmatprep.mubr.msk.bf16.mxu0 %vm5359_vm4, %v6656_v53 }
0x12e8   : > { %4751 = vmatprep.subr.bf16.mxu0 %v6656_v53 }
0x12eb   : > { %4752 = vmatpush3.bf16.msra.mxu0 %v5893_v34 }
0x12ec   : > { %4753 = vmatprep.subr.bf16.mxu0 %v6656_v53 }
0x12ef   : > { %4754 = vmatpush3.bf16.msra.mxu0 %v5899_v48 }
0x12f0   : > { %4755 = vmatprep.subr.bf16.mxu0 %v6656_v53 }
0x12f3   : > { %4756 = vmatpush3.bf16.msra.mxu0 %v5905_v39 }
0x12f4   : > { %4757 = vmatprep.subr.bf16.mxu0 %v6656_v53 }
0x12f7   : > { %4758 = vmatpush3.bf16.msra.mxu0 %v5911_v47 }
0x12f8   : > { %4759 = vmatprep.subr.bf16.mxu0 %v6656_v53 }
0x12fb   : > { %4760 = vmatpush3.bf16.msra.mxu0 %v5917_v41 }
0x12fc   : > { %4761 = vmatprep.subr.bf16.mxu0 %v6656_v53 }
0x12ff   : > { %4762 = vmatpush3.bf16.msra.mxu0 %v5923_v7 }
0x1300   : > { %4763 = vmatprep.subr.bf16.mxu0 %v6656_v53 }
0x1303   : > { %4764 = vmatpush3.bf16.msra.mxu0 %v5929_v44 }
0x13b9   : > { %v2184_v46 = vpop.f32.mrb[40].mxu0 }
0x13ba   : > { %v2185_v34 = vadd.f32 %v2184_v46, %v5817_v56  ;;  %v4739_v48 = vpop.f32.mrb[41].mxu0 }
0x13bb   : > { %v2187_v39 = vpop.f32.mrb[42].mxu0 }
0x13bc   : > { %v6076_v40 = vadd.f32 %v2185_v34, %v5824_v59  ;;  %v2188_v47 = vadd.f32 %v2187_v39, %v5817_v56  ;;  %v4740_v2 = vpop.f32.mrb[43].mxu0 }
0x13be   : > { %v6080_v41 = vadd.f32 %v2188_v47, %v5835_v32  ;;  %v2193_v7 = vsel %vm640_vm2, %v6076_v40, 0.0 }
0x13bf   : > { %2194 = vadd.xlane.f32.xlu0 %v2193_v7 }
0x13c0   : > { %v2196_v53 = vsel %vm644_vm3, %v6080_v41, 0.0 }
0x13c1   : > { %2197 = vadd.xlane.f32.xlu1 %v2196_v53 }
0x144c   : > { %v2195_v44 = vpop.xlane.xlu0 %2194 }
0x144d   : > { %v2199_v52 = vmul.f32 0.03125, %v2195_v44 }
0x144e   : > { %v2198_v38 = vpop.xlane.xlu1 %2197 }
0x144f   : > { %v2201_v59 = vsub.f32 %v6076_v40, %v2199_v52  ;;  %v2200_v26 = vmul.f32 0.03125, %v2198_v38 }
0x1451   : > { %v2202_v56 = vsub.f32 %v6080_v41, %v2200_v26  ;;  %v2203_v49 = vmul.f32 %v2201_v59, %v2201_v59 }
0x1453   : > { %v2205_v32 = vsel %vm640_vm2, %v2203_v49, 0.0  ;;  %v2204_v45 = vmul.f32 %v2202_v56, %v2202_v56 }
0x1454   : > { %2206 = vadd.xlane.f32.xlu0 %v2205_v32 }
0x1455   : > { %v2208_v27 = vsel %vm644_vm3, %v2204_v45, 0.0 }
0x1458   : > { %2209 = vadd.xlane.f32.xlu0 %v2208_v27 }
0x14e1   : > { %v2207_v37 = vpop.xlane.xlu0 %2206 }
0x14e2   : > { %v2211_v28 = vmul.f32 0.03125, %v2207_v37 }
0x14e4   : > { %v2213_v35 = vadd.f32 1e-05, %v2211_v28 }
0x14e5   : > { %v2210_v6 = vpop.xlane.xlu0 %2209 }
0x14e6   : > { %5158 = vrsqrt.f32 %v2213_v35  ;;  %v2212_v36 = vmul.f32 0.03125, %v2210_v6 }
0x14e8   : > { %v2214_v60 = vadd.f32 1e-05, %v2212_v36 }
0x14ea   : > { %5160 = vrsqrt.f32 %v2214_v60 }
0x14f0   : > { %v5159_v15 = vpop.eup %5158 }
0x14f1   : > { %v2217_v51 = vmul.f32 %v5159_v15, %v2201_v59 }
0x14f3   : > { %v2219_v1 = vmul.f32 %v2217_v51, %v5861_v33 }
0x14f4   : > { %v5161_v54 = vpop.eup %5160 }
0x14f5   : > { %v2218_v3 = vmul.f32 %v5161_v54, %v2202_v56  ;;  %v2221_v31 = vadd.f32 %v2219_v1, %v5866_v42 }
0x14f7   : > { %v2220_v61 = vmul.f32 %v2218_v3, %v5861_v33 }
0x14f9   : > { %v2222_v57 = vadd.f32 %v2220_v61, %v5866_v42 }
0x14fb   : > { %v2223_v43 = vpack.c.bf16 %v2222_v57, %v2221_v31 }
0x14fd   : > { %4746 = vmatmul.mubr.msk.bf16.vlgmr.msra.gmra.mrb[44].mxu1 %vm640_vm2, %v2223_v43 }
0x15d0   : > { %v2261_v30 = vpop.f32.mrb[44].mxu1 }
0x15d1   : > { %v2262_v14 = vadd.f32 %v2261_v30, %v5935_v55  ;;  %v4747_v58 = vpop.f32.mrb[45].mxu1 }
0x15d2   : > { %v2264_v29 = vpop.f32.mrb[46].mxu1 }
0x15d3   : > { %v4385_v46 = vmul.f32 -1.702, %v2262_v14  ;;  %v2265_v34 = vadd.f32 %v2264_v29, %v5935_v55  ;;  %v4748_v48 = vpop.f32.mrb[47].mxu1 }
0x15d5   : > { %v2272_v39 = vmul.f32 1.442695, %v4385_v46  ;;  %v4386_v47 = vmul.f32 -1.702, %v2265_v34 }
0x15d7   : > { %5162 = vpow2.f32 %v2272_v39  ;;  %v2274_v33 = vmul.f32 1.442695, %v4386_v47 }
0x15d9   : > { %5164 = vpow2.f32 %v2274_v33 }
0x15e1   : > { %v5163_v2 = vpop.eup %5162 }
0x15e2   : > { %v2276_v7 = vadd.f32 1.0, %v5163_v2 }
0x15e3   : > { %v5165_v42 = vpop.eup %5164 }
0x15e4   : > { %5166 = vrcp.f32 %v2276_v7  ;;  %v2277_v53 = vadd.f32 1.0, %v5165_v42 }
0x15e6   : > { %5168 = vrcp.f32 %v2277_v53 }
0x15ee   : > { %v5167_v44 = vpop.eup %5166 }
0x15ef   : > { %v2282_v38 = vmul.f32 %v5167_v44, %v2262_v14 }
0x15f0   : > { %v5169_v52 = vpop.eup %5168 }
0x15f1   : > { %v2283_v59 = vmul.f32 %v5169_v52, %v2265_v34 }
0x15f3   : > { %v2284_v26 = vpack.c.bf16 %v2283_v59, %v2282_v38 }
0x15f5   : > { %4766 = vmatmul.mubr.bf16.vlgmr.msra.gmra.mrb[44].mxu0 %v2284_v26 }
0x16c8   : > { %v2319_v56 = vpop.f32.mrb[44].mxu0 }
0x16c9   : > { %v2320_v55 = vadd.f32 %v2319_v56, %v5963_v50  ;;  %v4767_v49 = vpop.f32.mrb[45].mxu0 }
0x16ca   : > { %v2322_v32 = vpop.f32.mrb[46].mxu0 }
0x16cb   : > { %v2326_v45 = vadd.f32 %v2320_v55, %v6076_v40  ;;  %v2323_v27 = vadd.f32 %v2322_v32, %v5963_v50  ;;  %v4768_v37 = vpop.f32.mrb[47].mxu0 }
0x16cd   : > { %2328 = vst.msk [vmem:[#allocation2 + $0x10] sm:$0xff] %vm640_vm2, %v2326_v45  ;;  %v2327_v28 = vadd.f32 %v2323_v27, %v6080_v41 }
0x16cf   : > { %2329 = vst.msk [vmem:[#allocation2 + $0x18] sm:$0xf] %vm644_vm3, %v2327_v28 }
0x16d0 PF: > { %p4387_p7 = scmp.lt.s32.totalorder %s5348_s13, 2 }
0x16d1   : > { %v6104_v35 = vld [vmem:[#allocation2] sm:$0xff] (!%p4387_p7)  ;;  %vm2336_vm11 = vcmask (!%p4387_p7), 261120   ;;  %v6106_v6 = vld [vmem:[#allocation2 + $0x8] sm:$0xff] (!%p4387_p7)  ;;  %v6118_v57 = vcombine.low (!%p4387_p7), %v5567_v4, %v5570_v5  ;;  %v5374_v43 = vmov (!%p4387_p7), 0.0   ;;  %v6657_v30 = vld [vmem:[#allocation13_spill] sm:$0xff] (!%p4387_p7)  ;;  %vm5375_vm12 = vmmov (!%p4387_p7), 0  }
0x16d2   : > { %2333 = sbr.rel (%p4387_p7) target bundleno = 11324 (0x2c3c), region = 72  ;;  %v2337_v40 = vsel (!%p4387_p7), %vm2336_vm11, %v6104_v35, 0.0  ;;  %v2340_v50 = vsel (!%p4387_p7), %vm2336_vm11, %v6106_v6, 0.0  ;;  %4769 = vmatprep.subr.bf16.mxu1 (!%p4387_p7), %v5374_v43  ;;  %4795 = vmatprep.subr.bf16.mxu0 (!%p4387_p7), %v5374_v43  ;;  %v6658_v14 = vld [vmem:[#allocation12_spill] sm:$0xff] (!%p4387_p7)  ;;  %v2364_v34 = vlaneseq (!%p4387_p7)  ;;  %v6659_v42 = vld [vmem:[#allocation7_spill] sm:$0xff] (!%p4387_p7)  ;;  %s5376_s24 = smov (!%p4387_p7), 96  }
0x16d3   : > { %2338 = vadd.xlane.f32.xlu0 (!%p4387_p7), %v2337_v40  ;;  %4770 = vmatpush3.bf16.msra.mxu1 (!%p4387_p7), %v6118_v57  ;;  %v6125_v58 = vcombine.low (!%p4387_p7), %v6658_v14, %v6657_v30  ;;  %v6660_v59 = vld [vmem:[#allocation8_spill] sm:$0xff] (!%p4387_p7)  ;;  %v6661_v45 = vld [vmem:[#allocation11_spill] sm:$0xff] (!%p4387_p7)  ;;  %s5377_s25 = smov (!%p4387_p7), 88   ;;  %s5378_s19 = smov (!%p4387_p7), 120   ;;  %vm2441_vm13 = vcmask (!%p4387_p7), 64512   ;;  %vm2489_vm14 = vcmask (!%p4387_p7), 130048  }
0x16d4   : > { %4773 = vmatprep.mubr.msk.bf16.mxu1 (!%p4387_p7), %vm5375_vm12, %v5374_v43  ;;  %4771 = vmatprep.subr.bf16.mxu1 (!%p4387_p7), %v5374_v43  ;;  %v2365_v47 = vshrl.u32 (!%p4387_p7), %v2364_v34, 7  ;;  %s5379_s27 = smov (!%p4387_p7), 80   ;;  %s5380_s20 = smov (!%p4387_p7), 72   ;;  %vm2951_vm15 = vcmask (!%p4387_p7), 195584  }
0x16d5   : > { %4797 = vmatprep.mubr.msk.bf16.mxu0 (!%p4387_p7), %vm5375_vm12, %v5374_v43  ;;  %s5381_s4 = smov (!%p4387_p7), 64   ;;  %s5382_s5 = smov (!%p4387_p7), 112  }
0x16d6   : > { %v6134_v33 = vsub.s32 (!%p4387_p7), 0, %v2365_v47  ;;  %s5383_s23 = smov (!%p4387_p7), 104   ;;  %s5384_s26 = smov (!%p4387_p7), 48  }
0x16d7   : > { %2341 = vadd.xlane.f32.xlu0 (!%p4387_p7), %v2340_v50  ;;  %4772 = vmatpush3.bf16.msra.mxu1 (!%p4387_p7), %v6125_v58  ;;  %s5385_s29 = smov (!%p4387_p7), 56   ;;  %s5386_s12 = smov (!%p4387_p7), 40  }
0x16d8   : > { %4777 = vmatprep.subr.bf16.mxu1 (!%p4387_p7), %v5374_v43  ;;  %v6138_v53 = vrot.slane (!%p4387_p7), %v6659_v42, %v6134_v33  ;;  %v6143_v26 = vrot.slane (!%p4387_p7), %v6660_v59, %v6134_v33  ;;  %v6153_v27 = vrot.slane (!%p4387_p7), %v6661_v45, %v6134_v33  ;;  %s5387_s18 = smov (!%p4387_p7), 8   ;;  %s5388_s28 = smov (!%p4387_p7), 16  }
0x16d9   : > { %s5389_s16 = smov 24  }
0x1760   : > { %v2339_v41 = vpop.xlane.xlu0 %2338 }
0x1761   : > { %v2344_v36 = vmul.f32 0.03125, %v2339_v41 }
0x1763   : > { %v2346_v60 = vsub.f32 %v6104_v35, %v2344_v36 }
0x1764   : > { %v2342_v15 = vpop.xlane.xlu0 %2341 }
0x1765   : > { %v2345_v51 = vmul.f32 0.03125, %v2342_v15  ;;  %v2348_v54 = vmul.f32 %v2346_v60, %v2346_v60 }
0x1767   : > { %v2347_v1 = vsub.f32 %v6106_v6, %v2345_v51  ;;  %v2350_v3 = vsel %vm2336_vm11, %v2348_v54, 0.0 }
0x1768   : > { %2351 = vadd.xlane.f32.xlu1 %v2350_v3 }
0x1769   : > { %v2349_v61 = vmul.f32 %v2347_v1, %v2347_v1 }
0x176b   : > { %v2353_v31 = vsel %vm2336_vm11, %v2349_v61, 0.0 }
0x176c   : > { %2354 = vadd.xlane.f32.xlu1 %v2353_v31 }
0x17f5   : > { %v2352_v4 = vpop.xlane.xlu1 %2351 }
0x17f6   : > { %v2356_v5 = vmul.f32 0.03125, %v2352_v4 }
0x17f8   : > { %v2358_v29 = vadd.f32 1e-05, %v2356_v5 }
0x17f9   : > { %v2355_v46 = vpop.xlane.xlu1 %2354 }
0x17fa   : > { %5200 = vrsqrt.f32 %v2358_v29  ;;  %v2357_v48 = vmul.f32 0.03125, %v2355_v46 }
0x17fc   : > { %v2359_v39 = vadd.f32 1e-05, %v2357_v48 }
0x17fe   : > { %5202 = vrsqrt.f32 %v2359_v39 }
0x1804   : > { %v5201_v2 = vpop.eup %5200 }
0x1805   : > { %v2362_v7 = vmul.f32 %v5201_v2, %v2346_v60 }
0x1807   : > { %v2368_v38 = vmul.f32 %v6138_v53, %v2362_v7 }
0x1808   : > { %v5203_v44 = vpop.eup %5202 }
0x1809   : > { %v2363_v52 = vmul.f32 %v5203_v44, %v2347_v1  ;;  %v2374_v55 = vadd.f32 %v6143_v26, %v2368_v38 }
0x180b   : > { %v2369_v56 = vmul.f32 %v6138_v53, %v2363_v52 }
0x180d   : > { %v2375_v49 = vadd.f32 %v6143_v26, %v2369_v56 }
0x180f   : > { %v2376_v32 = vpack.c.bf16 %v2375_v49, %v2374_v55 }
0x1811   : > { %4774 = vmatmul.mubr.msk.bf16.vlgmr.msra.gmra.mrb[0].mxu1 %vm2336_vm11, %v2376_v32 }
0x1812   : > { %4779 = vmatprep.mubr.msk.bf16.mxu1 %vm5375_vm12, %v5374_v43 }
0x18e4   : > { %v2430_v37 = vpop.f32.mrb[0].mxu1 }
0x18e5   : > { %v4775_v28 = vpop.f32.mrb[1].mxu1  ;;  %v2431_v50 = vadd.f32 %v2430_v37, %v6153_v27 }
0x18e6   : > { %v2433_v40 = vpop.f32.mrb[2].mxu1 }
0x18e7   : > { %v2434_v41 = vadd.f32 %v2433_v40, %v6153_v27  ;;  %v4776_v36 = vpop.f32.mrb[3].mxu1 }
0x18e9   : > { %v6157_v60 = vpack.c.bf16 %v2434_v41, %v2431_v50 }
0x18eb   : > { %2439 = vrot.lane.b32.xlu0 %v6157_v60, %s5376_s24 }
0x18ef   : > { %2562 = vrot.lane.b32.xlu0 %v6157_v60, %s5377_s25 }
0x18f3   : > { %2560 = vrot.lane.b32.xlu0 %v6157_v60, %s5378_s19 }
0x18f7   : > { %2683 = vrot.lane.b32.xlu0 %v6157_v60, %s5379_s27 }
0x18fb   : > { %2804 = vrot.lane.b32.xlu0 %v6157_v60, %s5380_s20 }
0x195d   : > { %v2440_v15 = vpop.permute.xlu0 %2439 }
0x195e   : > { %v2446_v51 = vsel %vm2441_vm13, %v2440_v15, 0 }
0x195f   : > { %4778 = vmatpush3.bf16.xpose.msra.mxu1 %v2446_v51 }
0x1960   : > { %4783 = vmatprep.subr.bf16.mxu1 %v5374_v43 }
0x1961   : > { %v2563_v38 = vpop.permute.xlu0 %2562 }
0x1962   : > { %v2568_v45 = vsel %vm2441_vm13, %v2563_v38, 0 }
0x1965   : > { %v2561_v32 = vpop.permute.xlu0 %2560 }
0x1966   : > { %4780 = vmatmul.mubr.msk.bf16.vlgmr.msra.gmra.mrb[4].mxu1 %vm2441_vm13, %v6157_v60 }
0x1967   : > { %4785 = vmatprep.mubr.msk.bf16.mxu1 %vm5375_vm12, %v5374_v43 }
0x1969   : > { %v2684_v37 = vpop.permute.xlu0 %2683 }
0x196a   : > { %v2689_v28 = vsel %vm2441_vm13, %v2684_v37, 0 }
0x196d   : > { %v2805_v40 = vpop.permute.xlu0 %2804 }
0x196e   : > { %v2810_v41 = vsel %vm2441_vm13, %v2805_v40, 0 }
0x1a39   : > { %v2482_v54 = vpop.f32.mrb[4].mxu1 }
0x1a3a   : > { %v4781_v1 = vpop.f32.mrb[5].mxu1  ;;  %v2490_v3 = vsel %vm2489_vm14, %v2482_v54, -inf }
0x1a3b   : > { %2491 = vmax.xlane.f32.xlu1 %v2490_v3  ;;  %v2485_v61 = vpop.f32.mrb[6].mxu1 }
0x1a3c   : > { %v4782_v31 = vpop.f32.mrb[7].mxu1  ;;  %v2493_v30 = vsel %vm2489_vm14, %v2485_v61, -inf }
0x1a3f   : > { %2494 = vmax.xlane.f32.xlu1 %v2493_v30 }
0x1ac8   : > { %v2492_v14 = vpop.xlane.xlu1 %2491 }
0x1ac9   : > { %v2496_v4 = vsub.f32 %v2482_v54, %v2492_v14 }
0x1acb   : > { %v2498_v5 = vmul.f32 1.442695, %v2496_v4 }
0x1acc   : > { %v2495_v29 = vpop.xlane.xlu1 %2494 }
0x1acd   : > { %5204 = vpow2.f32 %v2498_v5  ;;  %v2497_v46 = vsub.f32 %v2485_v61, %v2495_v29 }
0x1acf   : > { %v2500_v34 = vmul.f32 1.442695, %v2497_v46 }
0x1ad1   : > { %5206 = vpow2.f32 %v2500_v34 }
0x1ad7   : > { %v5205_v48 = vpop.eup %5204 }
0x1ad8   : > { %v2502_v39 = vsel %vm2489_vm14, %v5205_v48, 0.0 }
0x1ad9   : > { %2503 = vadd.xlane.f32.xlu1 %v2502_v39 }
0x1adb   : > { %v5207_v47 = vpop.eup %5206 }
0x1adc   : > { %v2505_v2 = vsel %vm2489_vm14, %v5207_v47, 0.0 }
0x1add   : > { %2506 = vadd.xlane.f32.xlu1 %v2505_v2 }
0x1aee   : > { %2513 = vrot.lane.b32.xlu1 %v6157_v60, %s5381_s4 }
0x1af2   : > { %2681 = vrot.lane.b32.xlu1 %v6157_v60, %s5382_s5 }
0x1af6   : > { %2802 = vrot.lane.b32.xlu1 %v6157_v60, %s5383_s23 }
0x1b66   : > { %v2504_v7 = vpop.xlane.xlu1 %2503 }
0x1b67   : > { %5208 = vrcp.f32 %v2504_v7 }
0x1b6a   : > { %v2507_v42 = vpop.xlane.xlu1 %2506 }
0x1b6b   : > { %5210 = vrcp.f32 %v2507_v42 }
0x1b6e   : > { %v2514_v44 = vpop.permute.xlu1 %2513 }
0x1b6f   : > { %4784 = vmatpush3.bf16.msra.mxu1 %v2514_v44 }
0x1b70   : > { %4789 = vmatprep.subr.bf16.mxu1 %v5374_v43 }
0x1b71   : > { %v5209_v52 = vpop.eup %5208 }
0x1b72   : > { %v2510_v56 = vmul.f32 %v5209_v52, %v5205_v48  ;;  %v2682_v50 = vpop.permute.xlu1 %2681 }
0x1b75   : > { %v5211_v59 = vpop.eup %5210 }
0x1b76   : > { %v2511_v55 = vmul.f32 %v5211_v59, %v5207_v47  ;;  %v2803_v36 = vpop.permute.xlu1 %2802 }
0x1b78   : > { %v2512_v49 = vpack.c.bf16 %v2511_v55, %v2510_v56 }
0x1b7a   : > { %4786 = vmatmul.mubr.msk.bf16.vlgmr.msra.gmra.mrb[8].mxu1 %vm2489_vm14, %v2512_v49 }
0x1b7b   : > { %4790 = vmatpush3.bf16.xpose.msra.mxu1 %v2568_v45  ;;  %4791 = vmatprep.mubr.msk.bf16.mxu1 %vm5375_vm12, %v5374_v43 }
0x1b7c   : > { %4801 = vmatprep.subr.bf16.mxu1 %v5374_v43 }
0x1b82   : > { %4792 = vmatmul.mubr.msk.bf16.vlgmr.msra.gmra.mrb[12].mxu1 %vm2441_vm13, %v2561_v32 }
0x1b83   : > { %4802 = vmatpush3.bf16.xpose.msra.mxu1 %v2689_v28  ;;  %4803 = vmatprep.mubr.msk.bf16.mxu1 %vm5375_vm12, %v5374_v43 }
0x1b84   : > { %4813 = vmatprep.subr.bf16.mxu1 %v5374_v43 }
0x1b8a   : > { %4804 = vmatmul.mubr.msk.bf16.vlgmr.msra.gmra.mrb[16].mxu1 %vm2441_vm13, %v2682_v50 }
0x1b8b   : > { %4814 = vmatpush3.bf16.xpose.msra.mxu1 %v2810_v41  ;;  %4815 = vmatprep.mubr.msk.bf16.mxu1 %vm5375_vm12, %v5374_v43 }
0x1b8c   : > { %4825 = vmatprep.subr.bf16.mxu1 %v5374_v43 }
0x1b92   : > { %4816 = vmatmul.mubr.msk.bf16.vlgmr.msra.gmra.mrb[20].mxu1 %vm2441_vm13, %v2803_v36 }
0x1b93   : > { %4829 = vmatprep.mubr.msk.bf16.mxu1 %vm5375_vm12, %v5374_v43 }
0x1c4d   : > { %v6204_v15 = vpop.f32.mrb[8].mxu1 }
0x1c4e   : > { %v4787_v51 = vpop.f32.mrb[9].mxu1 }
0x1c4f   : > { %v6206_v54 = vpop.f32.mrb[10].mxu1 }
0x1c50   : > { %v4788_v1 = vpop.f32.mrb[11].mxu1 }
0x1c55   : > { %v2604_v3 = vpop.f32.mrb[12].mxu1 }
0x1c56   : > { %v4793_v61 = vpop.f32.mrb[13].mxu1  ;;  %v2611_v31 = vsel %vm2489_vm14, %v2604_v3, -inf }
0x1c57   : > { %2612 = vmax.xlane.f32.xlu0 %v2611_v31  ;;  %v2607_v30 = vpop.f32.mrb[14].mxu1 }
0x1c58   : > { %v4794_v14 = vpop.f32.mrb[15].mxu1  ;;  %v2614_v4 = vsel %vm2489_vm14, %v2607_v30, -inf }
0x1c59   : > { %2615 = vmax.xlane.f32.xlu1 %v2614_v4 }
0x1c5d   : > { %v2725_v5 = vpop.f32.mrb[16].mxu1 }
0x1c5e   : > { %v4805_v29 = vpop.f32.mrb[17].mxu1  ;;  %v2732_v46 = vsel %vm2489_vm14, %v2725_v5, -inf }
0x1c5f   : > { %2733 = vmax.xlane.f32.xlu0 %v2732_v46  ;;  %v2728_v34 = vpop.f32.mrb[18].mxu1 }
0x1c60   : > { %v4806_v48 = vpop.f32.mrb[19].mxu1  ;;  %v2735_v39 = vsel %vm2489_vm14, %v2728_v34, -inf }
0x1c63   : > { %2736 = vmax.xlane.f32.xlu0 %v2735_v39 }
0x1c65   : > { %v2846_v47 = vpop.f32.mrb[20].mxu1 }
0x1c66   : > { %v4817_v2 = vpop.f32.mrb[21].mxu1  ;;  %v2853_v7 = vsel %vm2489_vm14, %v2846_v47, -inf }
0x1c67   : > { %2854 = vmax.xlane.f32.xlu0 %v2853_v7  ;;  %v2849_v42 = vpop.f32.mrb[22].mxu1 }
0x1c68   : > { %v4818_v44 = vpop.f32.mrb[23].mxu1  ;;  %v2856_v52 = vsel %vm2489_vm14, %v2849_v42, -inf }
0x1c69   : > { %2857 = vmax.xlane.f32.xlu1 %v2856_v52 }
0x1ce4   : > { %v2613_v38 = vpop.xlane.xlu0 %2612 }
0x1ce5   : > { %v2617_v59 = vsub.f32 %v2604_v3, %v2613_v38 }
0x1ce6   : > { %v2616_v56 = vpop.xlane.xlu1 %2615 }
0x1ce7   : > { %v2619_v55 = vmul.f32 1.442695, %v2617_v59  ;;  %v2618_v49 = vsub.f32 %v2607_v30, %v2616_v56 }
0x1ce9   : > { %5212 = vpow2.f32 %v2619_v55  ;;  %v2621_v32 = vmul.f32 1.442695, %v2618_v49 }
0x1ceb   : > { %5214 = vpow2.f32 %v2621_v32 }
0x1cec   : > { %v2734_v45 = vpop.xlane.xlu0 %2733 }
0x1ced   : > { %v2738_v37 = vsub.f32 %v2725_v5, %v2734_v45 }
0x1cef   : > { %v2740_v28 = vmul.f32 1.442695, %v2738_v37 }
0x1cf0   : > { %v2737_v40 = vpop.xlane.xlu0 %2736 }
0x1cf1   : > { %5216 = vpow2.f32 %v2740_v28  ;;  %v2739_v50 = vsub.f32 %v2728_v34, %v2737_v40 }
0x1cf3   : > { %v5213_v41 = vpop.eup %5212  ;;  %v2742_v36 = vmul.f32 1.442695, %v2739_v50 }
0x1cf4   : > { %v2855_v51 = vpop.xlane.xlu0 %2854  ;;  %v2623_v1 = vsel %vm2489_vm14, %v5213_v41, 0.0 }
0x1cf5   : > { %v5215_v61 = vpop.eup %5214  ;;  %5218 = vpow2.f32 %v2742_v36  ;;  %v2859_v3 = vsub.f32 %v2846_v47, %v2855_v51  ;;  %2624 = vadd.xlane.f32.xlu0 %v2623_v1 }
0x1cf6   : > { %v2626_v31 = vsel %vm2489_vm14, %v5215_v61, 0.0  ;;  %v2858_v48 = vpop.xlane.xlu1 %2857 }
0x1cf7   : > { %v2861_v30 = vmul.f32 1.442695, %v2859_v3  ;;  %2627 = vadd.xlane.f32.xlu1 %v2626_v31  ;;  %v2860_v39 = vsub.f32 %v2849_v42, %v2858_v48 }
0x1cf9   : > { %5220 = vpow2.f32 %v2861_v30  ;;  %v2863_v47 = vmul.f32 1.442695, %v2860_v39 }
0x1cfb   : > { %v5217_v14 = vpop.eup %5216  ;;  %5222 = vpow2.f32 %v2863_v47 }
0x1cfc   : > { %v2744_v4 = vsel %vm2489_vm14, %v5217_v14, 0.0 }
0x1cfd   : > { %2745 = vadd.xlane.f32.xlu0 %v2744_v4 }
0x1cff   : > { %v5219_v5 = vpop.eup %5218 }
0x1d00   : > { %v2747_v29 = vsel %vm2489_vm14, %v5219_v5, 0.0 }
0x1d01   : > { %2748 = vadd.xlane.f32.xlu1 %v2747_v29 }
0x1d03   : > { %v5221_v46 = vpop.eup %5220 }
0x1d04   : > { %v2865_v34 = vsel %vm2489_vm14, %v5221_v46, 0.0 }
0x1d05   : > { %2866 = vadd.xlane.f32.xlu0 %v2865_v34  ;;  %v5223_v2 = vpop.eup %5222  ;;  %v6240_v34 = vcombine.low %v5579_v8, %v5582_v9  ;;  %v6248_v8 = vcombine.low %v5585_v10, %v5588_v11 }
0x1d06   : > { %v2868_v7 = vsel %vm2489_vm14, %v5223_v2, 0.0 }
0x1d07   : > { %4826 = vmatpush3.bf16.msra.mxu1 %v6240_v34 }
0x1d08   : > { %4827 = vmatprep.subr.bf16.mxu1 %v5374_v43 }
0x1d0b   : > { %4828 = vmatpush3.bf16.msra.mxu1 %v6248_v8 }
0x1d0c   : > { %4841 = vmatprep.subr.bf16.mxu1 %v5374_v43 }
0x1d12   : > { %2755 = vrot.lane.b32.xlu1 %v6157_v60, %s5384_s26 }
0x1d1b   : > { %2634 = vrot.lane.b32.xlu0 %v6157_v60, %s5385_s29 }
0x1d36   : > { %2869 = vadd.xlane.f32.xlu1 %v2868_v7 }
0x1d47   : > { %2876 = vrot.lane.b32.xlu1 %v6157_v60, %s5386_s12 }
0x1d82   : > { %v2625_v52 = vpop.xlane.xlu0 %2624 }
0x1d84   : > { %v2628_v44 = vpop.xlane.xlu1 %2627 }
0x1d85   : > { %5224 = vrcp.f32 %v2628_v44 }
0x1d86   : > { %5226 = vrcp.f32 %v2625_v52 }
0x1d8a   : > { %v2746_v38 = vpop.xlane.xlu0 %2745 }
0x1d8e   : > { %v2749_v59 = vpop.xlane.xlu1 %2748 }
0x1d8f   : > { %5228 = vrcp.f32 %v2749_v59  ;;  %v5225_v56 = vpop.eup %5224 }
0x1d90   : > { %5230 = vrcp.f32 %v2746_v38  ;;  %v5227_v55 = vpop.eup %5226  ;;  %v2632_v49 = vmul.f32 %v5225_v56, %v5215_v61 }
0x1d91   : > { %v2631_v45 = vmul.f32 %v5227_v55, %v5213_v41 }
0x1d92   : > { %v2867_v42 = vpop.xlane.xlu0 %2866  ;;  %v2756_v60 = vpop.permute.xlu1 %2755 }
0x1d93   : > { %v2633_v37 = vpack.c.bf16 %v2632_v49, %v2631_v45  ;;  %5232 = vrcp.f32 %v2867_v42 }
0x1d96   : > { %v2635_v32 = vpop.permute.xlu0 %2634 }
0x1d97   : > { %4796 = vmatpush3.bf16.msra.mxu0 %v2635_v32 }
0x1d98   : > { %4807 = vmatprep.subr.bf16.mxu0 %v5374_v43 }
0x1d99   : > { %v5229_v28 = vpop.eup %5228 }
0x1d9a   : > { %4798 = vmatmul.mubr.msk.bf16.vlgmr.msra.gmra.mrb[0].mxu0 %vm2489_vm14, %v2633_v37  ;;  %v5231_v40 = vpop.eup %5230  ;;  %v2753_v50 = vmul.f32 %v5229_v28, %v5219_v5 }
0x1d9b   : > { %4808 = vmatpush3.bf16.msra.mxu0 %v2756_v60  ;;  %4809 = vmatprep.mubr.msk.bf16.mxu0 %vm5375_vm12, %v5374_v43  ;;  %v2752_v36 = vmul.f32 %v5231_v40, %v5217_v14 }
0x1d9c   : > { %4819 = vmatprep.subr.bf16.mxu0 %v5374_v43 }
0x1d9d   : > { %v2754_v51 = vpack.c.bf16 %v2753_v50, %v2752_v36  ;;  %v5233_v61 = vpop.eup %5232 }
0x1d9e   : > { %v2873_v31 = vmul.f32 %v5233_v61, %v5221_v46 }
0x1da2   : > { %4810 = vmatmul.mubr.msk.bf16.vlgmr.msra.gmra.mrb[4].mxu0 %vm2489_vm14, %v2754_v51 }
0x1da3   : > { %4821 = vmatprep.mubr.msk.bf16.mxu0 %vm5375_vm12, %v5374_v43 }
0x1dc3   : > { %v2870_v41 = vpop.xlane.xlu1 %2869 }
0x1dc4   : > { %5234 = vrcp.f32 %v2870_v41 }
0x1dc7   : > { %v2877_v1 = vpop.permute.xlu1 %2876 }
0x1dc8   : > { %4820 = vmatpush3.bf16.msra.mxu0 %v2877_v1 }
0x1dc9   : > { %4833 = vmatprep.subr.bf16.mxu0 %v5374_v43 }
0x1dce   : > { %v5235_v3 = vpop.eup %5234 }
0x1dcf   : > { %v2874_v30 = vmul.f32 %v5235_v3, %v5223_v2 }
0x1dd1   : > { %v2875_v4 = vpack.c.bf16 %v2874_v30, %v2873_v31 }
0x1dd3   : > { %4822 = vmatmul.mubr.msk.bf16.vlgmr.msra.gmra.mrb[8].mxu0 %vm2489_vm14, %v2875_v4 }
0x1dd4   : > { %4837 = vmatprep.mubr.msk.bf16.mxu0 %vm5375_vm12, %v5374_v43 }
0x1e6d   : > { %v2674_v14 = vpop.f32.mrb[0].mxu0 }
0x1e6e   : > { %v4799_v5 = vpop.f32.mrb[1].mxu0 }
0x1e6f   : > { %v2677_v29 = vpop.f32.mrb[2].mxu0  ;;  %v6273_v5 = vld [vmem:[#allocation2 + $0x10] sm:$0xff] }
0x1e70   : > { %v5170_v48 = vpack.i.bf16 %v2677_v29, %v2674_v14  ;;  %v4800_v39 = vpop.f32.mrb[3].mxu0 }
0x1e71   : > { %v3233_v39 = vsel %vm2336_vm11, %v6273_v5, 0.0 }
0x1e72   : > { %5171 = vrot.lane.b32.xlu1 %v5170_v48, %s5387_s18 }
0x1e75   : > { %v2795_v46 = vpop.f32.mrb[4].mxu0 }
0x1e76   : > { %v4811_v47 = vpop.f32.mrb[5].mxu0 }
0x1e77   : > { %v2798_v2 = vpop.f32.mrb[6].mxu0 }
0x1e78   : > { %v5175_v7 = vpack.i.bf16 %v2798_v2, %v2795_v46  ;;  %v4812_v44 = vpop.f32.mrb[7].mxu0 }
0x1e7a   : > { %5176 = vrot.lane.b32.xlu0 %v5175_v7, %s5388_s28 }
0x1ea6   : > { %v2916_v9 = vpop.f32.mrb[8].mxu0 }
0x1ea7   : > { %v4823_v52 = vpop.f32.mrb[9].mxu0 }
0x1ea8   : > { %v2919_v38 = vpop.f32.mrb[10].mxu0 }
0x1ea9   : > { %v5180_v59 = vpack.i.bf16 %v2919_v38, %v2916_v9  ;;  %v4824_v56 = vpop.f32.mrb[11].mxu0 }
0x1eab   : > { %5181 = vrot.lane.b32.xlu1 %v5180_v59, %s5389_s16 }
0x1ee4   : > { %v5172_v42 = vpop.permute.xlu1 %5171 }
0x1ee5   : > { %v5174_v49 = vunpack.i.h.bf16 %v5172_v42  ;;  %v5173_v32 = vunpack.i.l.bf16 %v5172_v42 }
0x1ee7   : > { %v2948_v11 = vsel %vm2441_vm13, %v6206_v54, %v5174_v49  ;;  %v2947_v28 = vsel %vm2441_vm13, %v6204_v15, %v5173_v32  ;;  %v6266_v54 = vrot.slane %v5549_v62, %v6134_v33 }
0x1eec   : > { %v5177_v55 = vpop.permute.xlu0 %5176 }
0x1eed   : > { %v5179_v45 = vunpack.i.h.bf16 %v5177_v55  ;;  %v5178_v37 = vunpack.i.l.bf16 %v5177_v55 }
0x1eef   : > { %v2949_v50 = vsel %vm2489_vm14, %v2947_v28, %v5178_v37  ;;  %v2950_v36 = vsel %vm2489_vm14, %v2948_v11, %v5179_v45 }
0x1f1d   : > { %v5182_v10 = vpop.permute.xlu1 %5181 }
0x1f1e   : > { %v5184_v60 = vunpack.i.h.bf16 %v5182_v10  ;;  %v5183_v40 = vunpack.i.l.bf16 %v5182_v10 }
0x1f20   : > { %v2952_v51 = vsel %vm2951_vm15, %v2949_v50, %v5183_v40  ;;  %v2953_v41 = vsel %vm2951_vm15, %v2950_v36, %v5184_v60  ;;  %v6298_v40 = vcombine.low %v5591_v12, %v5594_v13  ;;  %v6662_v50 = vld [vmem:[#allocation15_spill] sm:$0xff]  ;;  %v6663_v36 = vld [vmem:[#allocation14_spill] sm:$0xff] }
0x1f21   : > { %v2954_v1 = vpack.c.bf16 %v2953_v41, %v2952_v51  ;;  %v6304_v51 = vcombine.low %v6663_v36, %v6662_v50 }
0x1f22   : > { %4834 = vmatpush3.bf16.msra.mxu0 %v6298_v40 }
0x1f23   : > { %4830 = vmatmul.mubr.msk.bf16.vlgmr.msra.gmra.mrb[24].mxu1 %vm2336_vm11, %v2954_v1  ;;  %4835 = vmatprep.subr.bf16.mxu0 %v5374_v43 }
0x1f24   : > { %4857 = vmatprep.mubr.msk.bf16.mxu1 %vm5375_vm12, %v5374_v43 }
0x1f26   : > { %4836 = vmatpush3.bf16.msra.mxu0 %v6304_v51 }
0x1f27   : > { %4861 = vmatprep.subr.bf16.mxu0 %v5374_v43 }
0x1ff6   : > { %v3008_v15 = vpop.f32.mrb[24].mxu1 }
0x1ff7   : > { %v3009_v61 = vadd.f32 %v3008_v15, %v6266_v54  ;;  %v4831_v3 = vpop.f32.mrb[25].mxu1 }
0x1ff8   : > { %v3011_v31 = vpop.f32.mrb[26].mxu1 }
0x1ff9   : > { %v6270_v30 = vadd.f32 %v3009_v61, %v6104_v35  ;;  %v3012_v4 = vadd.f32 %v3011_v31, %v6266_v54  ;;  %v4832_v14 = vpop.f32.mrb[27].mxu1  ;;  %v6284_v35 = vld [vmem:[#allocation2 + $0x18] sm:$0xff] }
0x1ffa   : > { %v3236_v46 = vsel %vm2336_vm11, %v6284_v35, 0.0 }
0x1ffb   : > { %v6276_v29 = vadd.f32 %v3012_v4, %v6106_v6  ;;  %v3017_v62 = vsel %vm2336_vm11, %v6270_v30, 0.0 }
0x1ffc   : > { %3018 = vadd.xlane.f32.xlu0 %v3017_v62 }
0x1ffd   : > { %v3020_v48 = vsel %vm2336_vm11, %v6276_v29, 0.0 }
0x1ffe   : > { %3021 = vadd.xlane.f32.xlu1 %v3020_v48 }
0x2000   : > { %3234 = vadd.xlane.f32.xlu0 %v3233_v39  ;;  %v6310_v39 = vrot.slane %v5552_v63, %v6134_v33 }
0x2004   : > { %3237 = vadd.xlane.f32.xlu0 %v3236_v46 }
0x2089   : > { %v3019_v6 = vpop.xlane.xlu0 %3018 }
0x208a   : > { %v3023_v47 = vmul.f32 0.03125, %v3019_v6 }
0x208b   : > { %v3022_v2 = vpop.xlane.xlu1 %3021 }
0x208c   : > { %v3025_v7 = vsub.f32 %v6270_v30, %v3023_v47  ;;  %v3024_v44 = vmul.f32 0.03125, %v3022_v2 }
0x208d   : > { %v3235_v9 = vpop.xlane.xlu0 %3234 }
0x208e   : > { %v3026_v52 = vsub.f32 %v6276_v29, %v3024_v44  ;;  %v3239_v38 = vmul.f32 0.03125, %v3235_v9  ;;  %v3027_v59 = vmul.f32 %v3025_v7, %v3025_v7  ;;  %v6315_v9 = vrot.slane %v5555_v0, %v6134_v33 }
0x2090   : > { %v3241_v56 = vsub.f32 %v6273_v5, %v3239_v38  ;;  %v3029_v42 = vsel %vm2336_vm11, %v3027_v59, 0.0  ;;  %v3028_v55 = vmul.f32 %v3026_v52, %v3026_v52 }
0x2091   : > { %3030 = vadd.xlane.f32.xlu0 %v3029_v42  ;;  %v3238_v49 = vpop.xlane.xlu0 %3237 }
0x2092   : > { %v3240_v32 = vmul.f32 0.03125, %v3238_v49  ;;  %v3032_v45 = vsel %vm2336_vm11, %v3028_v55, 0.0  ;;  %v3243_v37 = vmul.f32 %v3241_v56, %v3241_v56 }
0x2093   : > { %3033 = vadd.xlane.f32.xlu1 %v3032_v45 }
0x2094   : > { %v3242_v10 = vsub.f32 %v6284_v35, %v3240_v32  ;;  %v3245_v11 = vsel %vm2336_vm11, %v3243_v37, 0.0 }
0x2095   : > { %3246 = vadd.xlane.f32.xlu0 %v3245_v11 }
0x2096   : > { %v3244_v28 = vmul.f32 %v3242_v10, %v3242_v10 }
0x2098   : > { %v3248_v60 = vsel %vm2336_vm11, %v3244_v28, 0.0 }
0x2099   : > { %3249 = vadd.xlane.f32.xlu1 %v3248_v60 }
0x211e   : > { %v3031_v41 = vpop.xlane.xlu0 %3030 }
0x211f   : > { %v3035_v1 = vmul.f32 0.03125, %v3031_v41 }
0x2120   : > { %v3034_v15 = vpop.xlane.xlu1 %3033 }
0x2121   : > { %v3037_v61 = vadd.f32 1e-05, %v3035_v1  ;;  %v3036_v3 = vmul.f32 0.03125, %v3034_v15 }
0x2122   : > { %v3247_v31 = vpop.xlane.xlu0 %3246 }
0x2123   : > { %5236 = vrsqrt.f32 %v3037_v61  ;;  %v3038_v12 = vadd.f32 1e-05, %v3036_v3  ;;  %v3251_v13 = vmul.f32 0.03125, %v3247_v31 }
0x2125   : > { %5238 = vrsqrt.f32 %v3038_v12  ;;  %v3253_v4 = vadd.f32 1e-05, %v3251_v13 }
0x2126   : > { %v3250_v14 = vpop.xlane.xlu1 %3249 }
0x2127   : > { %5240 = vrsqrt.f32 %v3253_v4  ;;  %v3252_v62 = vmul.f32 0.03125, %v3250_v14 }
0x2129   : > { %v3254_v48 = vadd.f32 1e-05, %v3252_v62 }
0x212b   : > { %5242 = vrsqrt.f32 %v3254_v48 }
0x212d   : > { %v5237_v46 = vpop.eup %5236 }
0x212e   : > { %v3041_v6 = vmul.f32 %v5237_v46, %v3025_v7 }
0x212f   : > { %v5239_v47 = vpop.eup %5238 }
0x2130   : > { %v3047_v2 = vmul.f32 %v6310_v39, %v3041_v6  ;;  %v3042_v44 = vmul.f32 %v5239_v47, %v3026_v52 }
0x2131   : > { %v5241_v38 = vpop.eup %5240 }
0x2132   : > { %v3048_v59 = vmul.f32 %v6310_v39, %v3042_v44  ;;  %v3257_v42 = vmul.f32 %v5241_v38, %v3241_v56  ;;  %v3053_v55 = vadd.f32 %v6315_v9, %v3047_v2 }
0x2134   : > { %v3054_v49 = vadd.f32 %v6315_v9, %v3048_v59  ;;  %v3259_v7 = vmul.f32 %v3257_v42, %v6138_v53 }
0x2135   : > { %v5243_v63 = vpop.eup %5242 }
0x2136   : > { %v3258_v32 = vmul.f32 %v5243_v63, %v3242_v10  ;;  %v3055_v45 = vpack.c.bf16 %v3054_v49, %v3053_v55  ;;  %v3261_v52 = vadd.f32 %v3259_v7, %v6143_v26  ;;  %v6670_v10 = vld [vmem:[#allocation10_spill] sm:$0xff] }
0x2137   : > { %v6384_v11 = vrot.slane %v6670_v10, %v6134_v33 }
0x2138   : > { %v3260_v37 = vmul.f32 %v3258_v32, %v6138_v53  ;;  %4838 = vmatmul.mubr.msk.bf16.vlgmr.msra.gmra.mrb[12].mxu0 %vm2336_vm11, %v3055_v45  ;;  %v6342_v53 = vcombine.low %v5609_v18, %v5612_v19  ;;  %v6664_v18 = vld [vmem:[#allocation17_spill] sm:$0xff]  ;;  %v6665_v19 = vld [vmem:[#allocation16_spill] sm:$0xff] }
0x2139   : > { %4862 = vmatpush3.bf16.msra.mxu0 %v6118_v57  ;;  %4865 = vmatprep.mubr.msk.bf16.mxu0 %vm5375_vm12, %v5374_v43  ;;  %v6336_v57 = vcombine.low %v5603_v16, %v5606_v17  ;;  %v6354_v16 = vcombine.low %v5621_v22, %v5624_v23  ;;  %v6360_v17 = vcombine.low %v5627_v24, %v5630_v25  ;;  %v6667_v22 = vld [vmem:[#allocation18_spill] sm:$0xff]  ;;  %v6668_v24 = vld [vmem:[#allocation21_spill] sm:$0xff]  ;;  %v6669_v25 = vld [vmem:[#allocation20_spill] sm:$0xff] }
0x213a   : > { %4863 = vmatprep.subr.bf16.mxu0 %v5374_v43  ;;  %v3262_v0 = vadd.f32 %v3260_v37, %v6143_v26  ;;  %v6378_v26 = vcombine.low %v6669_v25, %v6668_v24  ;;  %v6671_v32 = vld [vmem:[#allocation9_spill] sm:$0xff] }
0x213b   : > { %4842 = vmatpush3.bf16.msra.mxu1 %v6336_v57  ;;  %v6412_v45 = vrot.slane %v6671_v32, %v6134_v33 }
0x213c   : > { %v3263_v56 = vpack.c.bf16 %v3262_v0, %v3261_v52  ;;  %4843 = vmatprep.subr.bf16.mxu1 %v5374_v43 }
0x213d   : > { %4864 = vmatpush3.bf16.msra.mxu0 %v6125_v58  ;;  %v6348_v58 = vcombine.low %v5615_v20, %v5618_v21  ;;  %v6366_v20 = vcombine.low %v6665_v19, %v6664_v18  ;;  %v6666_v21 = vld [vmem:[#allocation19_spill] sm:$0xff] }
0x213e   : > { %4869 = vmatprep.subr.bf16.mxu0 %v5374_v43  ;;  %v6372_v23 = vcombine.low %v6667_v22, %v6666_v21 }
0x213f   : > { %4844 = vmatpush3.bf16.msra.mxu1 %v6342_v53 }
0x2140   : > { %4866 = vmatmul.mubr.msk.bf16.vlgmr.msra.gmra.mrb[16].mxu0 %vm2336_vm11, %v3263_v56  ;;  %4845 = vmatprep.subr.bf16.mxu1 %v5374_v43 }
0x2141   : > { %4871 = vmatprep.mubr.msk.bf16.mxu0 %vm5375_vm12, %v5374_v43 }
0x2143   : > { %4846 = vmatpush3.bf16.msra.mxu1 %v6348_v58 }
0x2144   : > { %4847 = vmatprep.subr.bf16.mxu1 %v5374_v43 }
0x2147   : > { %4848 = vmatpush3.bf16.msra.mxu1 %v6354_v16 }
0x2148   : > { %4849 = vmatprep.subr.bf16.mxu1 %v5374_v43 }
0x214b   : > { %4850 = vmatpush3.bf16.msra.mxu1 %v6360_v17 }
0x214c   : > { %4851 = vmatprep.subr.bf16.mxu1 %v5374_v43 }
0x214f   : > { %4852 = vmatpush3.bf16.msra.mxu1 %v6366_v20 }
0x2150   : > { %4853 = vmatprep.subr.bf16.mxu1 %v5374_v43 }
0x2153   : > { %4854 = vmatpush3.bf16.msra.mxu1 %v6372_v23 }
0x2154   : > { %4855 = vmatprep.subr.bf16.mxu1 %v5374_v43 }
0x2157   : > { %4856 = vmatpush3.bf16.msra.mxu1 %v6378_v26 }
0x2158   : > { %4887 = vmatprep.subr.bf16.mxu1 %v5374_v43 }
0x220b   : > { %v3109_v28 = vpop.f32.mrb[12].mxu0 }
0x220c   : > { %v3110_v60 = vadd.f32 %v3109_v28, %v6384_v11  ;;  %v4839_v50 = vpop.f32.mrb[13].mxu0 }
0x220d   : > { %v3112_v36 = vpop.f32.mrb[14].mxu0 }
0x220e   : > { %v4405_v41 = vmul.f32 -1.702, %v3110_v60  ;;  %v3113_v1 = vadd.f32 %v3112_v36, %v6384_v11  ;;  %v4840_v15 = vpop.f32.mrb[15].mxu0 }
0x2210   : > { %v3120_v61 = vmul.f32 1.442695, %v4405_v41  ;;  %v4406_v3 = vmul.f32 -1.702, %v3113_v1 }
0x2212   : > { %5244 = vpow2.f32 %v3120_v61  ;;  %v3122_v31 = vmul.f32 1.442695, %v4406_v3 }
0x2213   : > { %v3301_v12 = vpop.f32.mrb[16].mxu0 }
0x2214   : > { %5246 = vpow2.f32 %v3122_v31  ;;  %v4867_v13 = vpop.f32.mrb[17].mxu0  ;;  %v3302_v14 = vadd.f32 %v3301_v12, %v6153_v27 }
0x2215   : > { %v3304_v4 = vpop.f32.mrb[18].mxu0 }
0x2216   : > { %v3305_v62 = vadd.f32 %v3304_v4, %v6153_v27  ;;  %v4868_v48 = vpop.f32.mrb[19].mxu0 }
0x2218   : > { %v6390_v46 = vpack.c.bf16 %v3305_v62, %v3302_v14 }
0x221a   : > { %3310 = vrot.lane.b32.xlu0 %v6390_v46, %s5376_s24 }
0x221c   : > { %v5245_v6 = vpop.eup %5244 }
0x221d   : > { %v3124_v47 = vadd.f32 1.0, %v5245_v6 }
0x221e   : > { %v5247_v2 = vpop.eup %5246  ;;  %3431 = vrot.lane.b32.xlu0 %v6390_v46, %s5377_s25 }
0x221f   : > { %5248 = vrcp.f32 %v3124_v47  ;;  %v3125_v44 = vadd.f32 1.0, %v5247_v2 }
0x2221   : > { %5250 = vrcp.f32 %v3125_v44 }
0x2222   : > { %3429 = vrot.lane.b32.xlu0 %v6390_v46, %s5378_s19 }
0x2226   : > { %3552 = vrot.lane.b32.xlu0 %v6390_v46, %s5379_s27 }
0x2229   : > { %v5249_v27 = vpop.eup %5248 }
0x222a   : > { %3673 = vrot.lane.b32.xlu0 %v6390_v46, %s5380_s20  ;;  %v3130_v59 = vmul.f32 %v5249_v27, %v3110_v60 }
0x222b   : > { %v5251_v38 = vpop.eup %5250 }
0x222c   : > { %v3131_v42 = vmul.f32 %v5251_v38, %v3113_v1 }
0x222e   : > { %v3132_v55 = vpack.c.bf16 %v3131_v42, %v3130_v59 }
0x2230   : > { %4858 = vmatmul.mubr.bf16.vlgmr.msra.gmra.mrb[28].mxu1 %v3132_v55 }
0x2231   : > { %4889 = vmatprep.mubr.msk.bf16.mxu1 %vm5375_vm12, %v5374_v43 }
0x228c   : > { %v3311_v49 = vpop.permute.xlu0 %3310 }
0x228d   : > { %v3316_v63 = vsel %vm2441_vm13, %v3311_v49, 0 }
0x228e   : > { %4870 = vmatpush3.bf16.xpose.msra.mxu0 %v3316_v63 }
0x228f   : > { %4875 = vmatprep.subr.bf16.mxu0 %v5374_v43 }
0x2290   : > { %v3432_v14 = vpop.permute.xlu0 %3431 }
0x2291   : > { %v3437_v44 = vsel %vm2441_vm13, %v3432_v14, 0 }
0x2294   : > { %v3430_v2 = vpop.permute.xlu0 %3429 }
0x2295   : > { %4872 = vmatmul.mubr.msk.bf16.vlgmr.msra.gmra.mrb[20].mxu0 %vm2441_vm13, %v6390_v46 }
0x2296   : > { %4877 = vmatprep.mubr.msk.bf16.mxu0 %vm5375_vm12, %v5374_v43 }
0x2298   : > { %v3553_v27 = vpop.permute.xlu0 %3552 }
0x2299   : > { %v3558_v38 = vsel %vm2441_vm13, %v3553_v27, 0 }
0x229c   : > { %v3674_v59 = vpop.permute.xlu0 %3673 }
0x229d   : > { %v3679_v55 = vsel %vm2441_vm13, %v3674_v59, 0 }
0x2303   : > { %v3219_v7 = vpop.f32.mrb[28].mxu1 }
0x2304   : > { %v3220_v37 = vadd.f32 %v3219_v7, %v6412_v45  ;;  %v4859_v0 = vpop.f32.mrb[29].mxu1 }
0x2305   : > { %v3222_v52 = vpop.f32.mrb[30].mxu1 }
0x2306   : > { %v3226_v56 = vadd.f32 %v3220_v37, %v6270_v30  ;;  %v3223_v18 = vadd.f32 %v3222_v52, %v6412_v45  ;;  %v4860_v19 = vpop.f32.mrb[31].mxu1 }
0x2308   : > { %3228 = vst.msk [vmem:[#allocation2] sm:$0xff] %vm2336_vm11, %v3226_v56  ;;  %v3227_v21 = vadd.f32 %v3223_v18, %v6276_v29 }
0x230a   : > { %3229 = vst.msk [vmem:[#allocation2 + $0x8] sm:$0xff] %vm2336_vm11, %v3227_v21 }
0x2368   : > { %v3352_v22 = vpop.f32.mrb[20].mxu0 }
0x2369   : > { %v4873_v24 = vpop.f32.mrb[21].mxu0  ;;  %v3359_v33 = vsel %vm2489_vm14, %v3352_v22, -inf }
0x236a   : > { %3360 = vmax.xlane.f32.xlu1 %v3359_v33  ;;  %v3355_v25 = vpop.f32.mrb[22].mxu0 }
0x236b   : > { %v4874_v10 = vpop.f32.mrb[23].mxu0  ;;  %v3362_v28 = vsel %vm2489_vm14, %v3355_v25, -inf }
0x236e   : > { %3363 = vmax.xlane.f32.xlu1 %v3362_v28 }
0x23f7   : > { %v3361_v30 = vpop.xlane.xlu1 %3360 }
0x23f8   : > { %v3365_v60 = vsub.f32 %v3352_v22, %v3361_v30 }
0x23fa   : > { %v3367_v50 = vmul.f32 1.442695, %v3365_v60 }
0x23fb   : > { %v3364_v36 = vpop.xlane.xlu1 %3363 }
0x23fc   : > { %5252 = vpow2.f32 %v3367_v50  ;;  %v3366_v41 = vsub.f32 %v3355_v25, %v3364_v36 }
0x23fe   : > { %v3369_v1 = vmul.f32 1.442695, %v3366_v41 }
0x2400   : > { %5254 = vpow2.f32 %v3369_v1 }
0x2406   : > { %v5253_v29 = vpop.eup %5252 }
0x2407   : > { %v3371_v15 = vsel %vm2489_vm14, %v5253_v29, 0.0 }
0x2408   : > { %3372 = vadd.xlane.f32.xlu1 %v3371_v15 }
0x240a   : > { %v5255_v61 = vpop.eup %5254 }
0x240b   : > { %v3374_v3 = vsel %vm2489_vm14, %v5255_v61, 0.0 }
0x240c   : > { %3375 = vadd.xlane.f32.xlu1 %v3374_v3 }
0x241d   : > { %3382 = vrot.lane.b32.xlu1 %v6390_v46, %s5381_s4 }
0x2421   : > { %3550 = vrot.lane.b32.xlu1 %v6390_v46, %s5382_s5 }
0x2425   : > { %3671 = vrot.lane.b32.xlu1 %v6390_v46, %s5383_s23 }
0x2495   : > { %v3373_v31 = vpop.xlane.xlu1 %3372 }
0x2496   : > { %5256 = vrcp.f32 %v3373_v31 }
0x2499   : > { %v3376_v12 = vpop.xlane.xlu1 %3375 }
0x249a   : > { %5258 = vrcp.f32 %v3376_v12 }
0x249d   : > { %v3383_v13 = vpop.permute.xlu1 %3382 }
0x249e   : > { %4876 = vmatpush3.bf16.msra.mxu0 %v3383_v13 }
0x249f   : > { %4881 = vmatprep.subr.bf16.mxu0 %v5374_v43 }
0x24a0   : > { %v5257_v4 = vpop.eup %5256 }
0x24a1   : > { %v3379_v48 = vmul.f32 %v5257_v4, %v5253_v29  ;;  %v3551_v42 = vpop.permute.xlu1 %3550 }
0x24a4   : > { %v5259_v62 = vpop.eup %5258 }
0x24a5   : > { %v3380_v6 = vmul.f32 %v5259_v62, %v5255_v61  ;;  %v3672_v49 = vpop.permute.xlu1 %3671 }
0x24a7   : > { %v3381_v47 = vpack.c.bf16 %v3380_v6, %v3379_v48 }
0x24a9   : > { %4878 = vmatmul.mubr.msk.bf16.vlgmr.msra.gmra.mrb[24].mxu0 %vm2489_vm14, %v3381_v47 }
0x24aa   : > { %4882 = vmatpush3.bf16.xpose.msra.mxu0 %v3437_v44  ;;  %4883 = vmatprep.mubr.msk.bf16.mxu0 %vm5375_vm12, %v5374_v43 }
0x24ab   : > { %4893 = vmatprep.subr.bf16.mxu0 %v5374_v43 }
0x24b1   : > { %4884 = vmatmul.mubr.msk.bf16.vlgmr.msra.gmra.mrb[28].mxu0 %vm2441_vm13, %v3430_v2 }
0x24b2   : > { %4894 = vmatpush3.bf16.xpose.msra.mxu0 %v3558_v38  ;;  %4895 = vmatprep.mubr.msk.bf16.mxu0 %vm5375_vm12, %v5374_v43 }
0x24b3   : > { %4905 = vmatprep.subr.bf16.mxu0 %v5374_v43 }
0x24b9   : > { %4896 = vmatmul.mubr.msk.bf16.vlgmr.msra.gmra.mrb[32].mxu0 %vm2441_vm13, %v3551_v42 }
0x24ba   : > { %4906 = vmatpush3.bf16.xpose.msra.mxu0 %v3679_v55  ;;  %4907 = vmatprep.mubr.msk.bf16.mxu0 %vm5375_vm12, %v5374_v43 }
0x24bb   : > { %4917 = vmatprep.subr.bf16.mxu0 %v5374_v43 }
0x24c1   : > { %4908 = vmatmul.mubr.msk.bf16.vlgmr.msra.gmra.mrb[36].mxu0 %vm2441_vm13, %v3672_v49 }
0x24c2   : > { %4918 = vmatpush3.bf16.msra.mxu0 %v6240_v34  ;;  %4921 = vmatprep.mubr.msk.bf16.mxu0 %vm5375_vm12, %v5374_v43 }
0x24c3   : > { %4919 = vmatprep.subr.bf16.mxu0 %v5374_v43 }
0x24c6   : > { %4920 = vmatpush3.bf16.msra.mxu0 %v6248_v8 }
0x24c7   : > { %4933 = vmatprep.subr.bf16.mxu0 %v5374_v43 }
0x257c   : > { %v6453_v63 = vpop.f32.mrb[24].mxu0 }
0x257d   : > { %v4879_v32 = vpop.f32.mrb[25].mxu0 }
0x257e   : > { %v6455_v7 = vpop.f32.mrb[26].mxu0 }
0x257f   : > { %v4880_v37 = vpop.f32.mrb[27].mxu0 }
0x2584   : > { %v3473_v0 = vpop.f32.mrb[28].mxu0 }
0x2585   : > { %v4885_v52 = vpop.f32.mrb[29].mxu0  ;;  %v3480_v56 = vsel %vm2489_vm14, %v3473_v0, -inf }
0x2586   : > { %3481 = vmax.xlane.f32.xlu0 %v3480_v56  ;;  %v3476_v34 = vpop.f32.mrb[30].mxu0 }
0x2587   : > { %v4886_v18 = vpop.f32.mrb[31].mxu0  ;;  %v3483_v19 = vsel %vm2489_vm14, %v3476_v34, -inf }
0x2588   : > { %3484 = vmax.xlane.f32.xlu1 %v3483_v19 }
0x258c   : > { %v3594_v21 = vpop.f32.mrb[32].mxu0 }
0x258d   : > { %v4897_v8 = vpop.f32.mrb[33].mxu0  ;;  %v3601_v22 = vsel %vm2489_vm14, %v3594_v21, -inf }
0x258e   : > { %3602 = vmax.xlane.f32.xlu0 %v3601_v22  ;;  %v3597_v24 = vpop.f32.mrb[34].mxu0 }
0x258f   : > { %v4898_v33 = vpop.f32.mrb[35].mxu0  ;;  %v3604_v25 = vsel %vm2489_vm14, %v3597_v24, -inf }
0x2592   : > { %3605 = vmax.xlane.f32.xlu0 %v3604_v25 }
0x2594   : > { %v3715_v10 = vpop.f32.mrb[36].mxu0 }
0x2595   : > { %v4909_v28 = vpop.f32.mrb[37].mxu0  ;;  %v3722_v30 = vsel %vm2489_vm14, %v3715_v10, -inf }
0x2596   : > { %3723 = vmax.xlane.f32.xlu0 %v3722_v30  ;;  %v3718_v60 = vpop.f32.mrb[38].mxu0 }
0x2597   : > { %v4910_v50 = vpop.f32.mrb[39].mxu0  ;;  %v3725_v36 = vsel %vm2489_vm14, %v3718_v60, -inf }
0x2598   : > { %3726 = vmax.xlane.f32.xlu1 %v3725_v36 }
0x2613   : > { %v3482_v41 = vpop.xlane.xlu0 %3481 }
0x2614   : > { %v3486_v1 = vsub.f32 %v3473_v0, %v3482_v41 }
0x2615   : > { %v3485_v29 = vpop.xlane.xlu1 %3484 }
0x2616   : > { %v3488_v15 = vmul.f32 1.442695, %v3486_v1  ;;  %v3487_v61 = vsub.f32 %v3476_v34, %v3485_v29 }
0x2618   : > { %5260 = vpow2.f32 %v3488_v15  ;;  %v3490_v3 = vmul.f32 1.442695, %v3487_v61 }
0x261a   : > { %5262 = vpow2.f32 %v3490_v3 }
0x261b   : > { %v3603_v31 = vpop.xlane.xlu0 %3602 }
0x261c   : > { %v3607_v12 = vsub.f32 %v3594_v21, %v3603_v31 }
0x261e   : > { %v3609_v13 = vmul.f32 1.442695, %v3607_v12 }
0x261f   : > { %v3606_v4 = vpop.xlane.xlu0 %3605 }
0x2620   : > { %5264 = vpow2.f32 %v3609_v13  ;;  %v3608_v14 = vsub.f32 %v3597_v24, %v3606_v4 }
0x2622   : > { %v5261_v62 = vpop.eup %5260  ;;  %v3611_v48 = vmul.f32 1.442695, %v3608_v14 }
0x2623   : > { %v3724_v6 = vpop.xlane.xlu0 %3723  ;;  %v3492_v47 = vsel %vm2489_vm14, %v5261_v62, 0.0 }
0x2624   : > { %v5263_v2 = vpop.eup %5262  ;;  %5266 = vpow2.f32 %v3611_v48  ;;  %v3728_v44 = vsub.f32 %v3715_v10, %v3724_v6  ;;  %3493 = vadd.xlane.f32.xlu0 %v3492_v47 }
0x2625   : > { %v3495_v27 = vsel %vm2489_vm14, %v5263_v2, 0.0  ;;  %v3727_v0 = vpop.xlane.xlu1 %3726 }
0x2626   : > { %v3730_v38 = vmul.f32 1.442695, %v3728_v44  ;;  %3496 = vadd.xlane.f32.xlu1 %v3495_v27  ;;  %v3729_v52 = vsub.f32 %v3718_v60, %v3727_v0 }
0x2628   : > { %5268 = vpow2.f32 %v3730_v38  ;;  %v3732_v56 = vmul.f32 1.442695, %v3729_v52 }
0x262a   : > { %v5265_v59 = vpop.eup %5264  ;;  %5270 = vpow2.f32 %v3732_v56 }
0x262b   : > { %v3613_v42 = vsel %vm2489_vm14, %v5265_v59, 0.0 }
0x262c   : > { %3614 = vadd.xlane.f32.xlu0 %v3613_v42 }
0x262e   : > { %v5267_v55 = vpop.eup %5266 }
0x262f   : > { %v3616_v49 = vsel %vm2489_vm14, %v5267_v55, 0.0 }
0x2630   : > { %3617 = vadd.xlane.f32.xlu1 %v3616_v49 }
0x2632   : > { %v5269_v32 = vpop.eup %5268 }
0x2633   : > { %v3734_v37 = vsel %vm2489_vm14, %v5269_v32, 0.0 }
0x2634   : > { %3735 = vadd.xlane.f32.xlu0 %v3734_v37  ;;  %v5271_v34 = vpop.eup %5270 }
0x2635   : > { %v3737_v18 = vsel %vm2489_vm14, %v5271_v34, 0.0 }
0x2641   : > { %3624 = vrot.lane.b32.xlu1 %v6390_v46, %s5384_s26 }
0x264a   : > { %3503 = vrot.lane.b32.xlu0 %v6390_v46, %s5385_s29 }
0x2665   : > { %3738 = vadd.xlane.f32.xlu1 %v3737_v18 }
0x2676   : > { %3745 = vrot.lane.b32.xlu1 %v6390_v46, %s5386_s12 }
0x26b1   : > { %v3494_v21 = vpop.xlane.xlu0 %3493 }
0x26b3   : > { %v3497_v19 = vpop.xlane.xlu1 %3496 }
0x26b4   : > { %5272 = vrcp.f32 %v3497_v19 }
0x26b5   : > { %5274 = vrcp.f32 %v3494_v21 }
0x26b9   : > { %v3615_v8 = vpop.xlane.xlu0 %3614 }
0x26bd   : > { %v3618_v22 = vpop.xlane.xlu1 %3617 }
0x26be   : > { %5276 = vrcp.f32 %v3618_v22  ;;  %v5273_v24 = vpop.eup %5272 }
0x26bf   : > { %5278 = vrcp.f32 %v3615_v8  ;;  %v5275_v25 = vpop.eup %5274  ;;  %v3501_v10 = vmul.f32 %v5273_v24, %v5263_v2 }
0x26c0   : > { %v3500_v28 = vmul.f32 %v5275_v25, %v5261_v62 }
0x26c1   : > { %v3736_v33 = vpop.xlane.xlu0 %3735  ;;  %v3625_v46 = vpop.permute.xlu1 %3624 }
0x26c2   : > { %v3502_v60 = vpack.c.bf16 %v3501_v10, %v3500_v28  ;;  %5280 = vrcp.f32 %v3736_v33 }
0x26c5   : > { %v3504_v30 = vpop.permute.xlu0 %3503 }
0x26c6   : > { %4888 = vmatpush3.bf16.msra.mxu1 %v3504_v30 }
0x26c7   : > { %4899 = vmatprep.subr.bf16.mxu1 %v5374_v43 }
0x26c8   : > { %v5277_v50 = vpop.eup %5276 }
0x26c9   : > { %4890 = vmatmul.mubr.msk.bf16.vlgmr.msra.gmra.mrb[32].mxu1 %vm2489_vm14, %v3502_v60  ;;  %v5279_v36 = vpop.eup %5278  ;;  %v3622_v41 = vmul.f32 %v5277_v50, %v5267_v55 }
0x26ca   : > { %4900 = vmatpush3.bf16.msra.mxu1 %v3625_v46  ;;  %4901 = vmatprep.mubr.msk.bf16.mxu1 %vm5375_vm12, %v5374_v43  ;;  %v3621_v1 = vmul.f32 %v5279_v36, %v5265_v59 }
0x26cb   : > { %4911 = vmatprep.subr.bf16.mxu1 %v5374_v43 }
0x26cc   : > { %v3623_v29 = vpack.c.bf16 %v3622_v41, %v3621_v1  ;;  %v5281_v3 = vpop.eup %5280 }
0x26cd   : > { %v3742_v12 = vmul.f32 %v5281_v3, %v5269_v32 }
0x26d1   : > { %4902 = vmatmul.mubr.msk.bf16.vlgmr.msra.gmra.mrb[36].mxu1 %vm2489_vm14, %v3623_v29 }
0x26d2   : > { %4913 = vmatprep.mubr.msk.bf16.mxu1 %vm5375_vm12, %v5374_v43 }
0x26f2   : > { %v3739_v15 = vpop.xlane.xlu1 %3738 }
0x26f3   : > { %5282 = vrcp.f32 %v3739_v15 }
0x26f6   : > { %v3746_v61 = vpop.permute.xlu1 %3745 }
0x26f7   : > { %4912 = vmatpush3.bf16.msra.mxu1 %v3746_v61 }
0x26f8   : > { %4925 = vmatprep.subr.bf16.mxu1 %v5374_v43 }
0x26fd   : > { %v5283_v31 = vpop.eup %5282 }
0x26fe   : > { %v3743_v13 = vmul.f32 %v5283_v31, %v5271_v34 }
0x2700   : > { %v3744_v4 = vpack.c.bf16 %v3743_v13, %v3742_v12 }
0x2702   : > { %4914 = vmatmul.mubr.msk.bf16.vlgmr.msra.gmra.mrb[40].mxu1 %vm2489_vm14, %v3744_v4 }
0x2703   : > { %4926 = vmatpush3.bf16.msra.mxu1 %v6298_v40  ;;  %4929 = vmatprep.mubr.msk.bf16.mxu1 %vm5375_vm12, %v5374_v43 }
0x2704   : > { %4927 = vmatprep.subr.bf16.mxu1 %v5374_v43 }
0x2707   : > { %4928 = vmatpush3.bf16.msra.mxu1 %v6304_v51 }
0x279c   : > { %v3543_v14 = vpop.f32.mrb[32].mxu1 }
0x279d   : > { %v4891_v62 = vpop.f32.mrb[33].mxu1 }
0x279e   : > { %v3546_v48 = vpop.f32.mrb[34].mxu1 }
0x279f   : > { %v5185_v6 = vpack.i.bf16 %v3546_v48, %v3543_v14  ;;  %v4892_v47 = vpop.f32.mrb[35].mxu1 }
0x27a1   : > { %5186 = vrot.lane.b32.xlu1 %v5185_v6, %s5387_s18 }
0x27a4   : > { %v3664_v2 = vpop.f32.mrb[36].mxu1 }
0x27a5   : > { %v4903_v44 = vpop.f32.mrb[37].mxu1 }
0x27a6   : > { %v3667_v27 = vpop.f32.mrb[38].mxu1 }
0x27a7   : > { %v5190_v38 = vpack.i.bf16 %v3667_v27, %v3664_v2  ;;  %v4904_v59 = vpop.f32.mrb[39].mxu1 }
0x27a9   : > { %5191 = vrot.lane.b32.xlu0 %v5190_v38, %s5388_s28 }
0x27d5   : > { %v3785_v40 = vpop.f32.mrb[40].mxu1 }
0x27d6   : > { %v4915_v42 = vpop.f32.mrb[41].mxu1 }
0x27d7   : > { %v3788_v55 = vpop.f32.mrb[42].mxu1 }
0x27d8   : > { %v5195_v49 = vpack.i.bf16 %v3788_v55, %v3785_v40  ;;  %v4916_v32 = vpop.f32.mrb[43].mxu1 }
0x27da   : > { %5196 = vrot.lane.b32.xlu1 %v5195_v49, %s5389_s16 }
0x2813   : > { %v5187_v51 = vpop.permute.xlu1 %5186 }
0x2814   : > { %v5189_v0 = vunpack.i.h.bf16 %v5187_v51  ;;  %v5188_v52 = vunpack.i.l.bf16 %v5187_v51 }
0x2816   : > { %v3817_v19 = vsel %vm2441_vm13, %v6455_v7, %v5189_v0  ;;  %v3816_v21 = vsel %vm2441_vm13, %v6453_v63, %v5188_v52 }
0x281b   : > { %v5192_v37 = vpop.permute.xlu0 %5191 }
0x281c   : > { %v5194_v56 = vunpack.i.h.bf16 %v5192_v37  ;;  %v5193_v34 = vunpack.i.l.bf16 %v5192_v37 }
0x281e   : > { %v3819_v24 = vsel %vm2489_vm14, %v3817_v19, %v5194_v56  ;;  %v3818_v33 = vsel %vm2489_vm14, %v3816_v21, %v5193_v34 }
0x284c   : > { %v5197_v18 = vpop.permute.xlu1 %5196 }
0x284d   : > { %v5199_v8 = vunpack.i.h.bf16 %v5197_v18  ;;  %v5198_v22 = vunpack.i.l.bf16 %v5197_v18 }
0x284f   : > { %v3821_v25 = vsel %vm2951_vm15, %v3819_v24, %v5199_v8  ;;  %v3820_v10 = vsel %vm2951_vm15, %v3818_v33, %v5198_v22 }
0x2850   : > { %v3822_v28 = vpack.c.bf16 %v3821_v25, %v3820_v10 }
0x2852   : > { %4922 = vmatmul.mubr.msk.bf16.vlgmr.msra.gmra.mrb[40].mxu0 %vm2336_vm11, %v3822_v28 }
0x2853   : > { %4934 = vmatpush3.bf16.msra.mxu0 %v6336_v57  ;;  %4949 = vmatprep.mubr.msk.bf16.mxu0 %vm5375_vm12, %v5374_v43 }
0x2854   : > { %4935 = vmatprep.subr.bf16.mxu0 %v5374_v43 }
0x2857   : > { %4936 = vmatpush3.bf16.msra.mxu0 %v6342_v53 }
0x2858   : > { %4937 = vmatprep.subr.bf16.mxu0 %v5374_v43 }
0x285b   : > { %4938 = vmatpush3.bf16.msra.mxu0 %v6348_v58 }
0x285c   : > { %4939 = vmatprep.subr.bf16.mxu0 %v5374_v43 }
0x285f   : > { %4940 = vmatpush3.bf16.msra.mxu0 %v6354_v16 }
0x2860   : > { %4941 = vmatprep.subr.bf16.mxu0 %v5374_v43 }
0x2863   : > { %4942 = vmatpush3.bf16.msra.mxu0 %v6360_v17 }
0x2864   : > { %4943 = vmatprep.subr.bf16.mxu0 %v5374_v43 }
0x2867   : > { %4944 = vmatpush3.bf16.msra.mxu0 %v6366_v20 }
0x2868   : > { %4945 = vmatprep.subr.bf16.mxu0 %v5374_v43 }
0x286b   : > { %4946 = vmatpush3.bf16.msra.mxu0 %v6372_v23 }
0x286c   : > { %4947 = vmatprep.subr.bf16.mxu0 %v5374_v43 }
0x286f   : > { %4948 = vmatpush3.bf16.msra.mxu0 %v6378_v26 }
0x2925   : > { %v3860_v57 = vpop.f32.mrb[40].mxu0 }
0x2926   : > { %v3861_v53 = vadd.f32 %v3860_v57, %v6266_v54  ;;  %v4923_v58 = vpop.f32.mrb[41].mxu0 }
0x2927   : > { %v3863_v16 = vpop.f32.mrb[42].mxu0 }
0x2928   : > { %v6521_v63 = vadd.f32 %v3861_v53, %v6273_v5  ;;  %v3864_v17 = vadd.f32 %v3863_v16, %v6266_v54  ;;  %v4924_v7 = vpop.f32.mrb[43].mxu0 }
0x292a   : > { %v6525_v20 = vadd.f32 %v3864_v17, %v6284_v35  ;;  %v3869_v23 = vsel %vm2336_vm11, %v6521_v63, 0.0 }
0x292b   : > { %3870 = vadd.xlane.f32.xlu0 %v3869_v23 }
0x292c   : > { %v3872_v43 = vsel %vm2336_vm11, %v6525_v20, 0.0 }
0x292d   : > { %3873 = vadd.xlane.f32.xlu1 %v3872_v43 }
0x29b8   : > { %v3871_v26 = vpop.xlane.xlu0 %3870 }
0x29b9   : > { %v3875_v30 = vmul.f32 0.03125, %v3871_v26 }
0x29ba   : > { %v3874_v60 = vpop.xlane.xlu1 %3873 }
0x29bb   : > { %v3877_v5 = vsub.f32 %v6521_v63, %v3875_v30  ;;  %v3876_v50 = vmul.f32 0.03125, %v3874_v60 }
0x29bd   : > { %v3878_v54 = vsub.f32 %v6525_v20, %v3876_v50  ;;  %v3879_v46 = vmul.f32 %v3877_v5, %v3877_v5 }
0x29bf   : > { %v3881_v35 = vsel %vm2336_vm11, %v3879_v46, 0.0  ;;  %v3880_v36 = vmul.f32 %v3878_v54, %v3878_v54 }
0x29c0   : > { %3882 = vadd.xlane.f32.xlu0 %v3881_v35 }
0x29c1   : > { %v3884_v41 = vsel %vm2336_vm11, %v3880_v36, 0.0 }
0x29c4   : > { %3885 = vadd.xlane.f32.xlu0 %v3884_v41 }
0x2a4d   : > { %v3883_v1 = vpop.xlane.xlu0 %3882 }
0x2a4e   : > { %v3887_v29 = vmul.f32 0.03125, %v3883_v1 }
0x2a50   : > { %v3889_v15 = vadd.f32 1e-05, %v3887_v29 }
0x2a51   : > { %v3886_v61 = vpop.xlane.xlu0 %3885 }
0x2a52   : > { %5284 = vrsqrt.f32 %v3889_v15  ;;  %v3888_v3 = vmul.f32 0.03125, %v3886_v61 }
0x2a54   : > { %v3890_v31 = vadd.f32 1e-05, %v3888_v3 }
0x2a56   : > { %5286 = vrsqrt.f32 %v3890_v31 }
0x2a5c   : > { %v5285_v12 = vpop.eup %5284 }
0x2a5d   : > { %v3893_v13 = vmul.f32 %v5285_v12, %v3877_v5 }
0x2a5f   : > { %v3895_v14 = vmul.f32 %v3893_v13, %v6310_v39 }
0x2a60   : > { %v5287_v4 = vpop.eup %5286 }
0x2a61   : > { %v3894_v62 = vmul.f32 %v5287_v4, %v3878_v54  ;;  %v3897_v6 = vadd.f32 %v3895_v14, %v6315_v9 }
0x2a63   : > { %v3896_v48 = vmul.f32 %v3894_v62, %v6310_v39 }
0x2a65   : > { %v3898_v47 = vadd.f32 %v3896_v48, %v6315_v9 }
0x2a67   : > { %v3899_v2 = vpack.c.bf16 %v3898_v47, %v3897_v6 }
0x2a69   : > { %4930 = vmatmul.mubr.msk.bf16.vlgmr.msra.gmra.mrb[44].mxu1 %vm2336_vm11, %v3899_v2 }
0x2b3c   : > { %v3937_v44 = vpop.f32.mrb[44].mxu1 }
0x2b3d   : > { %v3938_v27 = vadd.f32 %v3937_v44, %v6384_v11  ;;  %v4931_v38 = vpop.f32.mrb[45].mxu1 }
0x2b3e   : > { %v3940_v59 = vpop.f32.mrb[46].mxu1 }
0x2b3f   : > { %v4426_v40 = vmul.f32 -1.702, %v3938_v27  ;;  %v3941_v42 = vadd.f32 %v3940_v59, %v6384_v11  ;;  %v4932_v55 = vpop.f32.mrb[47].mxu1 }
0x2b41   : > { %v3948_v49 = vmul.f32 1.442695, %v4426_v40  ;;  %v4427_v32 = vmul.f32 -1.702, %v3941_v42 }
0x2b43   : > { %5288 = vpow2.f32 %v3948_v49  ;;  %v3950_v39 = vmul.f32 1.442695, %v4427_v32 }
0x2b45   : > { %5290 = vpow2.f32 %v3950_v39 }
0x2b4d   : > { %v5289_v51 = vpop.eup %5288 }
0x2b4e   : > { %v3952_v37 = vadd.f32 1.0, %v5289_v51 }
0x2b4f   : > { %v5291_v9 = vpop.eup %5290 }
0x2b50   : > { %5292 = vrcp.f32 %v3952_v37  ;;  %v3953_v0 = vadd.f32 1.0, %v5291_v9 }
0x2b52   : > { %5294 = vrcp.f32 %v3953_v0 }
0x2b5a   : > { %v5293_v52 = vpop.eup %5292 }
0x2b5b   : > { %v3958_v34 = vmul.f32 %v5293_v52, %v3938_v27 }
0x2b5c   : > { %v5295_v56 = vpop.eup %5294 }
0x2b5d   : > { %v3959_v18 = vmul.f32 %v5295_v56, %v3941_v42 }
0x2b5f   : > { %v3960_v19 = vpack.c.bf16 %v3959_v18, %v3958_v34 }
0x2b61   : > { %4950 = vmatmul.mubr.bf16.vlgmr.msra.gmra.mrb[44].mxu0 %v3960_v19 }
0x2c34   : > { %v3995_v21 = vpop.f32.mrb[44].mxu0 }
0x2c35   : > { %v3996_v11 = vadd.f32 %v3995_v21, %v6412_v45  ;;  %v4951_v8 = vpop.f32.mrb[45].mxu0 }
0x2c36   : > { %v3998_v22 = vpop.f32.mrb[46].mxu0 }
0x2c37   : > { %v4002_v24 = vadd.f32 %v3996_v11, %v6521_v63  ;;  %v3999_v33 = vadd.f32 %v3998_v22, %v6412_v45  ;;  %v4952_v25 = vpop.f32.mrb[47].mxu0 }
0x2c39   : > { %4004 = vst.msk [vmem:[#allocation2 + $0x10] sm:$0xff] %vm2336_vm11, %v4002_v24  ;;  %v4003_v10 = vadd.f32 %v3999_v33, %v6525_v20 }
0x2c3b   : > { %4005 = vst.msk [vmem:[#allocation2 + $0x18] sm:$0xff] %vm2336_vm11, %v4003_v10 }
0x2c3c PF: > { %p4428_p8 = scmp.ne.s32.totalorder %s5348_s13, 3 }
0x2c3d   : > { %v4012_v28 = vld [vmem:[#allocation2] sm:$0x1] (!%p4428_p8)  ;;  %vm4013_vm0 = vcmask (!%p4428_p8), 253952   ;;  %v5390_v5 = vmov (!%p4428_p8), 0.0   ;;  %v5297_v50 = vld [vmem:[%s6611_s3 + $0x8] sm:$0xff] (!%p4428_p8)   ;;  %vm5391_vm1 = vmmov (!%p4428_p8), 0  }
0x2c3e   : > { %4009 = sbr.rel (%p4428_p8) target bundleno = 11860 (0x2e54), region = 76  ;;  %v4014_v53 = vsel (!%p4428_p8), %vm4013_vm0, %v4012_v28, 0.0  ;;  %v5296_v60 = vld [vmem:[%s6611_s3] sm:$0xff] (!%p4428_p8)   ;;  %4953 = vmatprep.subr.bf16.mxu0 (!%p4428_p8), %v5390_v5  ;;  %4961 = vmatprep.subr.bf16.mxu1 (!%p4428_p8), %v5390_v5  ;;  %v5299_v46 = vld [vmem:[%s6611_s3 + $0x8] sm:$0xff] (!%p4428_p8)   ;;  %vm4047_vm2 = vcmask (!%p4428_p8), 261120   ;;  %vm4091_vm3 = vcmask (!%p4428_p8), 122880  }
0x2c3f   : > { %4015 = vadd.xlane.f32.xlu0 (!%p4428_p8), %v4014_v53  ;;  %4954 = vmatpush3.bf16.msra.mxu0 (!%p4428_p8), %v5296_v60  ;;  %v5298_v54 = vld [vmem:[%s6611_s3] sm:$0xff] (!%p4428_p8)  }
0x2c40   : > { %v4094_v57 = vld [vmem:[#allocation2 + $0x10] sm:$0x1] (!%p4428_p8)  ;;  %4955 = vmatprep.subr.bf16.mxu0 (!%p4428_p8), %v5390_v5  ;;  %4962 = vmatpush3.bf16.msra.mxu1 (!%p4428_p8), %v5298_v54  ;;  %v4010_v3 = vld [vmem:[%s6610_s2 + $0x2] sm:$0x1] (!%p4428_p8)  ;;  %v4011_v12 = vld [vmem:[%s6610_s2 + $0x3] sm:$0x1] (!%p4428_p8) }
0x2c41   : > { %v4095_v58 = vsel (!%p4428_p8), %vm4013_vm0, %v4094_v57, 0.0  ;;  %4957 = vmatprep.mubr.msk.bf16.mxu0 (!%p4428_p8), %vm5391_vm1, %v5390_v5  ;;  %4963 = vmatprep.subr.bf16.mxu1 (!%p4428_p8), %v5390_v5 }
0x2c42   : > { %4965 = vmatprep.mubr.msk.bf16.mxu1 (!%p4428_p8), %vm5391_vm1, %v5390_v5 }
0x2c43   : > { %4096 = vadd.xlane.f32.xlu0 (!%p4428_p8), %v4095_v58  ;;  %4956 = vmatpush3.bf16.msra.mxu0 (!%p4428_p8), %v5297_v50 }
0x2c44   : > { %4964 = vmatpush3.bf16.msra.mxu1 (!%p4428_p8), %v5299_v46 }
0x2ccc   : > { %v4016_v45 = vpop.xlane.xlu0 %4015 }
0x2ccd   : > { %v4018_v16 = vmul.f32 0.03125, %v4016_v45 }
0x2ccf   : > { %v4019_v63 = vsub.f32 %v4012_v28, %v4018_v16 }
0x2cd0   : > { %v4097_v17 = vpop.xlane.xlu0 %4096 }
0x2cd1   : > { %v4098_v7 = vmul.f32 0.03125, %v4097_v17  ;;  %v4020_v20 = vmul.f32 %v4019_v63, %v4019_v63 }
0x2cd3   : > { %v4099_v23 = vsub.f32 %v4094_v57, %v4098_v7  ;;  %v4021_v43 = vsel %vm4013_vm0, %v4020_v20, 0.0 }
0x2cd4   : > { %4022 = vadd.xlane.f32.xlu1 %v4021_v43 }
0x2cd5   : > { %v4100_v26 = vmul.f32 %v4099_v23, %v4099_v23 }
0x2cd7   : > { %v4101_v30 = vsel %vm4013_vm0, %v4100_v26, 0.0 }
0x2cd8   : > { %4102 = vadd.xlane.f32.xlu1 %v4101_v30 }
0x2d61   : > { %v4023_v35 = vpop.xlane.xlu1 %4022 }
0x2d62   : > { %v4024_v36 = vmul.f32 0.03125, %v4023_v35 }
0x2d64   : > { %v4025_v41 = vadd.f32 1e-05, %v4024_v36 }
0x2d65   : > { %v4103_v1 = vpop.xlane.xlu1 %4102 }
0x2d66   : > { %5300 = vrsqrt.f32 %v4025_v41  ;;  %v4104_v29 = vmul.f32 0.03125, %v4103_v1 }
0x2d68   : > { %v4105_v15 = vadd.f32 1e-05, %v4104_v29 }
0x2d6a   : > { %5302 = vrsqrt.f32 %v4105_v15 }
0x2d70   : > { %v5301_v61 = vpop.eup %5300 }
0x2d71   : > { %v4027_v31 = vmul.f32 %v5301_v61, %v4019_v63 }
0x2d73   : > { %v4028_v13 = vmul.f32 %v4027_v31, %v4010_v3 }
0x2d74   : > { %v5303_v4 = vpop.eup %5302 }
0x2d75   : > { %v4107_v14 = vmul.f32 %v5303_v4, %v4099_v23  ;;  %v4029_v62 = vadd.f32 %v4028_v13, %v4011_v12 }
0x2d77   : > { %v4030_v48 = vpack.c.bf16 %v4029_v62, %v4029_v62  ;;  %v4108_v6 = vmul.f32 %v4107_v14, %v4010_v3 }
0x2d79   : > { %4958 = vmatmul.mubr.msk.bf16.vlgmr.msra.gmra.mrb[0].mxu0 %vm4047_vm2, %v4030_v48  ;;  %v4109_v47 = vadd.f32 %v4108_v6, %v4011_v12 }
0x2d7b   : > { %v4110_v2 = vpack.c.bf16 %v4109_v47, %v4109_v47 }
0x2d7d   : > { %4966 = vmatmul.mubr.msk.bf16.vlgmr.msra.gmra.mrb[0].mxu1 %vm4047_vm2, %v4110_v2 }
0x2e4c   : > { %v4085_v44 = vpop.f32.mrb[0].mxu0 }
0x2e4d   : > { %4092 = vst.msk [vmem:[#allocation3] sm:$0x1] %vm4091_vm3, %v4085_v44  ;;  %v4959_v27 = vpop.f32.mrb[1].mxu0 }
0x2e4e   : > { %v4088_v38 = vpop.f32.mrb[2].mxu0 }
0x2e4f   : > { %v4960_v59 = vpop.f32.mrb[3].mxu0 }
0x2e50   : > { %v4164_v40 = vpop.f32.mrb[0].mxu1 }
0x2e51   : > { %4171 = vst.msk [vmem:[#allocation3 + $0x1] sm:$0x1] %vm4091_vm3, %v4164_v40  ;;  %v4967_v42 = vpop.f32.mrb[1].mxu1 }
0x2e52   : > { %v4167_v55 = vpop.f32.mrb[2].mxu1 }
0x2e53   : > { %v4968_v49 = vpop.f32.mrb[3].mxu1 }
0x2e54 PF: > { %s6672_s5 = sadd.s32 4294967295, %s5356_s15   ;;  %s5392_s26 = smov [#allocation3]  }
0x2e55   : > { %p6573_p9 = scmp.eq.s32.totalorder %s6672_s5, 3  ;;  %s4181_s29 = sshll.u32 %s5392_s26, 4  ;;  %s4182_s29 = int_to_ptr.vmem [resolvable:$true] %s4181_s29 }
0x2e56   : > { %s5304_s12 = scalar_lea.vmem %s4182_s29, 32  ;;  %p5311_p13 = scmp.lt.s32.totalorder %s4182_s29, %s4182_s29 }
0x2e57   : > { %p5305_p10 = scmp.ne.s32.totalorder %s4182_s29, %s5304_s12  ;;  %p5312_p0 = scmp.lt.s32.totalorder %s5304_s12, %s5304_s12 }
0x2e59   : > { %p5306_p11 = pnand %p5305_p10, %p6573_p9  ;;  %p5313_p1 = por %p5312_p0, %p5311_p13 }
0x2e5b   : > { %p5307_p12 = pneg %p5306_p11 }
0x2e5d   : > { %p5314_p2 = pnand %p5313_p1, %p5307_p12 }
0x2e5f   : > { %5317 = shalt.err (!%p5314_p2)
}
0x2e60   : > { %s5318_s16 = scalar_lea.hbm %s6618_s10, 32 }
0x2e61   : > { %p5319_p3 = scmp.ne.s32.totalorder %s6618_s10, %s5318_s16  ;;  %p5324_p6 = scmp.lt.u32.totalorder %s5318_s16, %s6618_s10 }
0x2e63   : > { %p5320_p4 = pnand %p5319_p3, %p6573_p9 }
0x2e65   : > { %p5321_p5 = pneg %p5320_p4 }
0x2e67   : > { %p5326_p7 = pnand %p5324_p6, %p5321_p5 }
0x2e69   : > { %5329 = shalt.err (!%p5326_p7)
}
0x2e6a   : > { %s5393_s21 = smov 16   ;;  %s5394_s22 = smov 1  }
0x2e6b   : > { %4970 = dma.vmem_to_hbm [thread:$0]  (%p6573_p9), %s4182_s29, 32, %s6618_s10, [#allocation4], %s5393_s21, %s5393_s21, %s5394_s22  }
0x2e6c   : > { %5343 = dma.done.wait (%p6573_p9), [#allocation4], 32  }
0x2e6d   : > { %5345 = vsyncadd (%p6573_p9), [#allocation4], 4294967264 }
0x2e6e PF: > { %s21_s15 = sadd.s32 1, %s5356_s15   ;;  %s6674_s19 = sld [smem:[#allocation6_spill]] }
0x2e6f   : > { %p18_p8 = scmp.ge.s32.totalorder %s21_s15, 6   ;;  %s6675_s13 = smov %s5352_s14 }
0x2e71   :  { %20 = sbr.rel (!%p18_p8) target bundleno = 5 (0x5), region = 132 }
0x2e74   : > { %s6676_s14 = smov %s6674_s19 }
0x2e78   :  { %4197 = vsyncpa [#allocation4], 1 }
0x2e79   :  { %4199 = vsyncpa [#allocation4 + $0x1], 1 }

</bundles_post_ra>
